<compile_context>
chip_gen: v5e
topology: v5e:2x2
jax: 0.10.0
libtpu: 0.0.40
codegen_flags: <defaults>
</compile_context>

<pallas_src>
import jax
import jax.numpy as jnp
from jax import lax
from jax.experimental import pallas as pl
from jax.experimental.pallas import tpu as pltpu

IN_FEATURES = 784    # 1 * 28 * 28, fixed by the module
OUT_FEATURES = 10
LANE = 128           # lane-dense output width (>= OUT_FEATURES)


def _round_up(n, m):
    return ((n + m - 1) // m) * m


def dense_mlp_kernel(x_ref, w1_ref, w2_ref, o_ref):
    """Fused 2-layer MLP for one batch tile.

    x_ref:  [bm, 784]        bf16 activations
    w1_ref: [width_p, 784]   bf16 W1 in PyTorch [out, in] layout (no wrapper transpose)
    w2_ref: [128, width_p]   bf16 W2, zero-padded rows 10..127 / cols width..width_p
    o_ref:  [bm, 128]        f32 lane-dense logits (columns :10 are the real outputs)
    """
    # relu(x @ W1^T): contract x dim 1 with W1 dim 1 (transposed-RHS on the MXU).
    h = lax.dot_general(
        x_ref[...], w1_ref[...],
        dimension_numbers=(((1,), (1,)), ((), ())),
        preferred_element_type=jnp.float32)            # [bm, width_p] f32 acc (MXU)
    h = jnp.maximum(h, 0.0)                            # ReLU on f32 accumulator (VPU)

    # h @ W2^T into a lane-dense 128-wide slab.
    out = lax.dot_general(
        h.astype(w2_ref.dtype), w2_ref[...],
        dimension_numbers=(((1,), (1,)), ((), ())),
        preferred_element_type=jnp.float32)            # [bm, 128] (MXU)
    o_ref[...] = out.astype(o_ref.dtype)               # full-width (unmasked) stores


def prepare_params(w1, w2, *, compute_dtype=jnp.bfloat16):
    """One-time weight prep (call once, outside the per-step forward).

    w1: [width, 784], w2: [10, width]  (PyTorch nn.Linear weight layout [out, in]).
    Returns zero-padded, bf16-cast weights:
      w1p: [width_p, 784], w2p: [128, width_p]  with width_p = round_up(width, 128).
    Padding with zeros is numerically exact.
    """
    width = w1.shape[0]
    assert w1.shape == (width, IN_FEATURES)
    assert w2.shape == (OUT_FEATURES, width)
    width_p = _round_up(width, LANE)
    w1p = jnp.pad(w1, ((0, width_p - width), (0, 0))).astype(compute_dtype)
    w2p = jnp.pad(w2, ((0, LANE - OUT_FEATURES), (0, width_p - width))).astype(compute_dtype)
    return w1p, w2p


def dense_model_forward(x_nchw, w1p, w2p, *, bm=512, compute_dtype=jnp.bfloat16):
    """x_nchw: [B, C, H, W] with C*H*W == 784; w1p/w2p from prepare_params()."""
    B = x_nchw.shape[0]
    x = x_nchw.reshape(B, -1).astype(compute_dtype)     # Flatten(): view(B, -1)
    assert x.shape[1] == IN_FEATURES
    width_p = w1p.shape[0]

    # Shrink the tile for tiny batches; pad the batch to a tile multiple otherwise.
    # (Default bm=512 keeps double-buffered x + weights ~10 MiB of VMEM, safe on
    #  v5e/v6e/v7x, and yields >=2 grid steps for realistic batch sizes so the
    #  "parallel" batch axis can shard across v7x's 2 TensorCores.)
    bm = min(bm, _round_up(B, 8))
    Bp = _round_up(B, bm)
    if Bp != B:
        x = jnp.pad(x, ((0, Bp - B), (0, 0)))
    grid = (Bp // bm,)

    itemsize = jnp.dtype(compute_dtype).itemsize
    flops = 2 * Bp * (IN_FEATURES * width_p + width_p * LANE)
    bytes_accessed = (Bp * IN_FEATURES * itemsize        # streamed activations
                      + w1p.size * itemsize + w2p.size * itemsize
                      + Bp * LANE * 4)                    # f32 logits slab

    out_padded = pl.pallas_call(
        dense_mlp_kernel,
        out_shape=jax.ShapeDtypeStruct((Bp, LANE), jnp.float32),
        grid=grid,
        in_specs=[
            pl.BlockSpec((bm, IN_FEATURES), lambda i: (i, 0)),       # x tile
            pl.BlockSpec((width_p, IN_FEATURES), lambda i: (0, 0)),  # W1 (resident)
            pl.BlockSpec((LANE, width_p), lambda i: (0, 0)),         # W2 (resident)
        ],
        out_specs=pl.BlockSpec((bm, LANE), lambda i: (i, 0)),
        compiler_params=pltpu.CompilerParams(
            dimension_semantics=("parallel",),
            vmem_limit_bytes=32 * 1024 * 1024),
        cost_estimate=pl.CostEstimate(
            flops=flops, transcendentals=0, bytes_accessed=bytes_accessed),
    )(x, w1p, w2p)

    # Drop batch padding and the lane padding of the output slab.
    return out_padded[:B, :OUT_FEATURES]


if __name__ == "__main__":
    key = jax.random.PRNGKey(0)
    kx, k1, k2 = jax.random.split(key, 3)

    # Small deterministic example consistent with the module (MNIST-like input,
    # default hidden width=1000 -> padded to 1024 inside prepare_params).
    B, C, H, W = 16, 1, 28, 28
    WIDTH = 1000  # DEFAULT_WIDTH from the PyTorch module

    x = jax.random.normal(kx, (B, C, H, W), dtype=jnp.float32)
    w1 = jax.random.normal(k1, (WIDTH, IN_FEATURES), dtype=jnp.float32) * (1.0 / IN_FEATURES ** 0.5)
    w2 = jax.random.normal(k2, (OUT_FEATURES, WIDTH), dtype=jnp.float32) * (1.0 / WIDTH ** 0.5)

    w1p, w2p = prepare_params(w1, w2)          # one-time weight prep (no per-call transpose)
    out = dense_model_forward(x, w1p, w2p)
    out = jax.block_until_ready(out)
    assert out.shape == (B, OUT_FEATURES)

    # Reference 1: same bf16 input/weight rounding, f32 accumulation (tight check).
    xb = x.reshape(B, -1).astype(jnp.bfloat16)
    h_ref = jnp.maximum(
        jnp.dot(xb, w1.astype(jnp.bfloat16).T, preferred_element_type=jnp.float32), 0.0)
    ref_bf16 = jnp.dot(h_ref.astype(jnp.bfloat16), w2.astype(jnp.bfloat16).T,
                       preferred_element_type=jnp.float32)
    assert jnp.allclose(out, ref_bf16, atol=2e-2, rtol=2e-2), \
        float(jnp.max(jnp.abs(out - ref_bf16)))

    # Reference 2: full-precision PyTorch-equivalent math (loose check, bf16 rounding).
    ref_f32 = jnp.maximum(x.reshape(B, -1) @ w1.T, 0.0) @ w2.T
    assert jnp.allclose(out, ref_f32, atol=1e-1, rtol=1e-1), \
        float(jnp.max(jnp.abs(out - ref_f32)))

    print("KERNEL_OK")
</pallas_src>

<mosaic_0001>
module attributes {stable_mosaic.version = 11 : i64} {
  func.func @dense_mlp_kernel(%arg0: i32, %arg1: memref<16x784xbf16, #tpu.memory_space<vmem>>, %arg2: memref<1024x784xbf16, #tpu.memory_space<vmem>>, %arg3: memref<128x1024xbf16, #tpu.memory_space<vmem>>, %arg4: memref<16x128xf32, #tpu.memory_space<vmem>>) attributes {dimension_semantics = [#tpu.dimension_semantics<parallel>], iteration_bounds = array<i64: 1>, scalar_prefetch = 0 : i64, scratch_operands = 0 : i64, tpu.core_type = #tpu.core_type<tc>, window_params = [{transform_indices = @transform_0, window_bounds = array<i64: 16, 784>}, {pipeline_mode = #tpu.pipeline_mode<synchronous>, transform_indices = @transform_1, window_bounds = array<i64: 1024, 784>}, {pipeline_mode = #tpu.pipeline_mode<synchronous>, transform_indices = @transform_2, window_bounds = array<i64: 128, 1024>}, {transform_indices = @transform_3, window_bounds = array<i64: 16, 128>}]} {
    %c0 = arith.constant 0 : index
    %c0_0 = arith.constant 0 : index
    %0 = vector.load %arg1[%c0, %c0_0] : memref<16x784xbf16, #tpu.memory_space<vmem>>, vector<16x784xbf16>
    %c0_1 = arith.constant 0 : index
    %c0_2 = arith.constant 0 : index
    %1 = vector.load %arg2[%c0_1, %c0_2] : memref<1024x784xbf16, #tpu.memory_space<vmem>>, vector<1024x784xbf16>
    %cst = arith.constant dense<0.000000e+00> : vector<16x1024xf32>
    %2 = tpu.matmul %0, %1, %cst {dimension_numbers = #tpu.dot_dimension_numbers<[1], [1], [0], [0], [0, 0, 1, 0], [], []>} : vector<16x784xbf16>, vector<1024x784xbf16>, vector<16x1024xf32> -> vector<16x1024xf32>
    %cst_3 = arith.constant 0.000000e+00 : f32
    %3 = vector.broadcast %cst_3 : f32 to vector<16x1024xf32>
    %4 = arith.maximumf %2, %3 : vector<16x1024xf32>
    %5 = arith.truncf %4 : vector<16x1024xf32> to vector<16x1024xbf16>
    %c0_4 = arith.constant 0 : index
    %c0_5 = arith.constant 0 : index
    %6 = vector.load %arg3[%c0_4, %c0_5] : memref<128x1024xbf16, #tpu.memory_space<vmem>>, vector<128x1024xbf16>
    %cst_6 = arith.constant dense<0.000000e+00> : vector<16x128xf32>
    %7 = tpu.matmul %5, %6, %cst_6 {dimension_numbers = #tpu.dot_dimension_numbers<[1], [1], [0], [0], [0, 0, 1, 0], [], []>} : vector<16x1024xbf16>, vector<128x1024xbf16>, vector<16x128xf32> -> vector<16x128xf32>
    %c0_7 = arith.constant 0 : index
    %c0_8 = arith.constant 0 : index
    %8 = vector.load %arg4[%c0_7, %c0_8] : memref<16x128xf32, #tpu.memory_space<vmem>>, vector<16x128xf32>
    tpu.vector_store %arg4[%c0_7, %c0_8], %7 {strides = array<i32>} : memref<16x128xf32, #tpu.memory_space<vmem>>, vector<16x128xf32>,
    return
  }
  func.func @transform_0(%arg0: i32) -> (i32, i32) {
    %c0_i32 = arith.constant 0 : i32
    %c0_i32_0 = arith.constant 0 : i32
    return %arg0, %c0_i32 : i32, i32
  }
  func.func @transform_1(%arg0: i32) -> (i32, i32) {
    %c0_i32 = arith.constant 0 : i32
    %c0_i32_0 = arith.constant 0 : i32
    %c0_i32_1 = arith.constant 0 : i32
    return %c0_i32, %c0_i32_0 : i32, i32
  }
  func.func @transform_2(%arg0: i32) -> (i32, i32) {
    %c0_i32 = arith.constant 0 : i32
    %c0_i32_0 = arith.constant 0 : i32
    %c0_i32_1 = arith.constant 0 : i32
    return %c0_i32, %c0_i32_0 : i32, i32
  }
  func.func @transform_3(%arg0: i32) -> (i32, i32) {
    %c0_i32 = arith.constant 0 : i32
    %c0_i32_0 = arith.constant 0 : i32
    return %arg0, %c0_i32 : i32, i32
  }
}

</mosaic_0001>

<bundles_post_ra>
// kernel: tpu_custom_call.1
= control target key start
LH: loop header
LB: loop body
LE: loop exit
PB: predicated region body
PF: predicated region fallthrough
CT: control target
= control target key end

     0   :  { %s10427_s0 = inlined_call_operand.vmem [shape: bf16[16,784], index: 0, kind: input, shape index: {}]   ;;  %s10428_s1 = inlined_call_operand.vmem [shape: bf16[1024,784], index: 1, kind: input, shape index: {}]   ;;  %s10429_s2 = inlined_call_operand.vmem [shape: bf16[128,1024], index: 2, kind: input, shape index: {}]   ;;  %s10430_s3 = inlined_call_operand.hbm [shape: f32[16,128], index: 3, kind: output, shape index: {}]  }
   0x1   :  { %v4556_v0 = vld [vmem:[%s10428_s1 + $0x188] sm:$0xf]  ;;  %v6473_v1 = vld [vmem:[%s10428_s1 + $0x1a0] sm:$0xf0]  ;;  %v6470_v2 = vld [vmem:[%s10428_s1 + $0x18c] sm:$0xf] }
   0x2   :  { %v4557_v3 = vor.u32 %v6473_v1, %v4556_v0  ;;  %v4558_v4 = vld [vmem:[%s10428_s1 + $0x1a4] sm:$0xf0]  ;;  %v4564_v5 = vld [vmem:[%s10428_s1 + $0x190] sm:$0xf]  ;;  %v6474_v6 = vld [vmem:[%s10428_s1 + $0x1a8] sm:$0xf0] }
   0x3   :  { %v4561_v7 = vor.u32 %v6470_v2, %v4558_v4  ;;  %v4565_v8 = vor.u32 %v6474_v6, %v4564_v5  ;;  %v6471_v9 = vld [vmem:[%s10428_s1 + $0x194] sm:$0xf]  ;;  %v4566_v10 = vld [vmem:[%s10428_s1 + $0x1ac] sm:$0xf0]  ;;  %v6466_v13 = vld [vmem:[%s10428_s1 + $0x168] sm:$0xf0] }
   0x4   :  { %3006 = vmatpush.bf16.xpose.msra.mxu0 %v4557_v3  ;;  %v4569_v11 = vor.u32 %v6471_v9, %v4566_v10  ;;  %v4528_v12 = vld [vmem:[%s10428_s1 + $0x150] sm:$0xf]  ;;  %v6463_v14 = vld [vmem:[%s10428_s1 + $0x154] sm:$0xf]  ;;  %v4536_v16 = vld [vmem:[%s10428_s1 + $0x158] sm:$0xf] }
   0x5   :  { %3020 = vmatpush.bf16.xpose.msra.mxu1 %v4561_v7  ;;  %3034 = vmatpush.bf16.xpose.msra.mxu2 %v4565_v8  ;;  %v4530_v15 = vld [vmem:[%s10428_s1 + $0x16c] sm:$0xf0]  ;;  %v6467_v17 = vld [vmem:[%s10428_s1 + $0x170] sm:$0xf0]  ;;  %v6464_v18 = vld [vmem:[%s10428_s1 + $0x15c] sm:$0xf]  ;;  %v4529_v20 = vor.u32 %v6466_v13, %v4528_v12 }
   0x6   :  { %3048 = vmatpush.bf16.xpose.msra.mxu3 %v4569_v11  ;;  %v4538_v19 = vld [vmem:[%s10428_s1 + $0x174] sm:$0xf0]  ;;  %v4533_v21 = vor.u32 %v6463_v14, %v4530_v15  ;;  %v4537_v22 = vor.u32 %v6467_v17, %v4536_v16  ;;  %v6459_v25 = vld [vmem:[%s10428_s1 + $0x130] sm:$0xf0]  ;;  %v6456_v26 = vld [vmem:[%s10428_s1 + $0x11c] sm:$0xf] }
   0x7   :  { %v4541_v23 = vor.u32 %v6464_v18, %v4538_v19  ;;  %v4500_v24 = vld [vmem:[%s10428_s1 + $0x118] sm:$0xf]  ;;  %v4508_v28 = vld [vmem:[%s10428_s1 + $0x120] sm:$0xf]  ;;  %v6460_v29 = vld [vmem:[%s10428_s1 + $0x138] sm:$0xf0] }
   0x8   :  { %v4502_v27 = vld [vmem:[%s10428_s1 + $0x134] sm:$0xf0]  ;;  %v6457_v30 = vld [vmem:[%s10428_s1 + $0x124] sm:$0xf]  ;;  %v4510_v31 = vld [vmem:[%s10428_s1 + $0x13c] sm:$0xf0]  ;;  %v4501_v32 = vor.u32 %v6459_v25, %v4500_v24  ;;  %v4509_v34 = vor.u32 %v6460_v29, %v4508_v28 }
   0x9   :  { %v4505_v33 = vor.u32 %v6456_v26, %v4502_v27 }
   0xc   :  { %3007 = vmatpush.bf16.xpose.msra.mxu0 %v4529_v20 }
   0xd   :  { %3021 = vmatpush.bf16.xpose.msra.mxu1 %v4533_v21  ;;  %3035 = vmatpush.bf16.xpose.msra.mxu2 %v4537_v22 }
   0xe   :  { %3049 = vmatpush.bf16.xpose.msra.mxu3 %v4541_v23 }
   0xf   :  { %8 = vsyncpa [#allocation3], 0  ;;  %v4513_v35 = vor.u32 %v6457_v30, %v4510_v31  ;;  %v4472_v36 = vld [vmem:[%s10428_s1 + $0xe0] sm:$0xf]  ;;  %v6452_v37 = vld [vmem:[%s10428_s1 + $0xf8] sm:$0xf0] }
  0x10   :  { %v6449_v38 = vld [vmem:[%s10428_s1 + $0xe4] sm:$0xf]  ;;  %v4474_v39 = vld [vmem:[%s10428_s1 + $0xfc] sm:$0xf0]  ;;  %v4480_v40 = vld [vmem:[%s10428_s1 + $0xe8] sm:$0xf]  ;;  %v4473_v44 = vor.u32 %v6452_v37, %v4472_v36 }
  0x11   :  { %v6453_v41 = vld [vmem:[%s10428_s1 + $0x100] sm:$0xf0]  ;;  %v6450_v42 = vld [vmem:[%s10428_s1 + $0xec] sm:$0xf]  ;;  %v4482_v43 = vld [vmem:[%s10428_s1 + $0x104] sm:$0xf0]  ;;  %v4477_v45 = vor.u32 %v6449_v38, %v4474_v39 }
  0x12   :  { %v4481_v46 = vor.u32 %v6453_v41, %v4480_v40  ;;  %v4485_v47 = vor.u32 %v6450_v42, %v4482_v43  ;;  %v4444_v48 = vld [vmem:[%s10428_s1 + $0xa8] sm:$0xf]  ;;  %v6445_v49 = vld [vmem:[%s10428_s1 + $0xc0] sm:$0xf0]  ;;  %v6442_v50 = vld [vmem:[%s10428_s1 + $0xac] sm:$0xf] }
  0x13   :  { %v4446_v51 = vld [vmem:[%s10428_s1 + $0xc4] sm:$0xf0]  ;;  %v4452_v52 = vld [vmem:[%s10428_s1 + $0xb0] sm:$0xf]  ;;  %v6446_v53 = vld [vmem:[%s10428_s1 + $0xc8] sm:$0xf0]  ;;  %v4445_v56 = vor.u32 %v6445_v49, %v4444_v48 }
  0x14   :  { %3008 = vmatpush.bf16.xpose.msra.mxu0 %v4501_v32  ;;  %v6443_v54 = vld [vmem:[%s10428_s1 + $0xb4] sm:$0xf]  ;;  %v4454_v55 = vld [vmem:[%s10428_s1 + $0xcc] sm:$0xf0]  ;;  %v4449_v57 = vor.u32 %v6442_v50, %v4446_v51  ;;  %v4453_v58 = vor.u32 %v6446_v53, %v4452_v52  ;;  %v6438_v61 = vld [vmem:[%s10428_s1 + $0x88] sm:$0xf0] }
  0x15   :  { %3022 = vmatpush.bf16.xpose.msra.mxu1 %v4505_v33  ;;  %3036 = vmatpush.bf16.xpose.msra.mxu2 %v4509_v34  ;;  %v4457_v59 = vor.u32 %v6443_v54, %v4454_v55  ;;  %v4416_v60 = vld [vmem:[%s10428_s1 + $0x70] sm:$0xf]  ;;  %v6435_v62 = vld [vmem:[%s10428_s1 + $0x74] sm:$0xf]  ;;  %v4424_v0 = vld [vmem:[%s10428_s1 + $0x78] sm:$0xf] }
  0x16   :  { %3050 = vmatpush.bf16.xpose.msra.mxu3 %v4513_v35  ;;  %v4418_v63 = vld [vmem:[%s10428_s1 + $0x8c] sm:$0xf0]  ;;  %v6439_v1 = vld [vmem:[%s10428_s1 + $0x90] sm:$0xf0]  ;;  %v6436_v2 = vld [vmem:[%s10428_s1 + $0x7c] sm:$0xf]  ;;  %v4417_v4 = vor.u32 %v6438_v61, %v4416_v60 }
  0x17   :  { %v4426_v3 = vld [vmem:[%s10428_s1 + $0x94] sm:$0xf0]  ;;  %v4421_v5 = vor.u32 %v6435_v62, %v4418_v63  ;;  %v4425_v6 = vor.u32 %v6439_v1, %v4424_v0  ;;  %v6431_v9 = vld [vmem:[%s10428_s1 + $0x50] sm:$0xf0]  ;;  %v6428_v10 = vld [vmem:[%s10428_s1 + $0x3c] sm:$0xf] }
  0x18   :  { %v4429_v7 = vor.u32 %v6436_v2, %v4426_v3  ;;  %v4388_v8 = vld [vmem:[%s10428_s1 + $0x38] sm:$0xf]  ;;  %v4396_v12 = vld [vmem:[%s10428_s1 + $0x40] sm:$0xf]  ;;  %v6432_v13 = vld [vmem:[%s10428_s1 + $0x58] sm:$0xf0] }
  0x19   :  { %v4390_v11 = vld [vmem:[%s10428_s1 + $0x54] sm:$0xf0]  ;;  %v6429_v14 = vld [vmem:[%s10428_s1 + $0x44] sm:$0xf]  ;;  %v4398_v15 = vld [vmem:[%s10428_s1 + $0x5c] sm:$0xf0]  ;;  %v4389_v16 = vor.u32 %v6431_v9, %v4388_v8  ;;  %v4397_v18 = vor.u32 %v6432_v13, %v4396_v12 }
  0x1a   :  { %v4393_v17 = vor.u32 %v6428_v10, %v4390_v11  ;;  %v4401_v19 = vor.u32 %v6429_v14, %v4398_v15  ;;  %v4360_v20 = vld [vmem:[%s10428_s1] sm:$0xf]  ;;  %v6424_v21 = vld [vmem:[%s10428_s1 + $0x18] sm:$0xf0]  ;;  %v6421_v22 = vld [vmem:[%s10428_s1 + $0x4] sm:$0xf] }
  0x1b   :  { %v4362_v23 = vld [vmem:[%s10428_s1 + $0x1c] sm:$0xf0]  ;;  %v6476_v25 = vld [vmem:[%s10428_s1 + $0x1b8] sm:$0xf0]  ;;  %v4368_v26 = vld [vmem:[%s10428_s1 + $0x8] sm:$0xf]  ;;  %v4361_v32 = vor.u32 %v6424_v21, %v4360_v20 }
  0x1c   :  { %3009 = vmatpush.bf16.xpose.msra.mxu0 %v4473_v44  ;;  %v4580_v24 = vld [vmem:[%s10428_s1 + $0x1a0] sm:$0xf]  ;;  %v6425_v27 = vld [vmem:[%s10428_s1 + $0x20] sm:$0xf0]  ;;  %v6422_v28 = vld [vmem:[%s10428_s1 + $0xc] sm:$0xf]  ;;  %v4365_v36 = vor.u32 %v6421_v22, %v4362_v23 }
  0x1d   :  { %3023 = vmatpush.bf16.xpose.msra.mxu1 %v4477_v45  ;;  %3037 = vmatpush.bf16.xpose.msra.mxu2 %v4481_v46  ;;  %v4370_v29 = vld [vmem:[%s10428_s1 + $0x24] sm:$0xf0]  ;;  %v4572_v30 = vld [vmem:[%s10428_s1 + $0x198] sm:$0xf]  ;;  %v6475_v31 = vld [vmem:[%s10428_s1 + $0x1b0] sm:$0xf0]  ;;  %v4581_v35 = vor.u32 %v6476_v25, %v4580_v24  ;;  %v4369_v37 = vor.u32 %v6425_v27, %v4368_v26 }
  0x1e   :  { %3051 = vmatpush.bf16.xpose.msra.mxu3 %v4485_v47  ;;  %v6472_v33 = vld [vmem:[%s10428_s1 + $0x19c] sm:$0xf]  ;;  %v4574_v34 = vld [vmem:[%s10428_s1 + $0x1b4] sm:$0xf0]  ;;  %vm2810_vm0 = vcmask 130048   ;;  %v4373_v40 = vor.u32 %v6422_v28, %v4370_v29  ;;  %v4573_v41 = vor.u32 %v6475_v31, %v4572_v30  ;;  %s6963_s21 = smov 128  }
  0x1f   :  { %v4780_v38 = vld [vmem:[%s10428_s1 + $0x348] sm:$0xf]  ;;  %v6529_v39 = vld [vmem:[%s10428_s1 + $0x360] sm:$0xf0]  ;;  %v4577_v42 = vor.u32 %v6472_v33, %v4574_v34  ;;  %v2836_v43 = vsel %vm2810_vm0, %v4581_v35, 0  ;;  %s6964_s22 = smov 8  }
  0x20   :  { %v4781_v44 = vor.u32 %v6529_v39, %v4780_v38  ;;  %v4552_v45 = vld [vmem:[%s10428_s1 + $0x168] sm:$0xf]  ;;  %v6469_v46 = vld [vmem:[%s10428_s1 + $0x180] sm:$0xf0]  ;;  %v4544_v47 = vld [vmem:[%s10428_s1 + $0x160] sm:$0xf] }
  0x21   :  { %v6468_v48 = vld [vmem:[%s10428_s1 + $0x178] sm:$0xf0]  ;;  %v6465_v49 = vld [vmem:[%s10428_s1 + $0x164] sm:$0xf]  ;;  %v4546_v50 = vld [vmem:[%s10428_s1 + $0x17c] sm:$0xf0]  ;;  %v4553_v51 = vor.u32 %v6469_v46, %v4552_v45 }
  0x22   :  { %v4752_v52 = vld [vmem:[%s10428_s1 + $0x310] sm:$0xf]  ;;  %v6522_v53 = vld [vmem:[%s10428_s1 + $0x328] sm:$0xf0]  ;;  %v4545_v54 = vor.u32 %v6468_v48, %v4544_v47  ;;  %v4549_v55 = vor.u32 %v6465_v49, %v4546_v50  ;;  %v4516_v60 = vld [vmem:[%s10428_s1 + $0x128] sm:$0xf] }
  0x23   :  { %v6461_v61 = vld [vmem:[%s10428_s1 + $0x140] sm:$0xf0]  ;;  %v6458_v62 = vld [vmem:[%s10428_s1 + $0x12c] sm:$0xf]  ;;  %v4518_v63 = vld [vmem:[%s10428_s1 + $0x144] sm:$0xf0] }
  0x24   :  { %3010 = vmatpush.bf16.xpose.msra.mxu0 %v4445_v56  ;;  %v2833_v56 = vsel %vm2810_vm0, %v4553_v51, 0  ;;  %v4332_v1 = vld [vmem:[%s10427_s0] sm:$0xf]  ;;  %v6417_v2 = vld [vmem:[%s10427_s0 + $0x18] sm:$0xf0]  ;;  %v4517_v8 = vor.u32 %v6461_v61, %v4516_v60  ;;  %v4521_v10 = vor.u32 %v6458_v62, %v4518_v63 }
  0x25   :  { %3024 = vmatpush.bf16.xpose.msra.mxu1 %v4449_v57  ;;  %3038 = vmatpush.bf16.xpose.msra.mxu2 %v4453_v58  ;;  %v4753_v57 = vor.u32 %v6522_v53, %v4752_v52  ;;  %v4524_v58 = vld [vmem:[%s10428_s1 + $0x130] sm:$0xf]  ;;  %v4340_v3 = vld [vmem:[%s10427_s0 + $0x8] sm:$0xf]  ;;  %v4496_v13 = vld [vmem:[%s10428_s1 + $0xf8] sm:$0xf] }
  0x26   :  { %3052 = vmatpush.bf16.xpose.msra.mxu3 %v4457_v59  ;;  %v6462_v59 = vld [vmem:[%s10428_s1 + $0x148] sm:$0xf0]  ;;  %v6455_v14 = vld [vmem:[%s10428_s1 + $0x110] sm:$0xf0]  ;;  %v4488_v15 = vld [vmem:[%s10428_s1 + $0xf0] sm:$0xf] }
  0x27   :  { %v4525_v0 = vor.u32 %v6462_v59, %v4524_v58  ;;  %v6415_v20 = vld [vmem:[%s10427_s0 + $0xc] sm:$0xf]  ;;  %v4342_v21 = vld [vmem:[%s10427_s0 + $0x24] sm:$0xf0]  ;;  %v6451_v22 = vld [vmem:[%s10428_s1 + $0xf4] sm:$0xf]  ;;  %v4497_v24 = vor.u32 %v6455_v14, %v4496_v13 }
  0x28   :  { %v4490_v23 = vld [vmem:[%s10428_s1 + $0x10c] sm:$0xf0]  ;;  %v7302_v25 = vor.u32 %v6415_v20, %v4342_v21  ;;  %v4696_v26 = vld [vmem:[%s10428_s1 + $0x2a0] sm:$0xf]  ;;  %v6508_v27 = vld [vmem:[%s10428_s1 + $0x2b8] sm:$0xf0] }
  0x29   :  { %v2830_v11 = vsel %vm2810_vm0, %v4525_v0, 0  ;;  %v4493_v29 = vor.u32 %v6451_v22, %v4490_v23  ;;  %v2827_v30 = vsel %vm2810_vm0, %v4497_v24, 0  ;;  %v4697_v31 = vor.u32 %v6508_v27, %v4696_v26  ;;  %v6448_v33 = vld [vmem:[%s10428_s1 + $0xd8] sm:$0xf0]  ;;  %v4460_v34 = vld [vmem:[%s10428_s1 + $0xb8] sm:$0xf] }
  0x2a   :  { %v6447_v35 = vld [vmem:[%s10428_s1 + $0xd0] sm:$0xf0]  ;;  %v4668_v39 = vld [vmem:[%s10428_s1 + $0x268] sm:$0xf]  ;;  %v6441_v46 = vld [vmem:[%s10428_s1 + $0xa0] sm:$0xf0] }
  0x2b   :  { %v4440_v45 = vld [vmem:[%s10428_s1 + $0x88] sm:$0xf]  ;;  %v4432_v47 = vld [vmem:[%s10428_s1 + $0x80] sm:$0xf]  ;;  %v6440_v48 = vld [vmem:[%s10428_s1 + $0x98] sm:$0xf0] }
  0x2c   :  { %3011 = vmatpush.bf16.xpose.msra.mxu0 %v4417_v4  ;;  %v4724_v4 = vld [vmem:[%s10428_s1 + $0x2d8] sm:$0xf]  ;;  %v6437_v49 = vld [vmem:[%s10428_s1 + $0x84] sm:$0xf]  ;;  %v4434_v50 = vld [vmem:[%s10428_s1 + $0x9c] sm:$0xf0]  ;;  %v4441_v51 = vor.u32 %v6441_v46, %v4440_v45 }
  0x2d   :  { %3025 = vmatpush.bf16.xpose.msra.mxu1 %v4421_v5  ;;  %3039 = vmatpush.bf16.xpose.msra.mxu2 %v4425_v6  ;;  %v6515_v5 = vld [vmem:[%s10428_s1 + $0x2f0] sm:$0xf0]  ;;  %v7260_v6 = vor.u32 %v6417_v2, %v4332_v1  ;;  %v4640_v52 = vld [vmem:[%s10428_s1 + $0x230] sm:$0xf]  ;;  %v6494_v53 = vld [vmem:[%s10428_s1 + $0x248] sm:$0xf0] }
  0x2e   :  { %3053 = vmatpush.bf16.xpose.msra.mxu3 %v4429_v7  ;;  %v6418_v7 = vld [vmem:[%s10427_s0 + $0x20] sm:$0xf0]  ;;  %v4725_v12 = vor.u32 %v6515_v5, %v4724_v4  ;;  %v4412_v58 = vld [vmem:[%s10428_s1 + $0x50] sm:$0xf]  ;;  %v6434_v59 = vld [vmem:[%s10428_s1 + $0x68] sm:$0xf0] }
  0x2f   :  { %v7265_v9 = vor.u32 %v6418_v7, %v4340_v3  ;;  %v4404_v60 = vld [vmem:[%s10428_s1 + $0x48] sm:$0xf]  ;;  %v6433_v61 = vld [vmem:[%s10428_s1 + $0x60] sm:$0xf0]  ;;  %v6430_v62 = vld [vmem:[%s10428_s1 + $0x4c] sm:$0xf]  ;;  %v4413_v0 = vor.u32 %v6434_v59, %v4412_v58 }
  0x30   :  { %v4406_v63 = vld [vmem:[%s10428_s1 + $0x64] sm:$0xf0]  ;;  %v4612_v1 = vld [vmem:[%s10428_s1 + $0x1f8] sm:$0xf]  ;;  %v6487_v2 = vld [vmem:[%s10428_s1 + $0x210] sm:$0xf0]  ;;  %v4405_v3 = vor.u32 %v6433_v61, %v4404_v60 }
  0x31   :  { %v4409_v4 = vor.u32 %v6430_v62, %v4406_v63  ;;  %v2818_v5 = vsel %vm2810_vm0, %v4413_v0, 0  ;;  %v4613_v7 = vor.u32 %v6487_v2, %v4612_v1  ;;  %v6423_v13 = vld [vmem:[%s10428_s1 + $0x14] sm:$0xf]  ;;  %v4378_v14 = vld [vmem:[%s10428_s1 + $0x2c] sm:$0xf0] }
  0x32   :  { %v4782_v20 = vld [vmem:[%s10428_s1 + $0x364] sm:$0xf0]  ;;  %v4788_v21 = vld [vmem:[%s10428_s1 + $0x350] sm:$0xf]  ;;  %v6530_v23 = vld [vmem:[%s10428_s1 + $0x368] sm:$0xf0]  ;;  %v4381_v27 = vor.u32 %v6423_v13, %v4378_v14 }
  0x33   :  { %v6527_v24 = vld [vmem:[%s10428_s1 + $0x354] sm:$0xf]  ;;  %v4790_v26 = vld [vmem:[%s10428_s1 + $0x36c] sm:$0xf0]  ;;  %v4760_v45 = vld [vmem:[%s10428_s1 + $0x318] sm:$0xf] }
  0x34   :  { %3012 = vmatpush.bf16.xpose.msra.mxu0 %v4389_v16  ;;  %v6414_v16 = vld [vmem:[%s10427_s0 + $0x4] sm:$0xf]  ;;  %v4726_v58 = vld [vmem:[%s10428_s1 + $0x2f4] sm:$0xf0]  ;;  %v4732_v59 = vld [vmem:[%s10428_s1 + $0x2e0] sm:$0xf] }
  0x35   :  { %3026 = vmatpush.bf16.xpose.msra.mxu1 %v4393_v17  ;;  %3040 = vmatpush.bf16.xpose.msra.mxu2 %v4397_v18  ;;  %v4334_v17 = vld [vmem:[%s10427_s0 + $0x1c] sm:$0xf0]  ;;  %v6454_v18 = vld [vmem:[%s10428_s1 + $0x108] sm:$0xf0]  ;;  %v6516_v60 = vld [vmem:[%s10428_s1 + $0x2f8] sm:$0xf0] }
  0x36   :  { %3054 = vmatpush.bf16.xpose.msra.mxu3 %v4401_v19  ;;  %v7288_v19 = vor.u32 %v6414_v16, %v4334_v17  ;;  %v4489_v28 = vor.u32 %v6454_v18, %v4488_v15  ;;  %v4584_v16 = vld [vmem:[%s10428_s1 + $0x1c0] sm:$0xf]  ;;  %v6480_v17 = vld [vmem:[%s10428_s1 + $0x1d8] sm:$0xf0]  ;;  %v6526_v18 = vld [vmem:[%s10428_s1 + $0x34c] sm:$0xf]  ;;  %v4733_v2 = vor.u32 %v6516_v60, %v4732_v59 }
  0x37   :  { %v6513_v61 = vld [vmem:[%s10428_s1 + $0x2e4] sm:$0xf]  ;;  %v4734_v62 = vld [vmem:[%s10428_s1 + $0x2fc] sm:$0xf0]  ;;  %v4740_v63 = vld [vmem:[%s10428_s1 + $0x2e8] sm:$0xf] }
  0x38   :  { %v6517_v0 = vld [vmem:[%s10428_s1 + $0x300] sm:$0xf0]  ;;  %v4712_v13 = vld [vmem:[%s10428_s1 + $0x2b0] sm:$0xf]  ;;  %v6510_v14 = vld [vmem:[%s10428_s1 + $0x2c8] sm:$0xf0] }
  0x39   :  { %v6477_v60 = vld [vmem:[%s10428_s1 + $0x1c4] sm:$0xf] }
  0x3c   :  { %3013 = vmatpush.bf16.xpose.msra.mxu0 %v4361_v32  ;;  %v4468_v32 = vld [vmem:[%s10428_s1 + $0xc0] sm:$0xf] }
  0x3d   :  { %3027 = vmatpush.bf16.xpose.msra.mxu1 %v4365_v36  ;;  %3041 = vmatpush.bf16.xpose.msra.mxu2 %v4369_v37  ;;  %v6444_v36 = vld [vmem:[%s10428_s1 + $0xbc] sm:$0xf]  ;;  %v4462_v37 = vld [vmem:[%s10428_s1 + $0xd4] sm:$0xf0]  ;;  %v4469_v38 = vor.u32 %v6448_v33, %v4468_v32  ;;  %v4785_v32 = vor.u32 %v6526_v18, %v4782_v20  ;;  %v4789_v33 = vor.u32 %v6530_v23, %v4788_v21  ;;  %v6498_v20 = vld [vmem:[%s10428_s1 + $0x26c] sm:$0xf] }
  0x3e   :  { %3055 = vmatpush.bf16.xpose.msra.mxu3 %v4373_v40  ;;  %v6501_v40 = vld [vmem:[%s10428_s1 + $0x280] sm:$0xf0]  ;;  %v4713_v18 = vor.u32 %v6510_v14, %v4712_v13  ;;  %v4670_v21 = vld [vmem:[%s10428_s1 + $0x284] sm:$0xf0]  ;;  %v6502_v23 = vld [vmem:[%s10428_s1 + $0x288] sm:$0xf0] }
  0x3f   :  { %v6585_v13 = vld [vmem:[%s10428_s1 + $0x520] sm:$0xf0] }
  0x43   :  { %3014 = vmatmul.bf16.vlgmr.msra.gmra.mxu0 %v7260_v6 }
  0x44   :  { %3062 = vmatpush.bf16.xpose.msrb.mxu0 %v4573_v41  ;;  %3042 = vmatmul.bf16.vlgmr.msra.gmra.mxu2 %v7265_v9  ;;  %v4461_v41 = vor.u32 %v6447_v35, %v4460_v34  ;;  %v4793_v34 = vor.u32 %v6527_v24, %v4790_v26  ;;  %v6499_v24 = vld [vmem:[%s10428_s1 + $0x274] sm:$0xf]  ;;  %v4678_v26 = vld [vmem:[%s10428_s1 + $0x28c] sm:$0xf0] }
  0x45   :  { %3076 = vmatpush.bf16.xpose.msrb.mxu1 %v4577_v42  ;;  %3090 = vmatpush.bf16.xpose.msrb.mxu2 %v2836_v43  ;;  %v4465_v42 = vor.u32 %v6444_v36, %v4462_v37  ;;  %v2824_v43 = vsel %vm2810_vm0, %v4469_v38, 0  ;;  %v4348_v36 = vld [vmem:[%s10427_s0 + $0x10] sm:$0xf]  ;;  %v6419_v37 = vld [vmem:[%s10427_s0 + $0x28] sm:$0xf0] }
  0x46   :  { %3104 = vmatpush.bf16.xpose.msrb.mxu3 %v4781_v44  ;;  %3028 = vmatmul.bf16.vlgmr.msra.gmra.mxu1 %v7288_v19  ;;  %v4669_v44 = vor.u32 %v6501_v40, %v4668_v39  ;;  %v4356_v38 = vld [vmem:[%s10427_s0 + $0x18] sm:$0xf]  ;;  %v6420_v39 = vld [vmem:[%s10427_s0 + $0x30] sm:$0xf0] }
  0x47   :  { %3056 = vmatmul.bf16.vlgmr.msra.gmra.mxu3 %v7302_v25  ;;  %v6416_v40 = vld [vmem:[%s10427_s0 + $0x14] sm:$0xf]  ;;  %v7466_v46 = vor.u32 %v6420_v39, %v4356_v38  ;;  %v4650_v38 = vld [vmem:[%s10428_s1 + $0x254] sm:$0xf0]  ;;  %v4656_v39 = vld [vmem:[%s10428_s1 + $0x240] sm:$0xf] }
  0x4c   :  { %3063 = vmatpush.bf16.xpose.msrb.mxu0 %v4545_v54  ;;  %v4433_v54 = vor.u32 %v6440_v48, %v4432_v47  ;;  %v6523_v48 = vld [vmem:[%s10428_s1 + $0x330] sm:$0xf0] }
  0x4d   :  { %3077 = vmatpush.bf16.xpose.msrb.mxu1 %v4549_v55  ;;  %3091 = vmatpush.bf16.xpose.msrb.mxu2 %v2833_v56  ;;  %v4437_v55 = vor.u32 %v6437_v49, %v4434_v50  ;;  %v2821_v56 = vsel %vm2810_vm0, %v4441_v51, 0  ;;  %v6520_v49 = vld [vmem:[%s10428_s1 + $0x31c] sm:$0xf]  ;;  %v4762_v50 = vld [vmem:[%s10428_s1 + $0x334] sm:$0xf0] }
  0x4e   :  { %3105 = vmatpush.bf16.xpose.msrb.mxu3 %v4753_v57  ;;  %v4641_v57 = vor.u32 %v6494_v53, %v4640_v52  ;;  %v4768_v51 = vld [vmem:[%s10428_s1 + $0x320] sm:$0xf]  ;;  %v6524_v52 = vld [vmem:[%s10428_s1 + $0x338] sm:$0xf0] }
  0x54   :  { %3064 = vmatpush.bf16.xpose.msrb.mxu0 %v4517_v8  ;;  %v4384_v8 = vld [vmem:[%s10428_s1 + $0x18] sm:$0xf] }
  0x55   :  { %3078 = vmatpush.bf16.xpose.msrb.mxu1 %v4521_v10  ;;  %3092 = vmatpush.bf16.xpose.msrb.mxu2 %v2830_v11  ;;  %v6427_v10 = vld [vmem:[%s10428_s1 + $0x30] sm:$0xf0]  ;;  %v4376_v11 = vld [vmem:[%s10428_s1 + $0x10] sm:$0xf] }
  0x56   :  { %3106 = vmatpush.bf16.xpose.msrb.mxu3 %v4725_v12  ;;  %v6426_v12 = vld [vmem:[%s10428_s1 + $0x28] sm:$0xf0]  ;;  %v4385_v15 = vor.u32 %v6427_v10, %v4384_v8  ;;  %v4704_v8 = vld [vmem:[%s10428_s1 + $0x2a8] sm:$0xf]  ;;  %v6509_v10 = vld [vmem:[%s10428_s1 + $0x2c0] sm:$0xf0] }
  0x57   :  { %v4377_v22 = vor.u32 %v6426_v12, %v4376_v11  ;;  %v6506_v11 = vld [vmem:[%s10428_s1 + $0x2ac] sm:$0xf]  ;;  %v4706_v12 = vld [vmem:[%s10428_s1 + $0x2c4] sm:$0xf0] }
  0x5c   :  { %3065 = vmatpush.bf16.xpose.msrb.mxu0 %v4489_v28  ;;  %v4796_v28 = vld [vmem:[%s10428_s1 + $0x358] sm:$0xf] }
  0x5d   :  { %3079 = vmatpush.bf16.xpose.msrb.mxu1 %v4493_v29  ;;  %3093 = vmatpush.bf16.xpose.msrb.mxu2 %v2827_v30  ;;  %v6531_v29 = vld [vmem:[%s10428_s1 + $0x370] sm:$0xf0]  ;;  %v2815_v30 = vsel %vm2810_vm0, %v4385_v15, 0 }
  0x5e   :  { %3107 = vmatpush.bf16.xpose.msrb.mxu3 %v4697_v31  ;;  %v4585_v31 = vor.u32 %v6480_v17, %v4584_v16  ;;  %v4797_v35 = vor.u32 %v6531_v29, %v4796_v28  ;;  %v4705_v16 = vor.u32 %v6509_v10, %v4704_v8  ;;  %v4709_v17 = vor.u32 %v6506_v11, %v4706_v12  ;;  %v6503_v28 = vld [vmem:[%s10428_s1 + $0x290] sm:$0xf0]  ;;  %v4798_v8 = vld [vmem:[%s10428_s1 + $0x374] sm:$0xf0]  ;;  %v5004_v12 = vld [vmem:[%s10428_s1 + $0x508] sm:$0xf] }
  0x5f   :  { %v4673_v29 = vor.u32 %v6498_v20, %v4670_v21  ;;  %v5005_v21 = vor.u32 %v6585_v13, %v5004_v12  ;;  %v6554_v12 = vld [vmem:[%s10428_s1 + $0x42c] sm:$0xf]  ;;  %v4894_v13 = vld [vmem:[%s10428_s1 + $0x444] sm:$0xf0] }
  0x64   :  { %3066 = vmatpush.bf16.xpose.msrb.mxu0 %v4461_v41  ;;  %v4350_v41 = vld [vmem:[%s10427_s0 + $0x2c] sm:$0xf0]  ;;  %s4318_s0 = sshll.u32 %s10430_s3, 4  ;;  %s4319_s0 = int_to_ptr.hbm [resolvable:$true] %s4318_s0 }
  0x65   :  { %3080 = vmatpush.bf16.xpose.msrb.mxu1 %v4465_v42  ;;  %3094 = vmatpush.bf16.xpose.msrb.mxu2 %v2824_v43  ;;  %v7455_v42 = vor.u32 %v6419_v37, %v4348_v36  ;;  %v6519_v43 = vld [vmem:[%s10428_s1 + $0x314] sm:$0xf]  ;;  %v7468_v47 = vor.u32 %v6416_v40, %v4350_v41  ;;  %v6492_v37 = vld [vmem:[%s10428_s1 + $0x23c] sm:$0xf] }
  0x66   :  { %3108 = vmatpush.bf16.xpose.msrb.mxu3 %v4669_v44  ;;  %v4754_v44 = vld [vmem:[%s10428_s1 + $0x32c] sm:$0xf0]  ;;  %v6495_v36 = vld [vmem:[%s10428_s1 + $0x250] sm:$0xf0]  ;;  %v6496_v40 = vld [vmem:[%s10428_s1 + $0x258] sm:$0xf0] }
  0x67   :  { %v4757_v53 = vor.u32 %v6519_v43, %v4754_v44  ;;  %v4653_v44 = vor.u32 %v6492_v37, %v4650_v38  ;;  %v4748_v38 = vld [vmem:[%s10428_s1 + $0x2f0] sm:$0xf] }
  0x6c   :  { %3067 = vmatpush.bf16.xpose.msrb.mxu0 %v4433_v54  ;;  %v4761_v54 = vor.u32 %v6523_v48, %v4760_v45  ;;  %v4657_v45 = vor.u32 %v6496_v40, %v4656_v39  ;;  %v6484_v48 = vld [vmem:[%s10428_s1 + $0x1fc] sm:$0xf]  ;;  %v6518_v39 = vld [vmem:[%s10428_s1 + $0x308] sm:$0xf0] }
  0x6d   :  { %3081 = vmatpush.bf16.xpose.msrb.mxu1 %v4437_v55  ;;  %3095 = vmatpush.bf16.xpose.msrb.mxu2 %v2821_v56  ;;  %v4765_v55 = vor.u32 %v6520_v49, %v4762_v50  ;;  %v4769_v56 = vor.u32 %v6524_v52, %v4768_v51  ;;  %v4614_v49 = vld [vmem:[%s10428_s1 + $0x214] sm:$0xf0]  ;;  %v4620_v50 = vld [vmem:[%s10428_s1 + $0x200] sm:$0xf]  ;;  %v6488_v51 = vld [vmem:[%s10428_s1 + $0x218] sm:$0xf0] }
  0x6e   :  { %3109 = vmatpush.bf16.xpose.msrb.mxu3 %v4641_v57  ;;  %v6512_v57 = vld [vmem:[%s10428_s1 + $0x2dc] sm:$0xf]  ;;  %v6485_v52 = vld [vmem:[%s10428_s1 + $0x204] sm:$0xf]  ;;  %v6514_v40 = vld [vmem:[%s10428_s1 + $0x2ec] sm:$0xf] }
  0x6f   :  { %v4729_v1 = vor.u32 %v6512_v57, %v4726_v58  ;;  %v4621_v57 = vor.u32 %v6488_v51, %v4620_v50 }
  0x74   :  { %3068 = vmatpush.bf16.xpose.msrb.mxu0 %v4405_v3  ;;  %v4737_v3 = vor.u32 %v6513_v61, %v4734_v62  ;;  %v4586_v61 = vld [vmem:[%s10428_s1 + $0x1dc] sm:$0xf0]  ;;  %v4592_v62 = vld [vmem:[%s10428_s1 + $0x1c8] sm:$0xf] }
  0x75   :  { %3082 = vmatpush.bf16.xpose.msrb.mxu1 %v4409_v4  ;;  %3096 = vmatpush.bf16.xpose.msrb.mxu2 %v2818_v5  ;;  %v4741_v4 = vor.u32 %v6517_v0, %v4740_v63  ;;  %v6505_v5 = vld [vmem:[%s10428_s1 + $0x2a4] sm:$0xf]  ;;  %v4804_v0 = vld [vmem:[%s10428_s1 + $0x360] sm:$0xf]  ;;  %v4589_v10 = vor.u32 %v6477_v60, %v4586_v61  ;;  %v6564_v60 = vld [vmem:[%s10428_s1 + $0x478] sm:$0xf0] }
  0x76   :  { %3110 = vmatpush.bf16.xpose.msrb.mxu3 %v4613_v7  ;;  %v4698_v7 = vld [vmem:[%s10428_s1 + $0x2bc] sm:$0xf0]  ;;  %v6481_v63 = vld [vmem:[%s10428_s1 + $0x1e0] sm:$0xf0] }
  0x77   :  { %v4701_v15 = vor.u32 %v6505_v5, %v4698_v7  ;;  %v6482_v5 = vld [vmem:[%s10428_s1 + $0x1e8] sm:$0xf0]  ;;  %v6528_v7 = vld [vmem:[%s10428_s1 + $0x35c] sm:$0xf]  ;;  %v4593_v14 = vor.u32 %v6481_v63, %v4592_v62  ;;  %v6561_v61 = vld [vmem:[%s10428_s1 + $0x464] sm:$0xf] }
  0x78   :  { %v4801_v20 = vor.u32 %v6528_v7, %v4798_v8  ;;  %v4922_v62 = vld [vmem:[%s10428_s1 + $0x47c] sm:$0xf0]  ;;  %v4686_v7 = vld [vmem:[%s10428_s1 + $0x294] sm:$0xf0] }
  0x7c   :  { %3069 = vmatpush.bf16.xpose.msrb.mxu0 %v4377_v22  ;;  %v4676_v22 = vld [vmem:[%s10428_s1 + $0x270] sm:$0xf] }
  0x7d   :  { %3083 = vmatpush.bf16.xpose.msrb.mxu1 %v4381_v27  ;;  %3097 = vmatpush.bf16.xpose.msrb.mxu2 %v2815_v30  ;;  %v4684_v27 = vld [vmem:[%s10428_s1 + $0x278] sm:$0xf]  ;;  %v4677_v30 = vor.u32 %v6502_v23, %v4676_v22 }
  0x7e   :  { %3111 = vmatpush.bf16.xpose.msrb.mxu3 %v4585_v31  ;;  %v4681_v31 = vor.u32 %v6499_v24, %v4678_v26  ;;  %v4776_v24 = vld [vmem:[%s10428_s1 + $0x328] sm:$0xf]  ;;  %v6525_v26 = vld [vmem:[%s10428_s1 + $0x340] sm:$0xf0] }
  0x83   :  { %3070 = vmatmul.bf16.vlgmr.msrb.gmra.mxu0 %v7455_v42 }
  0x84   :  { %3118 = vmatpush.bf16.xpose.msra.mxu0 %v4785_v32  ;;  %6150 = vmatmul.msk.bf16.vlgmr.msrb.gmra.mxu2 %vm2810_vm0, %v7466_v46  ;;  %v4685_v32 = vor.u32 %v6503_v28, %v4684_v27  ;;  %v6521_v27 = vld [vmem:[%s10428_s1 + $0x324] sm:$0xf]  ;;  %v4770_v28 = vld [vmem:[%s10428_s1 + $0x33c] sm:$0xf0] }
  0x85   :  { %3132 = vmatpush.bf16.xpose.msra.mxu1 %v4789_v33  ;;  %3146 = vmatpush.bf16.xpose.msra.mxu2 %v4793_v34  ;;  %v6491_v33 = vld [vmem:[%s10428_s1 + $0x234] sm:$0xf]  ;;  %v4642_v34 = vld [vmem:[%s10428_s1 + $0x24c] sm:$0xf0] }
  0x86   :  { %3160 = vmatpush.bf16.xpose.msra.mxu3 %v4797_v35  ;;  %3084 = vmatmul.bf16.vlgmr.msrb.gmra.mxu1 %v7468_v47  ;;  %v4648_v35 = vld [vmem:[%s10428_s1 + $0x238] sm:$0xf]  ;;  %v4645_v41 = vor.u32 %v6491_v33, %v4642_v34  ;;  %v4978_v33 = vld [vmem:[%s10428_s1 + $0x4ec] sm:$0xf0]  ;;  %v4773_v34 = vor.u32 %v6521_v27, %v4770_v28  ;;  %v6493_v27 = vld [vmem:[%s10428_s1 + $0x244] sm:$0xf] }
  0x87   :  { %3112 = vmatmul.bf16.vlgmr.msrb.gmra.mxu3 %v7260_v6  ;;  %v4649_v43 = vor.u32 %v6495_v36, %v4648_v35  ;;  %v4658_v28 = vld [vmem:[%s10428_s1 + $0x25c] sm:$0xf0] }
  0x8c   :  { %3119 = vmatpush.bf16.xpose.msra.mxu0 %v4757_v53  ;;  %v4622_v53 = vld [vmem:[%s10428_s1 + $0x21c] sm:$0xf0] }
  0x8d   :  { %3133 = vmatpush.bf16.xpose.msra.mxu1 %v4761_v54  ;;  %3147 = vmatpush.bf16.xpose.msra.mxu2 %v4765_v55  ;;  %v4628_v54 = vld [vmem:[%s10428_s1 + $0x208] sm:$0xf]  ;;  %v6489_v55 = vld [vmem:[%s10428_s1 + $0x220] sm:$0xf0]  ;;  %v4625_v58 = vor.u32 %v6485_v52, %v4622_v53 }
  0x8e   :  { %3161 = vmatpush.bf16.xpose.msra.mxu3 %v4769_v56  ;;  %v4617_v56 = vor.u32 %v6484_v48, %v4614_v49  ;;  %v4629_v59 = vor.u32 %v6489_v55, %v4628_v54  ;;  %v6568_v48 = vld [vmem:[%s10428_s1 + $0x49c] sm:$0xf]  ;;  %v4950_v49 = vld [vmem:[%s10428_s1 + $0x4b4] sm:$0xf0]  ;;  %v6511_v55 = vld [vmem:[%s10428_s1 + $0x2d0] sm:$0xf0] }
  0x8f   :  { %v4953_v53 = vor.u32 %v6568_v48, %v4950_v49  ;;  %v4720_v54 = vld [vmem:[%s10428_s1 + $0x2b8] sm:$0xf]  ;;  %v6543_v49 = vld [vmem:[%s10428_s1 + $0x3d0] sm:$0xf0] }
  0x90   :  { %v4836_v48 = vld [vmem:[%s10428_s1 + $0x3b8] sm:$0xf] }
  0x94   :  { %3120 = vmatpush.bf16.xpose.msra.mxu0 %v4729_v1  ;;  %v6532_v1 = vld [vmem:[%s10428_s1 + $0x378] sm:$0xf0] }
  0x95   :  { %3134 = vmatpush.bf16.xpose.msra.mxu1 %v4733_v2  ;;  %3148 = vmatpush.bf16.xpose.msra.mxu2 %v4737_v3  ;;  %v6478_v2 = vld [vmem:[%s10428_s1 + $0x1cc] sm:$0xf]  ;;  %v4594_v3 = vld [vmem:[%s10428_s1 + $0x1e4] sm:$0xf0]  ;;  %v4805_v11 = vor.u32 %v6532_v1, %v4804_v0 }
  0x96   :  { %3162 = vmatpush.bf16.xpose.msra.mxu3 %v4741_v4  ;;  %v4600_v4 = vld [vmem:[%s10428_s1 + $0x1d0] sm:$0xf] }
  0x97   :  { %v2860_v22 = vsel %vm2810_vm0, %v4805_v11, 0  ;;  %v6557_v11 = vld [vmem:[%s10428_s1 + $0x440] sm:$0xf0] }
  0x9c   :  { %3121 = vmatpush.bf16.xpose.msra.mxu0 %v4701_v15  ;;  %v4597_v15 = vor.u32 %v6478_v2, %v4594_v3  ;;  %v4925_v2 = vor.u32 %v6561_v61, %v4922_v62  ;;  %v4692_v3 = vld [vmem:[%s10428_s1 + $0x280] sm:$0xf]  ;;  %v6536_v62 = vld [vmem:[%s10428_s1 + $0x398] sm:$0xf0] }
  0x9d   :  { %3135 = vmatpush.bf16.xpose.msra.mxu1 %v4705_v16  ;;  %3149 = vmatpush.bf16.xpose.msra.mxu2 %v4709_v17  ;;  %v6582_v16 = vld [vmem:[%s10428_s1 + $0x50c] sm:$0xf]  ;;  %v5006_v17 = vld [vmem:[%s10428_s1 + $0x524] sm:$0xf0] }
  0x9e   :  { %3163 = vmatpush.bf16.xpose.msra.mxu3 %v4713_v18  ;;  %v4601_v18 = vor.u32 %v6482_v5, %v4600_v4  ;;  %v5009_v23 = vor.u32 %v6582_v16, %v5006_v17  ;;  %v6504_v4 = vld [vmem:[%s10428_s1 + $0x298] sm:$0xf0] }
  0x9f   :  { %v6500_v5 = vld [vmem:[%s10428_s1 + $0x27c] sm:$0xf]  ;;  %v4693_v8 = vor.u32 %v6504_v4, %v4692_v3  ;;  %v6583_v3 = vld [vmem:[%s10428_s1 + $0x514] sm:$0xf] }
  0xa4   :  { %3122 = vmatpush.bf16.xpose.msra.mxu0 %v4673_v29  ;;  %v4777_v29 = vor.u32 %v6525_v26, %v4776_v24 }
  0xa5   :  { %3136 = vmatpush.bf16.xpose.msra.mxu1 %v4677_v30  ;;  %3150 = vmatpush.bf16.xpose.msra.mxu2 %v4681_v31  ;;  %v4976_v30 = vld [vmem:[%s10428_s1 + $0x4d0] sm:$0xf]  ;;  %v6578_v31 = vld [vmem:[%s10428_s1 + $0x4e8] sm:$0xf0] }
  0xa6   :  { %3164 = vmatpush.bf16.xpose.msra.mxu3 %v4685_v32  ;;  %v6575_v32 = vld [vmem:[%s10428_s1 + $0x4d4] sm:$0xf]  ;;  %v4977_v35 = vor.u32 %v6578_v31, %v4976_v30  ;;  %v2857_v36 = vsel %vm2810_vm0, %v4777_v29, 0  ;;  %v4864_v30 = vld [vmem:[%s10428_s1 + $0x3f0] sm:$0xf] }
  0xa7   :  { %v4981_v37 = vor.u32 %v6575_v32, %v4978_v33  ;;  %v6550_v31 = vld [vmem:[%s10428_s1 + $0x408] sm:$0xf0]  ;;  %v6547_v32 = vld [vmem:[%s10428_s1 + $0x3f4] sm:$0xf]  ;;  %v4866_v33 = vld [vmem:[%s10428_s1 + $0x40c] sm:$0xf0] }
  0xac   :  { %3123 = vmatpush.bf16.xpose.msra.mxu0 %v4645_v41  ;;  %v4742_v41 = vld [vmem:[%s10428_s1 + $0x304] sm:$0xf0] }
  0xad   :  { %3137 = vmatpush.bf16.xpose.msra.mxu1 %v4649_v43  ;;  %3151 = vmatpush.bf16.xpose.msra.mxu2 %v4653_v44  ;;  %v4749_v43 = vor.u32 %v6518_v39, %v4748_v38  ;;  %v4948_v44 = vld [vmem:[%s10428_s1 + $0x498] sm:$0xf]  ;;  %v4745_v50 = vor.u32 %v6514_v40, %v4742_v41  ;;  %v4869_v39 = vor.u32 %v6547_v32, %v4866_v33  ;;  %v4636_v40 = vld [vmem:[%s10428_s1 + $0x210] sm:$0xf]  ;;  %v6490_v41 = vld [vmem:[%s10428_s1 + $0x228] sm:$0xf0] }
  0xae   :  { %3165 = vmatpush.bf16.xpose.msra.mxu3 %v4657_v45  ;;  %v6571_v45 = vld [vmem:[%s10428_s1 + $0x4b0] sm:$0xf0] }
  0xaf   :  { %v4949_v51 = vor.u32 %v6571_v45, %v4948_v44  ;;  %v2854_v52 = vsel %vm2810_vm0, %v4749_v43, 0  ;;  %v6486_v43 = vld [vmem:[%s10428_s1 + $0x20c] sm:$0xf]  ;;  %v4630_v44 = vld [vmem:[%s10428_s1 + $0x224] sm:$0xf0]  ;;  %v4637_v45 = vor.u32 %v6490_v41, %v4636_v40 }
  0xb0   :  { %v4964_v40 = vld [vmem:[%s10428_s1 + $0x4a8] sm:$0xf]  ;;  %v6573_v41 = vld [vmem:[%s10428_s1 + $0x4c0] sm:$0xf0] }
  0xb4   :  { %3124 = vmatpush.bf16.xpose.msra.mxu0 %v4617_v56  ;;  %v6507_v56 = vld [vmem:[%s10428_s1 + $0x2b4] sm:$0xf] }
  0xb5   :  { %3138 = vmatpush.bf16.xpose.msra.mxu1 %v4621_v57  ;;  %3152 = vmatpush.bf16.xpose.msra.mxu2 %v4625_v58  ;;  %v4714_v57 = vld [vmem:[%s10428_s1 + $0x2cc] sm:$0xf0]  ;;  %v4721_v58 = vor.u32 %v6511_v55, %v4720_v54  ;;  %v2842_v54 = vsel %vm2810_vm0, %v4637_v45, 0  ;;  %v4966_v45 = vld [vmem:[%s10428_s1 + $0x4c4] sm:$0xf0] }
  0xb6   :  { %3166 = vmatpush.bf16.xpose.msra.mxu3 %v4629_v59  ;;  %v4920_v59 = vld [vmem:[%s10428_s1 + $0x460] sm:$0xf]  ;;  %v4717_v63 = vor.u32 %v6507_v56, %v4714_v57  ;;  %v4608_v56 = vld [vmem:[%s10428_s1 + $0x1d8] sm:$0xf]  ;;  %v6483_v57 = vld [vmem:[%s10428_s1 + $0x1f0] sm:$0xf0] }
  0xb7   :  { %v4921_v0 = vor.u32 %v6564_v60, %v4920_v59  ;;  %v2851_v1 = vsel %vm2810_vm0, %v4721_v58, 0  ;;  %v6479_v58 = vld [vmem:[%s10428_s1 + $0x1d4] sm:$0xf]  ;;  %v4602_v59 = vld [vmem:[%s10428_s1 + $0x1ec] sm:$0xf0]  ;;  %v4609_v61 = vor.u32 %v6483_v57, %v4608_v56 }
  0xb8   :  { %v4808_v60 = vld [vmem:[%s10428_s1 + $0x380] sm:$0xf]  ;;  %v4605_v4 = vor.u32 %v6479_v58, %v4602_v59  ;;  %v4928_v56 = vld [vmem:[%s10428_s1 + $0x468] sm:$0xf]  ;;  %v6565_v57 = vld [vmem:[%s10428_s1 + $0x480] sm:$0xf0] }
  0xb9   :  { %v6562_v58 = vld [vmem:[%s10428_s1 + $0x46c] sm:$0xf]  ;;  %v4936_v59 = vld [vmem:[%s10428_s1 + $0x470] sm:$0xf] }
  0xbc   :  { %3125 = vmatpush.bf16.xpose.msra.mxu0 %v4589_v10  ;;  %v4892_v10 = vld [vmem:[%s10428_s1 + $0x428] sm:$0xf] }
  0xbd   :  { %3139 = vmatpush.bf16.xpose.msra.mxu1 %v4593_v14  ;;  %3153 = vmatpush.bf16.xpose.msra.mxu2 %v4597_v15  ;;  %v4689_v14 = vor.u32 %v6500_v5, %v4686_v7  ;;  %v4893_v17 = vor.u32 %v6557_v11, %v4892_v10  ;;  %v5014_v5 = vld [vmem:[%s10428_s1 + $0x52c] sm:$0xf0]  ;;  %v5020_v7 = vld [vmem:[%s10428_s1 + $0x518] sm:$0xf]  ;;  %v4809_v10 = vor.u32 %v6536_v62, %v4808_v60  ;;  %v6584_v11 = vld [vmem:[%s10428_s1 + $0x51c] sm:$0xf] }
  0xbe   :  { %3167 = vmatpush.bf16.xpose.msra.mxu3 %v4601_v18  ;;  %v6566_v60 = vld [vmem:[%s10428_s1 + $0x488] sm:$0xf0]  ;;  %v4938_v62 = vld [vmem:[%s10428_s1 + $0x48c] sm:$0xf0] }
  0xc0   :  { %v3015_v15 = vpop.f32.mrf.mxu0 }
  0xc3   :  { %3126 = vmatmul.bf16.vlgmr.msra.gmra.mxu0 %v7288_v19  ;;  %v3029_v16 = vpop.f32.mrf.mxu1 }
  0xc4   :  { %3174 = vmatpush.bf16.xpose.msrb.mxu0 %v4801_v20  ;;  %3154 = vmatmul.bf16.vlgmr.msra.gmra.mxu2 %v7302_v25  ;;  %v3030_v18 = vadd.f32 %v3029_v16, %v3015_v15  ;;  %v2848_v20 = vsel %vm2810_vm0, %v4693_v8, 0  ;;  %v6587_v8 = vld [vmem:[%s10428_s1 + $0x530] sm:$0xf0]  ;;  %v5017_v16 = vor.u32 %v6583_v3, %v5014_v5  ;;  %v4900_v5 = vld [vmem:[%s10428_s1 + $0x430] sm:$0xf] }
  0xc5   :  { %3188 = vmatpush.bf16.xpose.msrb.mxu1 %v2860_v22  ;;  %3202 = vmatpush.bf16.xpose.msrb.mxu2 %v5005_v21  ;;  %v4897_v21 = vor.u32 %v6554_v12, %v4894_v13  ;;  %v4664_v22 = vld [vmem:[%s10428_s1 + $0x248] sm:$0xf]  ;;  %v5022_v12 = vld [vmem:[%s10428_s1 + $0x534] sm:$0xf0]  ;;  %v2839_v13 = vsel %vm2810_vm0, %v4609_v61, 0 }
  0xc6   :  { %3216 = vmatpush.bf16.xpose.msrb.mxu3 %v5009_v23  ;;  %3140 = vmatmul.bf16.vlgmr.msra.gmra.mxu1 %v7265_v9  ;;  %v6497_v23 = vld [vmem:[%s10428_s1 + $0x260] sm:$0xf0]  ;;  %v6563_v61 = vld [vmem:[%s10428_s1 + $0x474] sm:$0xf] }
  0xc7   :  { %3168 = vmatmul.bf16.vlgmr.msra.gmra.mxu3 %v7455_v42  ;;  %v3043_v24 = vpop.f32.mrf.mxu2  ;;  %v4665_v29 = vor.u32 %v6497_v23, %v4664_v22  ;;  %v6576_v22 = vld [vmem:[%s10428_s1 + $0x4dc] sm:$0xf]  ;;  %v4986_v23 = vld [vmem:[%s10428_s1 + $0x4f4] sm:$0xf0] }
  0xc8   :  { %v3044_v26 = vadd.f32 %v3043_v24, %v3030_v18  ;;  %v5025_v18 = vor.u32 %v6584_v11, %v5022_v12  ;;  %v4992_v24 = vld [vmem:[%s10428_s1 + $0x4e0] sm:$0xf]  ;;  %v4908_v11 = vld [vmem:[%s10428_s1 + $0x438] sm:$0xf]  ;;  %v6559_v12 = vld [vmem:[%s10428_s1 + $0x450] sm:$0xf0] }
  0xc9   :  { %v2845_v38 = vsel %vm2810_vm0, %v4665_v29, 0 }
  0xcc   :  { %3175 = vmatpush.bf16.xpose.msrb.mxu0 %v4773_v34  ;;  %v4661_v34 = vor.u32 %v6493_v27, %v4658_v28  ;;  %v6577_v27 = vld [vmem:[%s10428_s1 + $0x4e4] sm:$0xf]  ;;  %v4994_v28 = vld [vmem:[%s10428_s1 + $0x4fc] sm:$0xf0] }
  0xcd   :  { %3189 = vmatpush.bf16.xpose.msrb.mxu1 %v2857_v36  ;;  %3203 = vmatpush.bf16.xpose.msrb.mxu2 %v4977_v35  ;;  %v3057_v35 = vpop.f32.mrf.mxu3  ;;  %v4865_v36 = vor.u32 %v6550_v31, %v4864_v30  ;;  %v7888_v30 = vpop.f32.mrf.mxu0  ;;  %v4989_v31 = vor.u32 %v6576_v22, %v4986_v23  ;;  %v4997_v33 = vor.u32 %v6577_v27, %v4994_v28  ;;  %v6548_v22 = vld [vmem:[%s10428_s1 + $0x3fc] sm:$0xf]  ;;  %v4874_v23 = vld [vmem:[%s10428_s1 + $0x414] sm:$0xf0]  ;;  %v6549_v27 = vld [vmem:[%s10428_s1 + $0x404] sm:$0xf] }
  0xce   :  { %3217 = vmatpush.bf16.xpose.msrb.mxu3 %v4981_v37  ;;  %v7787_v37 = vadd.f32 %v3057_v35, %v3044_v26  ;;  %v6580_v26 = vld [vmem:[%s10428_s1 + $0x4f8] sm:$0xf0]  ;;  %v4956_v35 = vld [vmem:[%s10428_s1 + $0x4a0] sm:$0xf] }
  0xcf   :  { %v4993_v32 = vor.u32 %v6580_v26, %v4992_v24  ;;  %v4880_v24 = vld [vmem:[%s10428_s1 + $0x400] sm:$0xf]  ;;  %v6552_v26 = vld [vmem:[%s10428_s1 + $0x418] sm:$0xf0] }
  0xd0   :  { %v4882_v28 = vld [vmem:[%s10428_s1 + $0x41c] sm:$0xf0] }
  0xd4   :  { %3176 = vmatpush.bf16.xpose.msrb.mxu0 %v4745_v50  ;;  %v6540_v50 = vld [vmem:[%s10428_s1 + $0x3bc] sm:$0xf] }
  0xd5   :  { %3190 = vmatpush.bf16.xpose.msrb.mxu1 %v2854_v52  ;;  %3204 = vmatpush.bf16.xpose.msrb.mxu2 %v4949_v51  ;;  %v4838_v51 = vld [vmem:[%s10428_s1 + $0x3d4] sm:$0xf0]  ;;  %v4633_v52 = vor.u32 %v6486_v43, %v4630_v44  ;;  %v7915_v43 = vpop.f32.mrf.mxu2  ;;  %v6570_v44 = vld [vmem:[%s10428_s1 + $0x4ac] sm:$0xf] }
  0xd6   :  { %3218 = vmatpush.bf16.xpose.msrb.mxu3 %v4953_v53  ;;  %v4837_v53 = vor.u32 %v6543_v49, %v4836_v48  ;;  %v4841_v55 = vor.u32 %v6540_v50, %v4838_v51  ;;  %v4965_v50 = vor.u32 %v6573_v41, %v4964_v40  ;;  %v4969_v51 = vor.u32 %v6570_v44, %v4966_v45  ;;  %v4852_v40 = vld [vmem:[%s10428_s1 + $0x3c8] sm:$0xf]  ;;  %v6545_v41 = vld [vmem:[%s10428_s1 + $0x3e0] sm:$0xf0]  ;;  %v6542_v44 = vld [vmem:[%s10428_s1 + $0x3cc] sm:$0xf] }
  0xd7   :  { %v4854_v45 = vld [vmem:[%s10428_s1 + $0x3e4] sm:$0xf0] }
  0xdc   :  { %3177 = vmatpush.bf16.xpose.msrb.mxu0 %v4717_v63  ;;  %v6533_v63 = vld [vmem:[%s10428_s1 + $0x384] sm:$0xf] }
  0xdd   :  { %3191 = vmatpush.bf16.xpose.msrb.mxu1 %v2851_v1  ;;  %3205 = vmatpush.bf16.xpose.msrb.mxu2 %v4921_v0  ;;  %v4810_v0 = vld [vmem:[%s10428_s1 + $0x39c] sm:$0xf0]  ;;  %v5012_v1 = vld [vmem:[%s10428_s1 + $0x510] sm:$0xf] }
  0xde   :  { %3219 = vmatpush.bf16.xpose.msrb.mxu3 %v4925_v2  ;;  %v6586_v2 = vld [vmem:[%s10428_s1 + $0x528] sm:$0xf0] }
  0xdf   :  { %v5013_v15 = vor.u32 %v6586_v2, %v5012_v1  ;;  %v4937_v2 = vor.u32 %v6566_v60, %v4936_v59  ;;  %v6535_v59 = vld [vmem:[%s10428_s1 + $0x394] sm:$0xf]  ;;  %v4826_v60 = vld [vmem:[%s10428_s1 + $0x3ac] sm:$0xf0] }
  0xe4   :  { %3178 = vmatpush.bf16.xpose.msrb.mxu0 %v4689_v14  ;;  %v4813_v14 = vor.u32 %v6533_v63, %v4810_v0  ;;  %v4929_v63 = vor.u32 %v6565_v57, %v4928_v56  ;;  %v6534_v56 = vld [vmem:[%s10428_s1 + $0x38c] sm:$0xf]  ;;  %v4818_v57 = vld [vmem:[%s10428_s1 + $0x3a4] sm:$0xf0] }
  0xe5   :  { %3192 = vmatpush.bf16.xpose.msrb.mxu1 %v2848_v20  ;;  %3206 = vmatpush.bf16.xpose.msrb.mxu2 %v4893_v17  ;;  %v5021_v17 = vor.u32 %v6587_v8, %v5020_v7  ;;  %v4984_v20 = vld [vmem:[%s10428_s1 + $0x4d8] sm:$0xf]  ;;  %v6558_v7 = vld [vmem:[%s10428_s1 + $0x448] sm:$0xf0]  ;;  %v6555_v8 = vld [vmem:[%s10428_s1 + $0x434] sm:$0xf] }
  0xe6   :  { %3220 = vmatpush.bf16.xpose.msrb.mxu3 %v4897_v21  ;;  %v6579_v21 = vld [vmem:[%s10428_s1 + $0x4f0] sm:$0xf0] }
  0xe7   :  { %v4985_v29 = vor.u32 %v6579_v21, %v4984_v20  ;;  %v4872_v20 = vld [vmem:[%s10428_s1 + $0x3f8] sm:$0xf]  ;;  %v6551_v21 = vld [vmem:[%s10428_s1 + $0x410] sm:$0xf0] }
  0xec   :  { %3179 = vmatpush.bf16.xpose.msrb.mxu0 %v4661_v34  ;;  %v7893_v34 = vpop.f32.mrf.mxu1 }
  0xed   :  { %3193 = vmatpush.bf16.xpose.msrb.mxu1 %v2845_v38  ;;  %3207 = vmatpush.bf16.xpose.msrb.mxu2 %v4865_v36  ;;  %v6572_v36 = vld [vmem:[%s10428_s1 + $0x4b8] sm:$0xf0]  ;;  %v6569_v38 = vld [vmem:[%s10428_s1 + $0x4a4] sm:$0xf] }
  0xee   :  { %3221 = vmatpush.bf16.xpose.msrb.mxu3 %v4869_v39  ;;  %v4958_v39 = vld [vmem:[%s10428_s1 + $0x4bc] sm:$0xf0]  ;;  %v4957_v48 = vor.u32 %v6572_v36, %v4956_v35  ;;  %v6544_v36 = vld [vmem:[%s10428_s1 + $0x3d8] sm:$0xf0] }
  0xef   :  { %v4961_v49 = vor.u32 %v6569_v38, %v4958_v39  ;;  %v4844_v35 = vld [vmem:[%s10428_s1 + $0x3c0] sm:$0xf]  ;;  %v6541_v38 = vld [vmem:[%s10428_s1 + $0x3c4] sm:$0xf] }
  0xf0   :  { %v4846_v39 = vld [vmem:[%s10428_s1 + $0x3dc] sm:$0xf0] }
  0xf4   :  { %3180 = vmatpush.bf16.xpose.msrb.mxu0 %v4633_v52 }
  0xf5   :  { %3194 = vmatpush.bf16.xpose.msrb.mxu1 %v2842_v54  ;;  %3208 = vmatpush.bf16.xpose.msrb.mxu2 %v4837_v53 }
  0xf6   :  { %3222 = vmatpush.bf16.xpose.msrb.mxu3 %v4841_v55 }
  0xfc   :  { %3181 = vmatpush.bf16.xpose.msrb.mxu0 %v4605_v4  ;;  %v4941_v4 = vor.u32 %v6563_v61, %v4938_v62  ;;  %v5228_v62 = vld [vmem:[%s10428_s1 + $0x6c8] sm:$0xf] }
  0xfd   :  { %3195 = vmatpush.bf16.xpose.msrb.mxu1 %v2839_v13  ;;  %3209 = vmatpush.bf16.xpose.msrb.mxu2 %v4809_v10  ;;  %v4902_v10 = vld [vmem:[%s10428_s1 + $0x44c] sm:$0xf0]  ;;  %v6556_v13 = vld [vmem:[%s10428_s1 + $0x43c] sm:$0xf] }
  0xfe   :  { %3223 = vmatpush.bf16.xpose.msrb.mxu3 %v4813_v14  ;;  %v4910_v14 = vld [vmem:[%s10428_s1 + $0x454] sm:$0xf0] }
 0x100   :  { %v3071_v52 = vpop.f32.mrf.mxu0 }
 0x101   :  { %v3072_v53 = vadd.f32 %v3071_v52, %v7787_v37  ;;  %v4930_v37 = vld [vmem:[%s10428_s1 + $0x484] sm:$0xf0]  ;;  %v5028_v52 = vld [vmem:[%s10428_s1 + $0x520] sm:$0xf] }
 0x102   :  { %v4933_v1 = vor.u32 %v6562_v58, %v4930_v37  ;;  %v4824_v58 = vld [vmem:[%s10428_s1 + $0x390] sm:$0xf]  ;;  %v6538_v37 = vld [vmem:[%s10428_s1 + $0x3a8] sm:$0xf0] }
 0x103   :  { %3182 = vmatmul.bf16.vlgmr.msrb.gmra.mxu0 %v7468_v47  ;;  %v3085_v54 = vpop.f32.mrf.mxu1 }
 0x104   :  { %3230 = vmatpush.bf16.xpose.msra.mxu0 %v5013_v15  ;;  %6151 = vmatmul.msk.bf16.vlgmr.msrb.gmra.mxu1 %vm2810_vm0, %v7466_v46  ;;  %v3086_v55 = vadd.f32 %v3085_v54, %v3072_v53  ;;  %v4901_v15 = vor.u32 %v6558_v7, %v4900_v5  ;;  %v6588_v53 = vld [vmem:[%s10428_s1 + $0x538] sm:$0xf0]  ;;  %v4816_v54 = vld [vmem:[%s10428_s1 + $0x388] sm:$0xf]  ;;  %v4821_v5 = vor.u32 %v6534_v56, %v4818_v57  ;;  %v4944_v57 = vld [vmem:[%s10428_s1 + $0x478] sm:$0xf] }
 0x105   :  { %3244 = vmatpush.bf16.xpose.msra.mxu1 %v5017_v16  ;;  %3258 = vmatpush.bf16.xpose.msra.mxu2 %v5021_v17  ;;  %v4905_v16 = vor.u32 %v6555_v8, %v4902_v10  ;;  %v4909_v17 = vor.u32 %v6559_v12, %v4908_v11  ;;  %v5029_v61 = vor.u32 %v6588_v53, %v5028_v52  ;;  %v5236_v8 = vld [vmem:[%s10428_s1 + $0x6d0] sm:$0xf]  ;;  %v6642_v10 = vld [vmem:[%s10428_s1 + $0x6e8] sm:$0xf0] }
 0x106   :  { %3272 = vmatpush.bf16.xpose.msra.mxu3 %v5025_v18  ;;  %3210 = vmatmul.bf16.vlgmr.msrb.gmra.mxu2 %v7260_v6  ;;  %v4913_v18 = vor.u32 %v6556_v13, %v4910_v14  ;;  %v4825_v7 = vor.u32 %v6538_v37, %v4824_v58  ;;  %v4829_v11 = vor.u32 %v6535_v59, %v4826_v60  ;;  %v6567_v58 = vld [vmem:[%s10428_s1 + $0x490] sm:$0xf0] }
 0x107   :  { %3224 = vmatmul.bf16.vlgmr.msrb.gmra.mxu3 %v7288_v19  ;;  %v3099_v0 = vpop.f32.mrf.mxu2  ;;  %v2884_v12 = vsel %vm2810_vm0, %v5029_v61, 0  ;;  %v4945_v61 = vor.u32 %v6567_v58, %v4944_v57  ;;  %v5060_v58 = vld [vmem:[%s10428_s1 + $0x578] sm:$0xf] }
 0x108   :  { %v7948_v3 = vadd.f32 %v3099_v0, %v3086_v55  ;;  %v6537_v55 = vld [vmem:[%s10428_s1 + $0x3a0] sm:$0xf0] }
 0x109   :  { %v4817_v0 = vor.u32 %v6537_v55, %v4816_v54 }
 0x10a   :  { %10431 = vst [vmem:[#allocation5_spill] sm:$0xff] %v7948_v3 }
 0x10c   :  { %3231 = vmatpush.bf16.xpose.msra.mxu0 %v4985_v29  ;;  %v4873_v29 = vor.u32 %v6551_v21, %v4872_v20  ;;  %v5200_v20 = vld [vmem:[%s10428_s1 + $0x690] sm:$0xf]  ;;  %v6634_v21 = vld [vmem:[%s10428_s1 + $0x6a8] sm:$0xf0] }
 0x10d   :  { %3245 = vmatpush.bf16.xpose.msra.mxu1 %v4989_v31  ;;  %3259 = vmatpush.bf16.xpose.msra.mxu2 %v4993_v32  ;;  %v4877_v31 = vor.u32 %v6548_v22, %v4874_v23  ;;  %v4881_v32 = vor.u32 %v6552_v26, %v4880_v24  ;;  %v6631_v22 = vld [vmem:[%s10428_s1 + $0x694] sm:$0xf]  ;;  %v5202_v23 = vld [vmem:[%s10428_s1 + $0x6ac] sm:$0xf0]  ;;  %v5208_v26 = vld [vmem:[%s10428_s1 + $0x698] sm:$0xf] }
 0x10e   :  { %3273 = vmatpush.bf16.xpose.msra.mxu3 %v4997_v33  ;;  %v4885_v33 = vor.u32 %v6549_v27, %v4882_v28  ;;  %v6635_v27 = vld [vmem:[%s10428_s1 + $0x6b0] sm:$0xf0] }
 0x114   :  { %3232 = vmatpush.bf16.xpose.msra.mxu0 %v4957_v48  ;;  %v4845_v48 = vor.u32 %v6544_v36, %v4844_v35  ;;  %v4972_v35 = vld [vmem:[%s10428_s1 + $0x4b0] sm:$0xf]  ;;  %v6574_v36 = vld [vmem:[%s10428_s1 + $0x4c8] sm:$0xf0] }
 0x115   :  { %3246 = vmatpush.bf16.xpose.msra.mxu1 %v4961_v49  ;;  %3260 = vmatpush.bf16.xpose.msra.mxu2 %v4965_v50  ;;  %v4849_v49 = vor.u32 %v6541_v38, %v4846_v39  ;;  %v4853_v50 = vor.u32 %v6545_v41, %v4852_v40  ;;  %v8110_v38 = vpop.f32.mrf.mxu1  ;;  %v4973_v39 = vor.u32 %v6574_v36, %v4972_v35  ;;  %v5172_v40 = vld [vmem:[%s10428_s1 + $0x658] sm:$0xf]  ;;  %v6627_v41 = vld [vmem:[%s10428_s1 + $0x670] sm:$0xf0]  ;;  %v6553_v35 = vld [vmem:[%s10428_s1 + $0x420] sm:$0xf0] }
 0x116   :  { %3274 = vmatpush.bf16.xpose.msra.mxu3 %v4969_v51  ;;  %v4857_v51 = vor.u32 %v6542_v44, %v4854_v45  ;;  %v6624_v44 = vld [vmem:[%s10428_s1 + $0x65c] sm:$0xf]  ;;  %v5174_v45 = vld [vmem:[%s10428_s1 + $0x674] sm:$0xf0]  ;;  %v5173_v53 = vor.u32 %v6627_v41, %v5172_v40  ;;  %v6606_v40 = vld [vmem:[%s10428_s1 + $0x5c8] sm:$0xf0] }
 0x117   :  { %v2878_v52 = vsel %vm2810_vm0, %v4973_v39, 0  ;;  %v5177_v54 = vor.u32 %v6624_v44, %v5174_v45  ;;  %v5088_v39 = vld [vmem:[%s10428_s1 + $0x5b0] sm:$0xf]  ;;  %v6603_v41 = vld [vmem:[%s10428_s1 + $0x5b4] sm:$0xf] }
 0x118   :  { %v5090_v44 = vld [vmem:[%s10428_s1 + $0x5cc] sm:$0xf0]  ;;  %v5096_v45 = vld [vmem:[%s10428_s1 + $0x5b8] sm:$0xf] }
 0x11c   :  { %3233 = vmatpush.bf16.xpose.msra.mxu0 %v4929_v63  ;;  %v8055_v63 = vpop.f32.mrf.mxu3 }
 0x11d   :  { %3247 = vmatpush.bf16.xpose.msra.mxu1 %v4933_v1  ;;  %3261 = vmatpush.bf16.xpose.msra.mxu2 %v4937_v2  ;;  %v6641_v1 = vld [vmem:[%s10428_s1 + $0x6e0] sm:$0xf0]  ;;  %v6638_v2 = vld [vmem:[%s10428_s1 + $0x6cc] sm:$0xf] }
 0x11e   :  { %3275 = vmatpush.bf16.xpose.msra.mxu3 %v4941_v4  ;;  %v5230_v4 = vld [vmem:[%s10428_s1 + $0x6e4] sm:$0xf0]  ;;  %v5229_v13 = vor.u32 %v6641_v1, %v5228_v62  ;;  %v5144_v62 = vld [vmem:[%s10428_s1 + $0x620] sm:$0xf]  ;;  %v6617_v1 = vld [vmem:[%s10428_s1 + $0x624] sm:$0xf] }
 0x11f   :  { %v5233_v14 = vor.u32 %v6638_v2, %v5230_v4  ;;  %v5146_v2 = vld [vmem:[%s10428_s1 + $0x63c] sm:$0xf0]  ;;  %v5152_v4 = vld [vmem:[%s10428_s1 + $0x628] sm:$0xf] }
 0x124   :  { %3234 = vmatpush.bf16.xpose.msra.mxu0 %v4901_v15  ;;  %v5237_v15 = vor.u32 %v6642_v10, %v5236_v8  ;;  %v3113_v24 = vpop.f32.mrf.mxu3  ;;  %v2875_v8 = vsel %vm2810_vm0, %v4945_v61, 0  ;;  %v5068_v61 = vld [vmem:[%s10428_s1 + $0x580] sm:$0xf] }
 0x125   :  { %3248 = vmatpush.bf16.xpose.msra.mxu1 %v4905_v16  ;;  %3262 = vmatpush.bf16.xpose.msra.mxu2 %v4909_v17  ;;  %v5000_v16 = vld [vmem:[%s10428_s1 + $0x4e8] sm:$0xf]  ;;  %v6581_v17 = vld [vmem:[%s10428_s1 + $0x500] sm:$0xf0] }
 0x126   :  { %3276 = vmatpush.bf16.xpose.msra.mxu3 %v4913_v18  ;;  %v5001_v18 = vor.u32 %v6581_v17, %v5000_v16  ;;  %v6560_v16 = vld [vmem:[%s10428_s1 + $0x458] sm:$0xf0] }
 0x128   :  { %v2881_v28 = vsel %vm2810_vm0, %v5001_v18, 0 }
 0x12c   :  { %3235 = vmatpush.bf16.xpose.msra.mxu0 %v4873_v29  ;;  %v5201_v29 = vor.u32 %v6634_v21, %v5200_v20  ;;  %v5116_v20 = vld [vmem:[%s10428_s1 + $0x5e8] sm:$0xf]  ;;  %v6613_v21 = vld [vmem:[%s10428_s1 + $0x600] sm:$0xf0] }
 0x12d   :  { %3249 = vmatpush.bf16.xpose.msra.mxu1 %v4877_v31  ;;  %3263 = vmatpush.bf16.xpose.msra.mxu2 %v4881_v32  ;;  %v5205_v31 = vor.u32 %v6631_v22, %v5202_v23  ;;  %v8099_v32 = vpop.f32.mrf.mxu0  ;;  %v6610_v22 = vld [vmem:[%s10428_s1 + $0x5ec] sm:$0xf]  ;;  %v5118_v23 = vld [vmem:[%s10428_s1 + $0x604] sm:$0xf0] }
 0x12e   :  { %3277 = vmatpush.bf16.xpose.msra.mxu3 %v4885_v33  ;;  %v5209_v33 = vor.u32 %v6635_v27, %v5208_v26  ;;  %v6614_v26 = vld [vmem:[%s10428_s1 + $0x608] sm:$0xf0] }
 0x134   :  { %3236 = vmatpush.bf16.xpose.msra.mxu0 %v4845_v48  ;;  %v5180_v48 = vld [vmem:[%s10428_s1 + $0x660] sm:$0xf] }
 0x135   :  { %3250 = vmatpush.bf16.xpose.msra.mxu1 %v4849_v49  ;;  %3264 = vmatpush.bf16.xpose.msra.mxu2 %v4853_v50  ;;  %v6628_v49 = vld [vmem:[%s10428_s1 + $0x678] sm:$0xf0]  ;;  %v8130_v50 = vpop.f32.mrf.mxu3 }
 0x136   :  { %3278 = vmatpush.bf16.xpose.msra.mxu3 %v4857_v51  ;;  %v8132_v51 = vpop.f32.mrf.mxu2  ;;  %v5181_v55 = vor.u32 %v6628_v49, %v5180_v48  ;;  %v6607_v48 = vld [vmem:[%s10428_s1 + $0x5d0] sm:$0xf0] }
 0x137   :  { %10432 = vst [vmem:[#allocation6_spill] sm:$0xff] %v8132_v51  ;;  %v6120_v51 = vld [vmem:[%s10428_s1 + $0xda8] sm:$0xf] }
 0x13c   :  { %3237 = vmatpush.bf16.xpose.msra.mxu0 %v4817_v0  ;;  %v6620_v0 = vld [vmem:[%s10428_s1 + $0x638] sm:$0xf0] }
 0x13d   :  { %3251 = vmatpush.bf16.xpose.msra.mxu1 %v4821_v5  ;;  %3265 = vmatpush.bf16.xpose.msra.mxu2 %v4825_v7  ;;  %v6621_v5 = vld [vmem:[%s10428_s1 + $0x640] sm:$0xf0]  ;;  %v5145_v10 = vor.u32 %v6620_v0, %v5144_v62  ;;  %v6600_v62 = vld [vmem:[%s10428_s1 + $0x598] sm:$0xf0] }
 0x13e   :  { %3279 = vmatpush.bf16.xpose.msra.mxu3 %v4829_v11  ;;  %v5149_v11 = vor.u32 %v6617_v1, %v5146_v2 }
 0x140   :  { %v3127_v56 = vpop.f32.mrf.mxu0 }
 0x141   :  { %v3128_v37 = vadd.f32 %v3127_v56, %v3113_v24  ;;  %v5124_v24 = vld [vmem:[%s10428_s1 + $0x5f0] sm:$0xf]  ;;  %v6546_v56 = vld [vmem:[%s10428_s1 + $0x3e8] sm:$0xf0] }
 0x143   :  { %3238 = vmatmul.bf16.vlgmr.msra.gmra.mxu0 %v7265_v9  ;;  %v3141_v59 = vpop.f32.mrf.mxu1 }
 0x144   :  { %3286 = vmatpush.bf16.xpose.msrb.mxu0 %v2884_v12  ;;  %3266 = vmatmul.bf16.vlgmr.msra.gmra.mxu2 %v7455_v42  ;;  %v3142_v60 = vadd.f32 %v3141_v59, %v3128_v37  ;;  %v6599_v37 = vld [vmem:[%s10428_s1 + $0x590] sm:$0xf0]  ;;  %v6596_v59 = vld [vmem:[%s10428_s1 + $0x57c] sm:$0xf] }
 0x145   :  { %3300 = vmatpush.bf16.xpose.msrb.mxu1 %v5229_v13  ;;  %3314 = vmatpush.bf16.xpose.msrb.mxu2 %v5233_v14  ;;  %v5153_v13 = vor.u32 %v6621_v5, %v5152_v4  ;;  %v5061_v1 = vor.u32 %v6599_v37, %v5060_v58  ;;  %v5069_v4 = vor.u32 %v6600_v62, %v5068_v61  ;;  %v4832_v5 = vld [vmem:[%s10428_s1 + $0x398] sm:$0xf]  ;;  %v5196_v61 = vld [vmem:[%s10428_s1 + $0x670] sm:$0xf]  ;;  %v6630_v62 = vld [vmem:[%s10428_s1 + $0x688] sm:$0xf0] }
 0x146   :  { %3328 = vmatpush.bf16.xpose.msrb.mxu3 %v5237_v15  ;;  %3252 = vmatmul.bf16.vlgmr.msra.gmra.mxu1 %v7302_v25  ;;  %v4916_v15 = vld [vmem:[%s10428_s1 + $0x440] sm:$0xf] }
 0x147   :  { %3280 = vmatmul.bf16.vlgmr.msra.gmra.mxu3 %v7468_v47  ;;  %v3155_v7 = vpop.f32.mrf.mxu2  ;;  %v4917_v18 = vor.u32 %v6560_v16, %v4916_v15  ;;  %v6593_v15 = vld [vmem:[%s10428_s1 + $0x560] sm:$0xf0]  ;;  %v5252_v16 = vld [vmem:[%s10428_s1 + $0x6e0] sm:$0xf] }
 0x148   :  { %v3156_v12 = vadd.f32 %v3155_v7, %v3142_v60  ;;  %v5062_v60 = vld [vmem:[%s10428_s1 + $0x594] sm:$0xf0]  ;;  %v6539_v7 = vld [vmem:[%s10428_s1 + $0x3b0] sm:$0xf0]  ;;  %v8313_v37 = vpop.f32.mrf.mxu0 }
 0x149   :  { %v2872_v27 = vsel %vm2810_vm0, %v4917_v18, 0  ;;  %v5065_v2 = vor.u32 %v6596_v59, %v5062_v60  ;;  %v6644_v18 = vld [vmem:[%s10428_s1 + $0x6f8] sm:$0xf0] }
 0x14a   :  { %v3169_v14 = vpop.f32.mrf.mxu3 }
 0x14b   :  { %v8166_v17 = vadd.f32 %v3169_v14, %v3156_v12  ;;  %v6589_v12 = vld [vmem:[%s10428_s1 + $0x544] sm:$0xf]  ;;  %v5040_v14 = vld [vmem:[%s10428_s1 + $0x548] sm:$0xf]  ;;  %v8317_v59 = vpop.f32.mrf.mxu1 }
 0x14c   :  { %3287 = vmatpush.bf16.xpose.msrb.mxu0 %v2881_v28  ;;  %v5117_v28 = vor.u32 %v6613_v21, %v5116_v20  ;;  %v6639_v20 = vld [vmem:[%s10428_s1 + $0x6d4] sm:$0xf]  ;;  %v5238_v21 = vld [vmem:[%s10428_s1 + $0x6ec] sm:$0xf0] }
 0x14d   :  { %3301 = vmatpush.bf16.xpose.msrb.mxu1 %v5201_v29  ;;  %3315 = vmatpush.bf16.xpose.msrb.mxu2 %v5205_v31  ;;  %v5121_v29 = vor.u32 %v6610_v22, %v5118_v23  ;;  %v5125_v31 = vor.u32 %v6614_v26, %v5124_v24  ;;  %v5244_v22 = vld [vmem:[%s10428_s1 + $0x6d8] sm:$0xf]  ;;  %v6643_v23 = vld [vmem:[%s10428_s1 + $0x6f0] sm:$0xf0]  ;;  %v6640_v24 = vld [vmem:[%s10428_s1 + $0x6dc] sm:$0xf] }
 0x14e   :  { %3329 = vmatpush.bf16.xpose.msrb.mxu3 %v5209_v33  ;;  %v4888_v33 = vld [vmem:[%s10428_s1 + $0x408] sm:$0xf]  ;;  %v5246_v26 = vld [vmem:[%s10428_s1 + $0x6f4] sm:$0xf0] }
 0x14f   :  { %v4889_v36 = vor.u32 %v6553_v35, %v4888_v33  ;;  %v5041_v33 = vor.u32 %v6593_v15, %v5040_v14  ;;  %v5241_v35 = vor.u32 %v6639_v20, %v5238_v21  ;;  %v6623_v20 = vld [vmem:[%s10428_s1 + $0x650] sm:$0xf0] }
 0x151   :  { %v2869_v49 = vsel %vm2810_vm0, %v4889_v36, 0  ;;  %v5245_v36 = vor.u32 %v6643_v23, %v5244_v22  ;;  %v6618_v22 = vld [vmem:[%s10428_s1 + $0x62c] sm:$0xf]  ;;  %v5160_v23 = vld [vmem:[%s10428_s1 + $0x630] sm:$0xf] }
 0x154   :  { %3288 = vmatpush.bf16.xpose.msrb.mxu0 %v2878_v52  ;;  %v5089_v52 = vor.u32 %v6606_v40, %v5088_v39  ;;  %v5249_v39 = vor.u32 %v6640_v24, %v5246_v26  ;;  %v6622_v24 = vld [vmem:[%s10428_s1 + $0x648] sm:$0xf0]  ;;  %v6619_v26 = vld [vmem:[%s10428_s1 + $0x634] sm:$0xf] }
 0x155   :  { %3302 = vmatpush.bf16.xpose.msrb.mxu1 %v5173_v53  ;;  %3316 = vmatpush.bf16.xpose.msrb.mxu2 %v5177_v54  ;;  %v5093_v53 = vor.u32 %v6603_v41, %v5090_v44  ;;  %v5097_v54 = vor.u32 %v6607_v48, %v5096_v45  ;;  %v5224_v41 = vld [vmem:[%s10428_s1 + $0x6a8] sm:$0xf]  ;;  %v6637_v44 = vld [vmem:[%s10428_s1 + $0x6c0] sm:$0xf0]  ;;  %v6632_v45 = vld [vmem:[%s10428_s1 + $0x69c] sm:$0xf] }
 0x156   :  { %3330 = vmatpush.bf16.xpose.msrb.mxu3 %v5181_v55  ;;  %v4860_v55 = vld [vmem:[%s10428_s1 + $0x3d0] sm:$0xf]  ;;  %v5210_v48 = vld [vmem:[%s10428_s1 + $0x6b4] sm:$0xf0] }
 0x157   :  { %v4861_v57 = vor.u32 %v6546_v56, %v4860_v55  ;;  %v5225_v55 = vor.u32 %v6637_v44, %v5224_v41  ;;  %v5213_v56 = vor.u32 %v6632_v45, %v5210_v48  ;;  %v5126_v41 = vld [vmem:[%s10428_s1 + $0x60c] sm:$0xf0]  ;;  %v5132_v44 = vld [vmem:[%s10428_s1 + $0x5f8] sm:$0xf]  ;;  %v6615_v45 = vld [vmem:[%s10428_s1 + $0x610] sm:$0xf0] }
 0x158   :  { %v6612_v48 = vld [vmem:[%s10428_s1 + $0x5fc] sm:$0xf] }
 0x159   :  { %v2866_v0 = vsel %vm2810_vm0, %v4861_v57, 0  ;;  %v2905_v60 = vsel %vm2810_vm0, %v5225_v55, 0 }
 0x15c   :  { %3289 = vmatpush.bf16.xpose.msrb.mxu0 %v2875_v8  ;;  %v5032_v8 = vld [vmem:[%s10428_s1 + $0x540] sm:$0xf] }
 0x15d   :  { %3303 = vmatpush.bf16.xpose.msrb.mxu1 %v5145_v10  ;;  %3317 = vmatpush.bf16.xpose.msrb.mxu2 %v5149_v11  ;;  %v6592_v10 = vld [vmem:[%s10428_s1 + $0x558] sm:$0xf0]  ;;  %v4833_v11 = vor.u32 %v6539_v7, %v4832_v5  ;;  %v6626_v5 = vld [vmem:[%s10428_s1 + $0x66c] sm:$0xf]  ;;  %v5190_v7 = vld [vmem:[%s10428_s1 + $0x684] sm:$0xf0] }
 0x15e   :  { %3331 = vmatpush.bf16.xpose.msrb.mxu3 %v5153_v13  ;;  %v5034_v13 = vld [vmem:[%s10428_s1 + $0x55c] sm:$0xf0] }
 0x164   :  { %3290 = vmatpush.bf16.xpose.msrb.mxu0 %v2872_v27  ;;  %v2863_v27 = vsel %vm2810_vm0, %v4833_v11, 0 }
 0x165   :  { %3304 = vmatpush.bf16.xpose.msrb.mxu1 %v5117_v28  ;;  %3318 = vmatpush.bf16.xpose.msrb.mxu2 %v5121_v29  ;;  %v5033_v28 = vor.u32 %v6592_v10, %v5032_v8  ;;  %v5037_v29 = vor.u32 %v6589_v12, %v5034_v13  ;;  %v5197_v8 = vor.u32 %v6630_v62, %v5196_v61  ;;  %v6609_v61 = vld [vmem:[%s10428_s1 + $0x5e0] sm:$0xf0]  ;;  %v6604_v62 = vld [vmem:[%s10428_s1 + $0x5bc] sm:$0xf] }
 0x166   :  { %3332 = vmatpush.bf16.xpose.msrb.mxu3 %v5125_v31  ;;  %v5253_v31 = vor.u32 %v6644_v18, %v5252_v16  ;;  %v5193_v12 = vor.u32 %v6626_v5, %v5190_v7  ;;  %v5168_v18 = vld [vmem:[%s10428_s1 + $0x638] sm:$0xf]  ;;  %v5106_v5 = vld [vmem:[%s10428_s1 + $0x5dc] sm:$0xf0] }
 0x167   :  { %v2902_v14 = vsel %vm2810_vm0, %v5197_v8, 0 }
 0x168   :  { %v2908_v40 = vsel %vm2810_vm0, %v5253_v31, 0  ;;  %v5161_v31 = vor.u32 %v6622_v24, %v5160_v23  ;;  %v6601_v23 = vld [vmem:[%s10428_s1 + $0x5a0] sm:$0xf0]  ;;  %v6598_v24 = vld [vmem:[%s10428_s1 + $0x58c] sm:$0xf] }
 0x16c   :  { %3291 = vmatpush.bf16.xpose.msrb.mxu0 %v2869_v49  ;;  %v5216_v49 = vld [vmem:[%s10428_s1 + $0x6a0] sm:$0xf] }
 0x16d   :  { %3305 = vmatpush.bf16.xpose.msrb.mxu1 %v5089_v52  ;;  %3319 = vmatpush.bf16.xpose.msrb.mxu2 %v5093_v53  ;;  %v6636_v52 = vld [vmem:[%s10428_s1 + $0x6b8] sm:$0xf0]  ;;  %v6633_v53 = vld [vmem:[%s10428_s1 + $0x6a4] sm:$0xf] }
 0x16e   :  { %3333 = vmatpush.bf16.xpose.msrb.mxu3 %v5097_v54  ;;  %v5218_v54 = vld [vmem:[%s10428_s1 + $0x6bc] sm:$0xf0]  ;;  %v5217_v57 = vor.u32 %v6636_v52, %v5216_v49  ;;  %v5134_v49 = vld [vmem:[%s10428_s1 + $0x614] sm:$0xf0] }
 0x16f   :  { %v5221_v58 = vor.u32 %v6633_v53, %v5218_v54  ;;  %v8398_v53 = vpop.f32.mrf.mxu2  ;;  %v8400_v54 = vpop.f32.mrf.mxu3 }
 0x174   :  { %3292 = vmatpush.bf16.xpose.msrb.mxu0 %v2866_v0  ;;  %v6625_v0 = vld [vmem:[%s10428_s1 + $0x664] sm:$0xf] }
 0x175   :  { %3306 = vmatpush.bf16.xpose.msrb.mxu1 %v5061_v1  ;;  %3320 = vmatpush.bf16.xpose.msrb.mxu2 %v5065_v2  ;;  %v5182_v1 = vld [vmem:[%s10428_s1 + $0x67c] sm:$0xf0]  ;;  %v5188_v2 = vld [vmem:[%s10428_s1 + $0x668] sm:$0xf] }
 0x176   :  { %3334 = vmatpush.bf16.xpose.msrb.mxu3 %v5069_v4  ;;  %v6629_v4 = vld [vmem:[%s10428_s1 + $0x680] sm:$0xf0]  ;;  %v5185_v10 = vor.u32 %v6625_v0, %v5182_v1  ;;  %v5098_v0 = vld [vmem:[%s10428_s1 + $0x5d4] sm:$0xf0]  ;;  %v5104_v1 = vld [vmem:[%s10428_s1 + $0x5c0] sm:$0xf] }
 0x177   :  { %v5189_v11 = vor.u32 %v6629_v4, %v5188_v2  ;;  %v6608_v2 = vld [vmem:[%s10428_s1 + $0x5d8] sm:$0xf0]  ;;  %v6605_v4 = vld [vmem:[%s10428_s1 + $0x5c4] sm:$0xf]  ;;  %v5101_v8 = vor.u32 %v6604_v62, %v5098_v0 }
 0x17c   :  { %3293 = vmatpush.bf16.xpose.msrb.mxu0 %v2863_v27  ;;  %v5162_v27 = vld [vmem:[%s10428_s1 + $0x64c] sm:$0xf0] }
 0x17d   :  { %3307 = vmatpush.bf16.xpose.msrb.mxu1 %v5033_v28  ;;  %3321 = vmatpush.bf16.xpose.msrb.mxu2 %v5037_v29  ;;  %v5169_v28 = vor.u32 %v6623_v20, %v5168_v18  ;;  %v6602_v18 = vld [vmem:[%s10428_s1 + $0x5a8] sm:$0xf0]  ;;  %v6597_v20 = vld [vmem:[%s10428_s1 + $0x584] sm:$0xf] }
 0x17e   :  { %3335 = vmatpush.bf16.xpose.msrb.mxu3 %v5041_v33  ;;  %v5165_v33 = vor.u32 %v6619_v26, %v5162_v27  ;;  %v5078_v26 = vld [vmem:[%s10428_s1 + $0x5a4] sm:$0xf0] }
 0x180   :  { %v3183_v13 = vpop.f32.mrf.mxu0 }
 0x181   :  { %v3184_v15 = vadd.f32 %v3183_v13, %v8166_v17  ;;  %v3197_v16 = vpop.f32.mrf.mxu1  ;;  %v5154_v17 = vld [vmem:[%s10428_s1 + $0x644] sm:$0xf0]  ;;  %v5109_v13 = vor.u32 %v6605_v4, %v5106_v5 }
 0x182   :  { %v5157_v29 = vor.u32 %v6618_v22, %v5154_v17  ;;  %v5070_v22 = vld [vmem:[%s10428_s1 + $0x59c] sm:$0xf0]  ;;  %v5076_v17 = vld [vmem:[%s10428_s1 + $0x588] sm:$0xf] }
 0x183   :  { %6152 = vmatmul.msk.bf16.vlgmr.msrb.gmra.mxu0 %vm2810_vm0, %v7466_v46  ;;  %v8353_v21 = vadd.f32 %v3197_v16, %v3184_v15  ;;  %v5084_v16 = vld [vmem:[%s10428_s1 + $0x590] sm:$0xf] }
 0x184   :  { %3342 = vmatpush.bf16.xpose.msra.mxu0 %v5241_v35  ;;  %3322 = vmatmul.bf16.vlgmr.msrb.gmra.mxu2 %v7288_v19  ;;  %v2899_v35 = vsel %vm2810_vm0, %v5169_v28, 0  ;;  %v5085_v27 = vor.u32 %v6602_v18, %v5084_v16  ;;  %v5073_v28 = vor.u32 %v6597_v20, %v5070_v22  ;;  %v5432_v16 = vld [vmem:[%s10428_s1 + $0x858] sm:$0xf]  ;;  %v6691_v18 = vld [vmem:[%s10428_s1 + $0x870] sm:$0xf0] }
 0x185   :  { %3356 = vmatpush.bf16.xpose.msra.mxu1 %v5245_v36  ;;  %3370 = vmatpush.bf16.xpose.msra.mxu2 %v5249_v39  ;;  %10433 = vst [vmem:[#allocation7_spill] sm:$0xff] %v8353_v21  ;;  %v5140_v36 = vld [vmem:[%s10428_s1 + $0x600] sm:$0xf]  ;;  %v6616_v39 = vld [vmem:[%s10428_s1 + $0x618] sm:$0xf0] }
 0x186   :  { %3384 = vmatpush.bf16.xpose.msra.mxu3 %v2908_v40  ;;  %3308 = vmatmul.bf16.vlgmr.msrb.gmra.mxu1 %v7260_v6  ;;  %v6611_v40 = vld [vmem:[%s10428_s1 + $0x5f4] sm:$0xf]  ;;  %v5141_v52 = vor.u32 %v6616_v39, %v5140_v36  ;;  %v6590_v39 = vld [vmem:[%s10428_s1 + $0x54c] sm:$0xf]  ;;  %v6688_v20 = vld [vmem:[%s10428_s1 + $0x85c] sm:$0xf] }
 0x187   :  { %3336 = vmatmul.bf16.vlgmr.msrb.gmra.mxu3 %v7265_v9  ;;  %v5129_v55 = vor.u32 %v6611_v40, %v5126_v41  ;;  %v6595_v36 = vld [vmem:[%s10428_s1 + $0x570] sm:$0xf0]  ;;  %v5042_v40 = vld [vmem:[%s10428_s1 + $0x564] sm:$0xf0]  ;;  %v5048_v41 = vld [vmem:[%s10428_s1 + $0x550] sm:$0xf] }
 0x188   :  { %v5434_v22 = vld [vmem:[%s10428_s1 + $0x874] sm:$0xf0] }
 0x18c   :  { %3343 = vmatpush.bf16.xpose.msra.mxu0 %v5213_v56  ;;  %v5133_v56 = vor.u32 %v6615_v45, %v5132_v44  ;;  %v6594_v44 = vld [vmem:[%s10428_s1 + $0x568] sm:$0xf0]  ;;  %v6591_v45 = vld [vmem:[%s10428_s1 + $0x554] sm:$0xf] }
 0x18d   :  { %3357 = vmatpush.bf16.xpose.msra.mxu1 %v5217_v57  ;;  %3371 = vmatpush.bf16.xpose.msra.mxu2 %v5221_v58  ;;  %v5137_v57 = vor.u32 %v6612_v48, %v5134_v49  ;;  %v2896_v58 = vsel %vm2810_vm0, %v5141_v52, 0  ;;  %v5050_v48 = vld [vmem:[%s10428_s1 + $0x56c] sm:$0xf0]  ;;  %v5452_v52 = vld [vmem:[%s10428_s1 + $0x888] sm:$0xf]  ;;  %v5049_v62 = vor.u32 %v6594_v44, %v5048_v41 }
 0x18e   :  { %3385 = vmatpush.bf16.xpose.msra.mxu3 %v2905_v60  ;;  %v5112_v60 = vld [vmem:[%s10428_s1 + $0x5c8] sm:$0xf]  ;;  %v5053_v0 = vor.u32 %v6591_v45, %v5050_v48 }
 0x18f   :  { %v5113_v7 = vor.u32 %v6609_v61, %v5112_v60  ;;  %v5460_v60 = vld [vmem:[%s10428_s1 + $0x890] sm:$0xf]  ;;  %v6698_v61 = vld [vmem:[%s10428_s1 + $0x8a8] sm:$0xf0] }
 0x191   :  { %v2893_v15 = vsel %vm2810_vm0, %v5113_v7, 0 }
 0x194   :  { %3344 = vmatpush.bf16.xpose.msra.mxu0 %v5185_v10  ;;  %v3211_v10 = vpop.f32.mrf.mxu2 }
 0x195   :  { %3358 = vmatpush.bf16.xpose.msra.mxu1 %v5189_v11  ;;  %3372 = vmatpush.bf16.xpose.msra.mxu2 %v5193_v12  ;;  %v3225_v11 = vpop.f32.mrf.mxu3  ;;  %v5105_v12 = vor.u32 %v6608_v2, %v5104_v1  ;;  %v6695_v1 = vld [vmem:[%s10428_s1 + $0x894] sm:$0xf]  ;;  %v5462_v2 = vld [vmem:[%s10428_s1 + $0x8ac] sm:$0xf0] }
 0x196   :  { %3386 = vmatpush.bf16.xpose.msra.mxu3 %v2902_v14  ;;  %v8427_v14 = vadd.f32 %v3225_v11, %v3211_v10  ;;  %v5465_v10 = vor.u32 %v6695_v1, %v5462_v2  ;;  %v5424_v11 = vld [vmem:[%s10428_s1 + $0x850] sm:$0xf] }
 0x19c   :  { %3345 = vmatpush.bf16.xpose.msra.mxu0 %v5157_v29  ;;  %v5077_v29 = vor.u32 %v6601_v23, %v5076_v17 }
 0x19d   :  { %3359 = vmatpush.bf16.xpose.msra.mxu1 %v5161_v31  ;;  %3373 = vmatpush.bf16.xpose.msra.mxu2 %v5165_v33  ;;  %v5081_v31 = vor.u32 %v6598_v24, %v5078_v26  ;;  %v2890_v33 = vsel %vm2810_vm0, %v5085_v27, 0  ;;  %v5433_v24 = vor.u32 %v6691_v18, %v5432_v16  ;;  %v8529_v26 = vpop.f32.mrf.mxu0  ;;  %v5437_v27 = vor.u32 %v6688_v20, %v5434_v22 }
 0x19e   :  { %3387 = vmatpush.bf16.xpose.msra.mxu3 %v2899_v35  ;;  %v5056_v35 = vld [vmem:[%s10428_s1 + $0x558] sm:$0xf] }
 0x19f   :  { %v5057_v49 = vor.u32 %v6595_v36, %v5056_v35  ;;  %v5404_v35 = vld [vmem:[%s10428_s1 + $0x820] sm:$0xf]  ;;  %v6684_v36 = vld [vmem:[%s10428_s1 + $0x838] sm:$0xf0] }
 0x1a0   :  { %v5405_v45 = vor.u32 %v6684_v36, %v5404_v35 }
 0x1a1   :  { %v2887_v5 = vsel %vm2810_vm0, %v5057_v49, 0 }
 0x1a4   :  { %3346 = vmatpush.bf16.xpose.msra.mxu0 %v5129_v55  ;;  %v6697_v55 = vld [vmem:[%s10428_s1 + $0x8a0] sm:$0xf0] }
 0x1a5   :  { %3360 = vmatpush.bf16.xpose.msra.mxu1 %v5133_v56  ;;  %3374 = vmatpush.bf16.xpose.msra.mxu2 %v5137_v57  ;;  %v6694_v56 = vld [vmem:[%s10428_s1 + $0x88c] sm:$0xf]  ;;  %v5045_v57 = vor.u32 %v6590_v39, %v5042_v40  ;;  %v5453_v4 = vor.u32 %v6697_v55, %v5452_v52  ;;  %v6681_v39 = vld [vmem:[%s10428_s1 + $0x824] sm:$0xf]  ;;  %v5406_v40 = vld [vmem:[%s10428_s1 + $0x83c] sm:$0xf0] }
 0x1a6   :  { %3388 = vmatpush.bf16.xpose.msra.mxu3 %v2896_v58  ;;  %v5454_v58 = vld [vmem:[%s10428_s1 + $0x8a4] sm:$0xf0]  ;;  %v5409_v48 = vor.u32 %v6681_v39, %v5406_v40  ;;  %v5368_v55 = vld [vmem:[%s10428_s1 + $0x7e0] sm:$0xf] }
 0x1a7   :  { %v5457_v7 = vor.u32 %v6694_v56, %v5454_v58  ;;  %v6676_v56 = vld [vmem:[%s10428_s1 + $0x7f8] sm:$0xf0]  ;;  %v5376_v58 = vld [vmem:[%s10428_s1 + $0x7e8] sm:$0xf] }
 0x1ac   :  { %3347 = vmatpush.bf16.xpose.msra.mxu0 %v5101_v8  ;;  %v5461_v8 = vor.u32 %v6698_v61, %v5460_v60  ;;  %v6677_v60 = vld [vmem:[%s10428_s1 + $0x800] sm:$0xf0]  ;;  %v6674_v61 = vld [vmem:[%s10428_s1 + $0x7ec] sm:$0xf] }
 0x1ad   :  { %3361 = vmatpush.bf16.xpose.msra.mxu1 %v5105_v12  ;;  %3375 = vmatpush.bf16.xpose.msra.mxu2 %v5109_v13  ;;  %v6690_v12 = vld [vmem:[%s10428_s1 + $0x868] sm:$0xf0]  ;;  %v6687_v13 = vld [vmem:[%s10428_s1 + $0x854] sm:$0xf]  ;;  %v5377_v2 = vor.u32 %v6677_v60, %v5376_v58 }
 0x1ae   :  { %3389 = vmatpush.bf16.xpose.msra.mxu3 %v2893_v15  ;;  %v5426_v15 = vld [vmem:[%s10428_s1 + $0x86c] sm:$0xf0]  ;;  %v5425_v17 = vor.u32 %v6690_v12, %v5424_v11  ;;  %v6670_v12 = vld [vmem:[%s10428_s1 + $0x7c8] sm:$0xf0] }
 0x1af   :  { %v5429_v23 = vor.u32 %v6687_v13, %v5426_v15  ;;  %v5348_v11 = vld [vmem:[%s10428_s1 + $0x7b0] sm:$0xf]  ;;  %v6667_v13 = vld [vmem:[%s10428_s1 + $0x7b4] sm:$0xf] }
 0x1b0   :  { %v5350_v15 = vld [vmem:[%s10428_s1 + $0x7cc] sm:$0xf0]  ;;  %v5349_v20 = vor.u32 %v6670_v12, %v5348_v11  ;;  %v5266_v11 = vld [vmem:[%s10428_s1 + $0x724] sm:$0xf0]  ;;  %v5468_v12 = vld [vmem:[%s10428_s1 + $0x898] sm:$0xf] }
 0x1b1   :  { %v5353_v22 = vor.u32 %v6667_v13, %v5350_v15  ;;  %v6699_v13 = vld [vmem:[%s10428_s1 + $0x8b0] sm:$0xf0] }
 0x1b4   :  { %3348 = vmatpush.bf16.xpose.msra.mxu0 %v5073_v28  ;;  %v5396_v28 = vld [vmem:[%s10428_s1 + $0x818] sm:$0xf] }
 0x1b5   :  { %3362 = vmatpush.bf16.xpose.msra.mxu1 %v5077_v29  ;;  %3376 = vmatpush.bf16.xpose.msra.mxu2 %v5081_v31  ;;  %v6683_v29 = vld [vmem:[%s10428_s1 + $0x830] sm:$0xf0]  ;;  %v6680_v31 = vld [vmem:[%s10428_s1 + $0x81c] sm:$0xf] }
 0x1b6   :  { %3390 = vmatpush.bf16.xpose.msra.mxu3 %v2890_v33  ;;  %v5398_v33 = vld [vmem:[%s10428_s1 + $0x834] sm:$0xf0]  ;;  %v5397_v41 = vor.u32 %v6683_v29, %v5396_v28  ;;  %v6663_v29 = vld [vmem:[%s10428_s1 + $0x790] sm:$0xf0] }
 0x1b7   :  { %v5401_v44 = vor.u32 %v6680_v31, %v5398_v33  ;;  %v5320_v28 = vld [vmem:[%s10428_s1 + $0x778] sm:$0xf]  ;;  %v6660_v31 = vld [vmem:[%s10428_s1 + $0x77c] sm:$0xf] }
 0x1b8   :  { %v5322_v33 = vld [vmem:[%s10428_s1 + $0x794] sm:$0xf0]  ;;  %v5321_v39 = vor.u32 %v6663_v29, %v5320_v28  ;;  %v5469_v28 = vor.u32 %v6699_v13, %v5468_v12  ;;  %v6679_v13 = vld [vmem:[%s10428_s1 + $0x810] sm:$0xf0] }
 0x1b9   :  { %v5325_v40 = vor.u32 %v6660_v31, %v5322_v33  ;;  %v5392_v12 = vld [vmem:[%s10428_s1 + $0x7f8] sm:$0xf] }
 0x1bc   :  { %3349 = vmatpush.bf16.xpose.msra.mxu0 %v5045_v57  ;;  %v6673_v57 = vld [vmem:[%s10428_s1 + $0x7e4] sm:$0xf] }
 0x1bd   :  { %3363 = vmatpush.bf16.xpose.msra.mxu1 %v5049_v62  ;;  %3377 = vmatpush.bf16.xpose.msra.mxu2 %v5053_v0  ;;  %v5378_v62 = vld [vmem:[%s10428_s1 + $0x804] sm:$0xf0]  ;;  %v5369_v0 = vor.u32 %v6676_v56, %v5368_v55  ;;  %v6656_v55 = vld [vmem:[%s10428_s1 + $0x758] sm:$0xf0]  ;;  %v6653_v56 = vld [vmem:[%s10428_s1 + $0x744] sm:$0xf] }
 0x1be   :  { %3391 = vmatpush.bf16.xpose.msra.mxu3 %v2887_v5  ;;  %v5340_v5 = vld [vmem:[%s10428_s1 + $0x7a8] sm:$0xf] }
 0x1c0   :  { %v3239_v49 = vpop.f32.mrf.mxu0 }
 0x1c1   :  { %v8560_v52 = vadd.f32 %v3239_v49, %v8427_v14  ;;  %v5370_v14 = vld [vmem:[%s10428_s1 + $0x7fc] sm:$0xf0] }
 0x1c2   :  { %v5373_v1 = vor.u32 %v6673_v57, %v5370_v14  ;;  %v5292_v49 = vld [vmem:[%s10428_s1 + $0x740] sm:$0xf] }
 0x1c3   :  { %3350 = vmatmul.bf16.vlgmr.msra.gmra.mxu0 %v7302_v25  ;;  %v5294_v57 = vld [vmem:[%s10428_s1 + $0x75c] sm:$0xf0]  ;;  %v5293_v60 = vor.u32 %v6656_v55, %v5292_v49  ;;  %v6746_v49 = vld [vmem:[%s10428_s1 + $0xa28] sm:$0xf0] }
 0x1c4   :  { %3398 = vmatpush.bf16.xpose.msrb.mxu0 %v5453_v4  ;;  %3378 = vmatmul.bf16.vlgmr.msra.gmra.mxu2 %v7468_v47  ;;  %v5381_v4 = vor.u32 %v6674_v61, %v5378_v62  ;;  %v5297_v61 = vor.u32 %v6653_v56, %v5294_v57  ;;  %v5256_v62 = vld [vmem:[%s10428_s1 + $0x700] sm:$0xf] }
 0x1c5   :  { %3412 = vmatpush.bf16.xpose.msrb.mxu1 %v5457_v7  ;;  %3426 = vmatpush.bf16.xpose.msrb.mxu2 %v5461_v8  ;;  %v6669_v7 = vld [vmem:[%s10428_s1 + $0x7c0] sm:$0xf0]  ;;  %v6666_v8 = vld [vmem:[%s10428_s1 + $0x7ac] sm:$0xf] }
 0x1c6   :  { %3440 = vmatpush.bf16.xpose.msrb.mxu3 %v5465_v10  ;;  %3364 = vmatmul.bf16.vlgmr.msra.gmra.mxu1 %v7455_v42  ;;  %v5342_v10 = vld [vmem:[%s10428_s1 + $0x7c4] sm:$0xf0]  ;;  %v5341_v16 = vor.u32 %v6669_v7, %v5340_v5  ;;  %v6700_v5 = vld [vmem:[%s10428_s1 + $0x8b8] sm:$0xf0] }
 0x1c7   :  { %6153 = vmatmul.msk.bf16.vlgmr.msra.gmra.mxu3 %vm2810_vm0, %v7466_v46  ;;  %v5345_v18 = vor.u32 %v6666_v8, %v5342_v10  ;;  %v5264_v7 = vld [vmem:[%s10428_s1 + $0x708] sm:$0xf]  ;;  %v6649_v8 = vld [vmem:[%s10428_s1 + $0x720] sm:$0xf0]  ;;  %v6646_v10 = vld [vmem:[%s10428_s1 + $0x70c] sm:$0xf] }
 0x1cc   :  { %3399 = vmatpush.bf16.xpose.msrb.mxu0 %v5425_v17  ;;  %v5312_v17 = vld [vmem:[%s10428_s1 + $0x770] sm:$0xf] }
 0x1cd   :  { %3413 = vmatpush.bf16.xpose.msrb.mxu1 %v5429_v23  ;;  %3427 = vmatpush.bf16.xpose.msrb.mxu2 %v5433_v24  ;;  %v6662_v23 = vld [vmem:[%s10428_s1 + $0x788] sm:$0xf0]  ;;  %v6659_v24 = vld [vmem:[%s10428_s1 + $0x774] sm:$0xf] }
 0x1ce   :  { %3441 = vmatpush.bf16.xpose.msrb.mxu3 %v5437_v27  ;;  %v5314_v27 = vld [vmem:[%s10428_s1 + $0x78c] sm:$0xf0]  ;;  %v5313_v35 = vor.u32 %v6662_v23, %v5312_v17  ;;  %v5265_v17 = vor.u32 %v6649_v8, %v5264_v7  ;;  %v5676_v23 = vld [vmem:[%s10428_s1 + $0xa48] sm:$0xf] }
 0x1cf   :  { %v5317_v36 = vor.u32 %v6659_v24, %v5314_v27  ;;  %v6753_v24 = vld [vmem:[%s10428_s1 + $0xa60] sm:$0xf0]  ;;  %v5269_v27 = vor.u32 %v6646_v10, %v5266_v11 }
 0x1d0   :  { %v5677_v33 = vor.u32 %v6753_v24, %v5676_v23  ;;  %v6732_v23 = vld [vmem:[%s10428_s1 + $0x9b8] sm:$0xf0] }
 0x1d4   :  { %3400 = vmatpush.bf16.xpose.msrb.mxu0 %v5397_v41  ;;  %v5284_v41 = vld [vmem:[%s10428_s1 + $0x738] sm:$0xf] }
 0x1d5   :  { %3414 = vmatpush.bf16.xpose.msrb.mxu1 %v5401_v44  ;;  %3428 = vmatpush.bf16.xpose.msrb.mxu2 %v5405_v45  ;;  %v6655_v44 = vld [vmem:[%s10428_s1 + $0x750] sm:$0xf0]  ;;  %v6652_v45 = vld [vmem:[%s10428_s1 + $0x73c] sm:$0xf] }
 0x1d6   :  { %3442 = vmatpush.bf16.xpose.msrb.mxu3 %v5409_v48  ;;  %v5286_v48 = vld [vmem:[%s10428_s1 + $0x754] sm:$0xf0]  ;;  %v5285_v14 = vor.u32 %v6655_v44, %v5284_v41  ;;  %v6689_v41 = vld [vmem:[%s10428_s1 + $0x864] sm:$0xf]  ;;  %v5442_v44 = vld [vmem:[%s10428_s1 + $0x87c] sm:$0xf0] }
 0x1d7   :  { %v5289_v58 = vor.u32 %v6652_v45, %v5286_v48  ;;  %v5648_v48 = vld [vmem:[%s10428_s1 + $0xa10] sm:$0xf]  ;;  %v5445_v56 = vor.u32 %v6689_v41, %v5442_v44  ;;  %v5564_v44 = vld [vmem:[%s10428_s1 + $0x968] sm:$0xf] }
 0x1dc   :  { %3401 = vmatpush.bf16.xpose.msrb.mxu0 %v5369_v0  ;;  %v6648_v0 = vld [vmem:[%s10428_s1 + $0x718] sm:$0xf0] }
 0x1dd   :  { %3415 = vmatpush.bf16.xpose.msrb.mxu1 %v5373_v1  ;;  %3429 = vmatpush.bf16.xpose.msrb.mxu2 %v5377_v2  ;;  %v6645_v1 = vld [vmem:[%s10428_s1 + $0x704] sm:$0xf]  ;;  %v5258_v2 = vld [vmem:[%s10428_s1 + $0x71c] sm:$0xf0]  ;;  %v5257_v15 = vor.u32 %v6648_v0, %v5256_v62  ;;  %v6682_v0 = vld [vmem:[%s10428_s1 + $0x82c] sm:$0xf] }
 0x1de   :  { %3443 = vmatpush.bf16.xpose.msrb.mxu3 %v5381_v4  ;;  %v5476_v4 = vld [vmem:[%s10428_s1 + $0x8a0] sm:$0xf]  ;;  %v6685_v62 = vld [vmem:[%s10428_s1 + $0x840] sm:$0xf0] }
 0x1e4   :  { %3402 = vmatpush.bf16.xpose.msrb.mxu0 %v5341_v16  ;;  %v6696_v16 = vld [vmem:[%s10428_s1 + $0x89c] sm:$0xf] }
 0x1e5   :  { %3416 = vmatpush.bf16.xpose.msrb.mxu1 %v5345_v18  ;;  %3430 = vmatpush.bf16.xpose.msrb.mxu2 %v5349_v20  ;;  %v5470_v18 = vld [vmem:[%s10428_s1 + $0x8b4] sm:$0xf0]  ;;  %v5477_v20 = vor.u32 %v6700_v5, %v5476_v4  ;;  %v6739_v5 = vld [vmem:[%s10428_s1 + $0x9f0] sm:$0xf0] }
 0x1e6   :  { %3444 = vmatpush.bf16.xpose.msrb.mxu3 %v5353_v22  ;;  %v5261_v22 = vor.u32 %v6645_v1, %v5258_v2  ;;  %v5473_v29 = vor.u32 %v6696_v16, %v5470_v18  ;;  %v5414_v1 = vld [vmem:[%s10428_s1 + $0x844] sm:$0xf0]  ;;  %v5620_v4 = vld [vmem:[%s10428_s1 + $0x9d8] sm:$0xf]  ;;  %v6678_v16 = vld [vmem:[%s10428_s1 + $0x808] sm:$0xf0] }
 0x1e7   :  { %v2932_v31 = vsel %vm2810_vm0, %v5477_v20, 0  ;;  %v5417_v8 = vor.u32 %v6682_v0, %v5414_v1  ;;  %v5621_v11 = vor.u32 %v6739_v5, %v5620_v4  ;;  %v6675_v18 = vld [vmem:[%s10428_s1 + $0x7f4] sm:$0xf]  ;;  %v5386_v20 = vld [vmem:[%s10428_s1 + $0x80c] sm:$0xf0] }
 0x1e8   :  { %v5536_v1 = vld [vmem:[%s10428_s1 + $0x930] sm:$0xf] }
 0x1ec   :  { %3403 = vmatpush.bf16.xpose.msrb.mxu0 %v5313_v35  ;;  %v5448_v35 = vld [vmem:[%s10428_s1 + $0x868] sm:$0xf] }
 0x1ed   :  { %3417 = vmatpush.bf16.xpose.msrb.mxu1 %v5317_v36  ;;  %3431 = vmatpush.bf16.xpose.msrb.mxu2 %v5321_v39  ;;  %v6693_v36 = vld [vmem:[%s10428_s1 + $0x880] sm:$0xf0]  ;;  %v5440_v39 = vld [vmem:[%s10428_s1 + $0x860] sm:$0xf] }
 0x1ee   :  { %3445 = vmatpush.bf16.xpose.msrb.mxu3 %v5325_v40  ;;  %v6692_v40 = vld [vmem:[%s10428_s1 + $0x878] sm:$0xf0]  ;;  %v5449_v45 = vor.u32 %v6693_v36, %v5448_v35  ;;  %v5356_v35 = vld [vmem:[%s10428_s1 + $0x7b8] sm:$0xf]  ;;  %v6671_v36 = vld [vmem:[%s10428_s1 + $0x7d0] sm:$0xf0] }
 0x1ef   :  { %v5441_v55 = vor.u32 %v6692_v40, %v5440_v39  ;;  %v6668_v39 = vld [vmem:[%s10428_s1 + $0x7bc] sm:$0xf]  ;;  %v5358_v40 = vld [vmem:[%s10428_s1 + $0x7d4] sm:$0xf0] }
 0x1f0   :  { %v2929_v57 = vsel %vm2810_vm0, %v5449_v45, 0  ;;  %v6725_v45 = vld [vmem:[%s10428_s1 + $0x980] sm:$0xf0] }
 0x1f4   :  { %3404 = vmatpush.bf16.xpose.msrb.mxu0 %v5285_v14  ;;  %v5649_v14 = vor.u32 %v6746_v49, %v5648_v48  ;;  %v5357_v48 = vor.u32 %v6671_v36, %v5356_v35  ;;  %v5361_v49 = vor.u32 %v6668_v39, %v5358_v40  ;;  %v6647_v35 = vld [vmem:[%s10428_s1 + $0x714] sm:$0xf]  ;;  %v5274_v36 = vld [vmem:[%s10428_s1 + $0x72c] sm:$0xf0]  ;;  %v5480_v40 = vld [vmem:[%s10428_s1 + $0x8c0] sm:$0xf] }
 0x1f5   :  { %3418 = vmatpush.bf16.xpose.msrb.mxu1 %v5289_v58  ;;  %3432 = vmatpush.bf16.xpose.msrb.mxu2 %v5293_v60  ;;  %v5420_v58 = vld [vmem:[%s10428_s1 + $0x830] sm:$0xf]  ;;  %v6686_v60 = vld [vmem:[%s10428_s1 + $0x848] sm:$0xf0] }
 0x1f6   :  { %3446 = vmatpush.bf16.xpose.msrb.mxu3 %v5297_v61  ;;  %v5412_v61 = vld [vmem:[%s10428_s1 + $0x828] sm:$0xf]  ;;  %v5421_v2 = vor.u32 %v6686_v60, %v5420_v58  ;;  %v5328_v58 = vld [vmem:[%s10428_s1 + $0x780] sm:$0xf]  ;;  %v6664_v60 = vld [vmem:[%s10428_s1 + $0x798] sm:$0xf0] }
 0x1f7   :  { %v5413_v7 = vor.u32 %v6685_v62, %v5412_v61  ;;  %v6661_v61 = vld [vmem:[%s10428_s1 + $0x784] sm:$0xf]  ;;  %v5330_v62 = vld [vmem:[%s10428_s1 + $0x79c] sm:$0xf0]  ;;  %v5329_v4 = vor.u32 %v6664_v60, %v5328_v58  ;;  %v5692_v58 = vld [vmem:[%s10428_s1 + $0xa58] sm:$0xf] }
 0x1f8   :  { %v2926_v10 = vsel %vm2810_vm0, %v5421_v2, 0  ;;  %v6718_v2 = vld [vmem:[%s10428_s1 + $0x948] sm:$0xf0]  ;;  %v5333_v5 = vor.u32 %v6661_v61, %v5330_v62  ;;  %v6755_v60 = vld [vmem:[%s10428_s1 + $0xa70] sm:$0xf0] }
 0x1fc   :  { %3405 = vmatpush.bf16.xpose.msrb.mxu0 %v5257_v15  ;;  %v5384_v15 = vld [vmem:[%s10428_s1 + $0x7f0] sm:$0xf] }
 0x1fd   :  { %3419 = vmatpush.bf16.xpose.msrb.mxu1 %v5261_v22  ;;  %3433 = vmatpush.bf16.xpose.msrb.mxu2 %v5265_v17  ;;  %v5393_v22 = vor.u32 %v6679_v13, %v5392_v12  ;;  %v5592_v17 = vld [vmem:[%s10428_s1 + $0x9a0] sm:$0xf]  ;;  %v5385_v24 = vor.u32 %v6678_v16, %v5384_v15  ;;  %v5300_v12 = vld [vmem:[%s10428_s1 + $0x748] sm:$0xf]  ;;  %v6657_v13 = vld [vmem:[%s10428_s1 + $0x760] sm:$0xf0] }
 0x1fe   :  { %3447 = vmatpush.bf16.xpose.msrb.mxu3 %v5269_v27  ;;  %v5389_v27 = vor.u32 %v6675_v18, %v5386_v20  ;;  %v6654_v15 = vld [vmem:[%s10428_s1 + $0x74c] sm:$0xf]  ;;  %v5302_v16 = vld [vmem:[%s10428_s1 + $0x764] sm:$0xf0]  ;;  %v5508_v20 = vld [vmem:[%s10428_s1 + $0x8f8] sm:$0xf] }
 0x203   :  { %3406 = vmatmul.bf16.vlgmr.msrb.gmra.mxu0 %v7260_v6 }
 0x204   :  { %3454 = vmatpush.bf16.xpose.msra.mxu0 %v5469_v28  ;;  %3434 = vmatmul.bf16.vlgmr.msrb.gmra.mxu2 %v7265_v9  ;;  %v2923_v28 = vsel %vm2810_vm0, %v5393_v22, 0  ;;  %v6711_v22 = vld [vmem:[%s10428_s1 + $0x910] sm:$0xf0] }
 0x205   :  { %3468 = vmatpush.bf16.xpose.msra.mxu1 %v5473_v29  ;;  %3482 = vmatpush.bf16.xpose.msra.mxu2 %v2932_v31  ;;  %v5593_v29 = vor.u32 %v6732_v23, %v5592_v17  ;;  %v5364_v31 = vld [vmem:[%s10428_s1 + $0x7c0] sm:$0xf]  ;;  %v5301_v17 = vor.u32 %v6657_v13, %v5300_v12  ;;  %v5305_v23 = vor.u32 %v6654_v15, %v5302_v16  ;;  %v5658_v12 = vld [vmem:[%s10428_s1 + $0xa34] sm:$0xf0]  ;;  %v6748_v15 = vld [vmem:[%s10428_s1 + $0xa38] sm:$0xf0] }
 0x206   :  { %3496 = vmatpush.bf16.xpose.msra.mxu3 %v5677_v33  ;;  %3420 = vmatmul.bf16.vlgmr.msrb.gmra.mxu1 %v7288_v19  ;;  %v6672_v33 = vld [vmem:[%s10428_s1 + $0x7d8] sm:$0xf0]  ;;  %v5664_v13 = vld [vmem:[%s10428_s1 + $0xa20] sm:$0xf] }
 0x207   :  { %3448 = vmatmul.bf16.vlgmr.msrb.gmra.mxu3 %v7302_v25  ;;  %v5365_v41 = vor.u32 %v6672_v33, %v5364_v31  ;;  %v5272_v31 = vld [vmem:[%s10428_s1 + $0x710] sm:$0xf]  ;;  %v6650_v33 = vld [vmem:[%s10428_s1 + $0x728] sm:$0xf0] }
 0x20c   :  { %3455 = vmatpush.bf16.xpose.msra.mxu0 %v5441_v55  ;;  %v2920_v55 = vsel %vm2810_vm0, %v5365_v41, 0  ;;  %v6704_v41 = vld [vmem:[%s10428_s1 + $0x8d8] sm:$0xf0] }
 0x20d   :  { %3469 = vmatpush.bf16.xpose.msra.mxu1 %v5445_v56  ;;  %3483 = vmatpush.bf16.xpose.msra.mxu2 %v2929_v57  ;;  %v5565_v56 = vor.u32 %v6725_v45, %v5564_v44  ;;  %v5336_v57 = vld [vmem:[%s10428_s1 + $0x788] sm:$0xf]  ;;  %v6750_v44 = vld [vmem:[%s10428_s1 + $0xa4c] sm:$0xf]  ;;  %v5481_v62 = vor.u32 %v6704_v41, %v5480_v40  ;;  %v6729_v41 = vld [vmem:[%s10428_s1 + $0x9a4] sm:$0xf] }
 0x20e   :  { %3497 = vmatpush.bf16.xpose.msra.mxu3 %v5649_v14  ;;  %v6665_v14 = vld [vmem:[%s10428_s1 + $0x7a0] sm:$0xf0]  ;;  %v5678_v45 = vld [vmem:[%s10428_s1 + $0xa64] sm:$0xf0] }
 0x20f   :  { %v5337_v0 = vor.u32 %v6665_v14, %v5336_v57  ;;  %v5686_v57 = vld [vmem:[%s10428_s1 + $0xa6c] sm:$0xf0]  ;;  %v5277_v14 = vor.u32 %v6647_v35, %v5274_v36 }
 0x214   :  { %3456 = vmatpush.bf16.xpose.msra.mxu0 %v5413_v7  ;;  %v2917_v7 = vsel %vm2810_vm0, %v5337_v0, 0  ;;  %v5681_v0 = vor.u32 %v6750_v44, %v5678_v45  ;;  %v5594_v44 = vld [vmem:[%s10428_s1 + $0x9bc] sm:$0xf0]  ;;  %v5600_v45 = vld [vmem:[%s10428_s1 + $0x9a8] sm:$0xf] }
 0x215   :  { %3470 = vmatpush.bf16.xpose.msra.mxu1 %v5417_v8  ;;  %3484 = vmatpush.bf16.xpose.msra.mxu2 %v2926_v10  ;;  %v5537_v8 = vor.u32 %v6718_v2, %v5536_v1  ;;  %v5308_v10 = vld [vmem:[%s10428_s1 + $0x750] sm:$0xf] }
 0x216   :  { %3498 = vmatpush.bf16.xpose.msra.mxu3 %v5621_v11  ;;  %v6658_v11 = vld [vmem:[%s10428_s1 + $0x768] sm:$0xf0] }
 0x217   :  { %v5309_v18 = vor.u32 %v6658_v11, %v5308_v10  ;;  %v6747_v10 = vld [vmem:[%s10428_s1 + $0xa30] sm:$0xf0]  ;;  %v6744_v11 = vld [vmem:[%s10428_s1 + $0xa1c] sm:$0xf] }
 0x21c   :  { %3457 = vmatpush.bf16.xpose.msra.mxu0 %v5385_v24  ;;  %v2914_v24 = vsel %vm2810_vm0, %v5309_v18, 0 }
 0x21d   :  { %3471 = vmatpush.bf16.xpose.msra.mxu1 %v5389_v27  ;;  %3485 = vmatpush.bf16.xpose.msra.mxu2 %v2923_v28  ;;  %v5509_v27 = vor.u32 %v6711_v22, %v5508_v20  ;;  %v5280_v28 = vld [vmem:[%s10428_s1 + $0x718] sm:$0xf]  ;;  %v5661_v20 = vor.u32 %v6744_v11, %v5658_v12  ;;  %v5665_v22 = vor.u32 %v6748_v15, %v5664_v13  ;;  %v6727_v12 = vld [vmem:[%s10428_s1 + $0x990] sm:$0xf0] }
 0x21e   :  { %3499 = vmatpush.bf16.xpose.msra.mxu3 %v5593_v29  ;;  %v6651_v29 = vld [vmem:[%s10428_s1 + $0x730] sm:$0xf0]  ;;  %v5580_v11 = vld [vmem:[%s10428_s1 + $0x978] sm:$0xf] }
 0x21f   :  { %v5281_v39 = vor.u32 %v6651_v29, %v5280_v28  ;;  %v6737_v28 = vld [vmem:[%s10428_s1 + $0x9e4] sm:$0xf]  ;;  %v5630_v29 = vld [vmem:[%s10428_s1 + $0x9fc] sm:$0xf0] }
 0x221   :  { %v2911_v61 = vsel %vm2810_vm0, %v5281_v39, 0  ;;  %v5633_v39 = vor.u32 %v6737_v28, %v5630_v29  ;;  %v6716_v28 = vld [vmem:[%s10428_s1 + $0x93c] sm:$0xf]  ;;  %v5546_v29 = vld [vmem:[%s10428_s1 + $0x954] sm:$0xf0] }
 0x224   :  { %3458 = vmatpush.bf16.xpose.msra.mxu0 %v5357_v48  ;;  %v5684_v48 = vld [vmem:[%s10428_s1 + $0xa50] sm:$0xf] }
 0x225   :  { %3472 = vmatpush.bf16.xpose.msra.mxu1 %v5361_v49  ;;  %3486 = vmatpush.bf16.xpose.msra.mxu2 %v2920_v55  ;;  %v5273_v49 = vor.u32 %v6650_v33, %v5272_v31  ;;  %v6754_v55 = vld [vmem:[%s10428_s1 + $0xa68] sm:$0xf0]  ;;  %v5636_v31 = vld [vmem:[%s10428_s1 + $0x9e8] sm:$0xf]  ;;  %v6741_v33 = vld [vmem:[%s10428_s1 + $0xa00] sm:$0xf0] }
 0x226   :  { %3500 = vmatpush.bf16.xpose.msra.mxu3 %v5565_v56  ;;  %v6751_v56 = vld [vmem:[%s10428_s1 + $0xa54] sm:$0xf]  ;;  %v5685_v1 = vor.u32 %v6754_v55, %v5684_v48  ;;  %v5637_v40 = vor.u32 %v6741_v33, %v5636_v31  ;;  %v6733_v48 = vld [vmem:[%s10428_s1 + $0x9c0] sm:$0xf0]  ;;  %v5602_v55 = vld [vmem:[%s10428_s1 + $0x9c4] sm:$0xf0] }
 0x227   :  { %v5689_v2 = vor.u32 %v6751_v56, %v5686_v57  ;;  %v5608_v56 = vld [vmem:[%s10428_s1 + $0x9b0] sm:$0xf]  ;;  %v6734_v57 = vld [vmem:[%s10428_s1 + $0x9c8] sm:$0xf0]  ;;  %v5552_v31 = vld [vmem:[%s10428_s1 + $0x940] sm:$0xf] }
 0x228   :  { %v6720_v33 = vld [vmem:[%s10428_s1 + $0x958] sm:$0xf0] }
 0x22c   :  { %3459 = vmatpush.bf16.xpose.msra.mxu0 %v5329_v4  ;;  %v5693_v4 = vor.u32 %v6755_v60, %v5692_v58  ;;  %v5601_v58 = vor.u32 %v6733_v48, %v5600_v45  ;;  %v6708_v45 = vld [vmem:[%s10428_s1 + $0x8fc] sm:$0xf]  ;;  %v5510_v48 = vld [vmem:[%s10428_s1 + $0x914] sm:$0xf0] }
 0x22d   :  { %3473 = vmatpush.bf16.xpose.msra.mxu1 %v5333_v5  ;;  %3487 = vmatpush.bf16.xpose.msra.mxu2 %v2917_v7  ;;  %v6743_v5 = vld [vmem:[%s10428_s1 + $0xa14] sm:$0xf]  ;;  %v5650_v7 = vld [vmem:[%s10428_s1 + $0xa2c] sm:$0xf0] }
 0x22e   :  { %3501 = vmatpush.bf16.xpose.msra.mxu3 %v5537_v8  ;;  %v5656_v8 = vld [vmem:[%s10428_s1 + $0xa18] sm:$0xf]  ;;  %v5653_v16 = vor.u32 %v6743_v5, %v5650_v7  ;;  %v6726_v5 = vld [vmem:[%s10428_s1 + $0x988] sm:$0xf0]  ;;  %v6723_v7 = vld [vmem:[%s10428_s1 + $0x974] sm:$0xf] }
 0x22f   :  { %v5657_v18 = vor.u32 %v6747_v10, %v5656_v8  ;;  %v5574_v8 = vld [vmem:[%s10428_s1 + $0x98c] sm:$0xf0]  ;;  %v9009_v10 = vpop.f32.mrf.mxu3 }
 0x234   :  { %3460 = vmatpush.bf16.xpose.msra.mxu0 %v5301_v17  ;;  %v6736_v17 = vld [vmem:[%s10428_s1 + $0x9dc] sm:$0xf] }
 0x235   :  { %3474 = vmatpush.bf16.xpose.msra.mxu1 %v5305_v23  ;;  %3488 = vmatpush.bf16.xpose.msra.mxu2 %v2914_v24  ;;  %v5622_v23 = vld [vmem:[%s10428_s1 + $0x9f4] sm:$0xf0]  ;;  %v5628_v24 = vld [vmem:[%s10428_s1 + $0x9e0] sm:$0xf] }
 0x236   :  { %3502 = vmatpush.bf16.xpose.msra.mxu3 %v5509_v27  ;;  %v6740_v27 = vld [vmem:[%s10428_s1 + $0x9f8] sm:$0xf0]  ;;  %v5625_v35 = vor.u32 %v6736_v17, %v5622_v23  ;;  %v6715_v17 = vld [vmem:[%s10428_s1 + $0x934] sm:$0xf]  ;;  %v5538_v23 = vld [vmem:[%s10428_s1 + $0x94c] sm:$0xf0] }
 0x237   :  { %v5629_v36 = vor.u32 %v6740_v27, %v5628_v24  ;;  %v5544_v24 = vld [vmem:[%s10428_s1 + $0x938] sm:$0xf]  ;;  %v6719_v27 = vld [vmem:[%s10428_s1 + $0x950] sm:$0xf0] }
 0x23c   :  { %3461 = vmatpush.bf16.xpose.msra.mxu0 %v5273_v49  ;;  %v6730_v49 = vld [vmem:[%s10428_s1 + $0x9ac] sm:$0xf] }
 0x23d   :  { %3475 = vmatpush.bf16.xpose.msra.mxu1 %v5277_v14  ;;  %3489 = vmatpush.bf16.xpose.msra.mxu2 %v2911_v61  ;;  %v5597_v14 = vor.u32 %v6729_v41, %v5594_v44  ;;  %v5605_v60 = vor.u32 %v6730_v49, %v5602_v55  ;;  %v8987_v61 = vpop.f32.mrf.mxu1  ;;  %v5553_v41 = vor.u32 %v6720_v33, %v5552_v31  ;;  %v5516_v49 = vld [vmem:[%s10428_s1 + $0x900] sm:$0xf]  ;;  %v9058_v55 = vpop.f32.mrf.mxu0  ;;  %v6752_v31 = vld [vmem:[%s10428_s1 + $0xa5c] sm:$0xf]  ;;  %v5694_v33 = vld [vmem:[%s10428_s1 + $0xa74] sm:$0xf0] }
 0x23e   :  { %3503 = vmatpush.bf16.xpose.msra.mxu3 %v5481_v62  ;;  %10434 = vst [vmem:[#allocation8_spill] sm:$0xff] %v8987_v61  ;;  %v5609_v62 = vor.u32 %v6734_v57, %v5608_v56  ;;  %v6712_v56 = vld [vmem:[%s10428_s1 + $0x918] sm:$0xf0]  ;;  %v6709_v57 = vld [vmem:[%s10428_s1 + $0x904] sm:$0xf] }
 0x243   :  { %3462 = vmatmul.bf16.vlgmr.msra.gmra.mxu0 %v7455_v42 }
 0x244   :  { %3510 = vmatpush.bf16.xpose.msrb.mxu0 %v5681_v0  ;;  %6154 = vmatmul.msk.bf16.vlgmr.msra.gmra.mxu2 %vm2810_vm0, %v7466_v46  ;;  %v8989_v0 = vpop.f32.mrf.mxu2 }
 0x245   :  { %3524 = vmatpush.bf16.xpose.msrb.mxu1 %v5685_v1  ;;  %3538 = vmatpush.bf16.xpose.msrb.mxu2 %v5689_v2  ;;  %v6722_v1 = vld [vmem:[%s10428_s1 + $0x96c] sm:$0xf]  ;;  %v5566_v2 = vld [vmem:[%s10428_s1 + $0x984] sm:$0xf0] }
 0x246   :  { %3552 = vmatpush.bf16.xpose.msrb.mxu3 %v5693_v4  ;;  %3476 = vmatmul.bf16.vlgmr.msra.gmra.mxu1 %v7468_v47  ;;  %v5572_v4 = vld [vmem:[%s10428_s1 + $0x970] sm:$0xf]  ;;  %v5569_v13 = vor.u32 %v6722_v1, %v5566_v2  ;;  %v5513_v1 = vor.u32 %v6708_v45, %v5510_v48  ;;  %v5517_v2 = vor.u32 %v6712_v56, %v5516_v49  ;;  %v6806_v49 = vld [vmem:[%s10428_s1 + $0xc0c] sm:$0xf]  ;;  %v5902_v56 = vld [vmem:[%s10428_s1 + $0xc24] sm:$0xf0] }
 0x247   :  { %3504 = vmatmul.bf16.vlgmr.msra.gmra.mxu3 %v7260_v6  ;;  %v5573_v15 = vor.u32 %v6726_v5, %v5572_v4 }
 0x24c   :  { %3511 = vmatpush.bf16.xpose.msrb.mxu0 %v5653_v16  ;;  %v5577_v16 = vor.u32 %v6723_v7, %v5574_v8 }
 0x24d   :  { %3525 = vmatpush.bf16.xpose.msrb.mxu1 %v5657_v18  ;;  %3539 = vmatpush.bf16.xpose.msrb.mxu2 %v5661_v20  ;;  %v9017_v18 = vpop.f32.mrf.mxu1  ;;  %v5581_v20 = vor.u32 %v6727_v12, %v5580_v11  ;;  %v6701_v11 = vld [vmem:[%s10428_s1 + $0x8c4] sm:$0xf]  ;;  %v5482_v12 = vld [vmem:[%s10428_s1 + $0x8dc] sm:$0xf0] }
 0x24e   :  { %3553 = vmatpush.bf16.xpose.msrb.mxu3 %v5665_v22  ;;  %v9019_v22 = vpop.f32.mrf.mxu2 }
 0x254   :  { %3512 = vmatpush.bf16.xpose.msrb.mxu0 %v5625_v35  ;;  %v5541_v35 = vor.u32 %v6715_v17, %v5538_v23  ;;  %v9099_v17 = vpop.f32.mrf.mxu0  ;;  %v6702_v23 = vld [vmem:[%s10428_s1 + $0x8cc] sm:$0xf] }
 0x255   :  { %3526 = vmatpush.bf16.xpose.msrb.mxu1 %v5629_v36  ;;  %3540 = vmatpush.bf16.xpose.msrb.mxu2 %v5633_v39  ;;  %v9045_v36 = vpop.f32.mrf.mxu3  ;;  %v5545_v39 = vor.u32 %v6719_v27, %v5544_v24  ;;  %v9047_v44 = vpop.f32.mrf.mxu1  ;;  %10436 = vst [vmem:[#allocation10_spill] sm:$0xff] %v9099_v17  ;;  %v5490_v24 = vld [vmem:[%s10428_s1 + $0x8e4] sm:$0xf0]  ;;  %v5496_v27 = vld [vmem:[%s10428_s1 + $0x8d0] sm:$0xf] }
 0x256   :  { %3554 = vmatpush.bf16.xpose.msrb.mxu3 %v5637_v40  ;;  %v5549_v40 = vor.u32 %v6716_v28, %v5546_v29  ;;  %v6706_v29 = vld [vmem:[%s10428_s1 + $0x8e8] sm:$0xf0]  ;;  %v5493_v48 = vor.u32 %v6702_v23, %v5490_v24 }
 0x257   :  { %v6802_v23 = vld [vmem:[%s10428_s1 + $0xbe8] sm:$0xf0] }
 0x25c   :  { %3513 = vmatpush.bf16.xpose.msrb.mxu0 %v5597_v14  ;;  %v5518_v14 = vld [vmem:[%s10428_s1 + $0x91c] sm:$0xf0] }
 0x25d   :  { %3527 = vmatpush.bf16.xpose.msrb.mxu1 %v5601_v58  ;;  %3541 = vmatpush.bf16.xpose.msrb.mxu2 %v5605_v60  ;;  %v9069_v58 = vpop.f32.mrf.mxu2  ;;  %v5524_v60 = vld [vmem:[%s10428_s1 + $0x908] sm:$0xf]  ;;  %v5521_v4 = vor.u32 %v6709_v57, %v5518_v14  ;;  %v9077_v7 = vpop.f32.mrf.mxu3  ;;  %v5497_v57 = vor.u32 %v6706_v29, %v5496_v27  ;;  %v5697_v14 = vor.u32 %v6752_v31, %v5694_v33  ;;  %v6799_v27 = vld [vmem:[%s10428_s1 + $0xbd4] sm:$0xf]  ;;  %v5874_v29 = vld [vmem:[%s10428_s1 + $0xbec] sm:$0xf0] }
 0x25e   :  { %3555 = vmatpush.bf16.xpose.msrb.mxu3 %v5609_v62  ;;  %v6713_v62 = vld [vmem:[%s10428_s1 + $0x920] sm:$0xf0]  ;;  %10435 = vst [vmem:[#allocation9_spill] sm:$0xff] %v9077_v7  ;;  %v9079_v8 = vpop.f32.mrf.mxu1  ;;  %v5796_v7 = vld [vmem:[%s10428_s1 + $0xb30] sm:$0xf] }
 0x25f   :  { %v5525_v5 = vor.u32 %v6713_v62, %v5524_v60 }
 0x264   :  { %3514 = vmatpush.bf16.xpose.msrb.mxu0 %v5569_v13  ;;  %v5488_v13 = vld [vmem:[%s10428_s1 + $0x8c8] sm:$0xf] }
 0x265   :  { %3528 = vmatpush.bf16.xpose.msrb.mxu1 %v5573_v15  ;;  %3542 = vmatpush.bf16.xpose.msrb.mxu2 %v5577_v16  ;;  %v6705_v15 = vld [vmem:[%s10428_s1 + $0x8e0] sm:$0xf0]  ;;  %v5700_v16 = vld [vmem:[%s10428_s1 + $0xa60] sm:$0xf]  ;;  %v9110_v28 = vpop.f32.mrf.mxu2  ;;  %v9133_v60 = vpop.f32.mrf.mxu3 }
 0x266   :  { %3556 = vmatpush.bf16.xpose.msrb.mxu3 %v5581_v20  ;;  %v6756_v20 = vld [vmem:[%s10428_s1 + $0xa78] sm:$0xf0]  ;;  %v5489_v45 = vor.u32 %v6705_v15, %v5488_v13  ;;  %v5666_v13 = vld [vmem:[%s10428_s1 + $0xa3c] sm:$0xf0]  ;;  %v9150_v15 = vpop.f32.mrf.mxu0 }
 0x267   :  { %10437 = vst [vmem:[#allocation11_spill] sm:$0xff] %v9150_v15 }
 0x26c   :  { %3515 = vmatpush.bf16.xpose.msrb.mxu0 %v5541_v35  ;;  %v5485_v35 = vor.u32 %v6701_v11, %v5482_v12  ;;  %v9142_v11 = vpop.f32.mrf.mxu1  ;;  %v6745_v12 = vld [vmem:[%s10428_s1 + $0xa24] sm:$0xf] }
 0x26d   :  { %3529 = vmatpush.bf16.xpose.msrb.mxu1 %v5545_v39  ;;  %3543 = vmatpush.bf16.xpose.msrb.mxu2 %v5549_v40  ;;  %v5701_v39 = vor.u32 %v6756_v20, %v5700_v16  ;;  %v5900_v40 = vld [vmem:[%s10428_s1 + $0xc08] sm:$0xf]  ;;  %v5872_v20 = vld [vmem:[%s10428_s1 + $0xbd0] sm:$0xf]  ;;  %v9158_v24 = vpop.f32.mrf.mxu2  ;;  %v5669_v31 = vor.u32 %v6745_v12, %v5666_v13 }
 0x26e   :  { %3557 = vmatpush.bf16.xpose.msrb.mxu3 %v5553_v41  ;;  %v6809_v41 = vld [vmem:[%s10428_s1 + $0xc20] sm:$0xf0]  ;;  %v5873_v33 = vor.u32 %v6802_v23, %v5872_v20  ;;  %v5616_v23 = vld [vmem:[%s10428_s1 + $0x9b8] sm:$0xf] }
 0x26f   :  { %v5901_v62 = vor.u32 %v6809_v41, %v5900_v40  ;;  %v9170_v40 = vpop.f32.mrf.mxu3  ;;  %v5644_v41 = vld [vmem:[%s10428_s1 + $0x9f0] sm:$0xf] }
 0x274   :  { %3516 = vmatpush.bf16.xpose.msrb.mxu0 %v5513_v1  ;;  %v2956_v1 = vsel %vm2810_vm0, %v5701_v39, 0  ;;  %v5877_v39 = vor.u32 %v6799_v27, %v5874_v29  ;;  %v6735_v27 = vld [vmem:[%s10428_s1 + $0x9d0] sm:$0xf0] }
 0x275   :  { %3530 = vmatpush.bf16.xpose.msrb.mxu1 %v5517_v2  ;;  %3544 = vmatpush.bf16.xpose.msrb.mxu2 %v5521_v4  ;;  %v5905_v2 = vor.u32 %v6806_v49, %v5902_v56  ;;  %v5672_v4 = vld [vmem:[%s10428_s1 + $0xa28] sm:$0xf]  ;;  %v9185_v56 = vpop.f32.mrf.mxu0  ;;  %v9201_v12 = vpop.f32.mrf.mxu2 }
 0x276   :  { %3558 = vmatpush.bf16.xpose.msrb.mxu3 %v5525_v5  ;;  %v6749_v5 = vld [vmem:[%s10428_s1 + $0xa40] sm:$0xf0]  ;;  %v5638_v49 = vld [vmem:[%s10428_s1 + $0xa04] sm:$0xf0]  ;;  %10438 = vst [vmem:[#allocation12_spill] sm:$0xff] %v9201_v12 }
 0x277   :  { %v5673_v16 = vor.u32 %v6749_v5, %v5672_v4  ;;  %v5846_v4 = vld [vmem:[%s10428_s1 + $0xbb4] sm:$0xf0]  ;;  %v9210_v29 = vpop.f32.mrf.mxu3 }
 0x278   :  { %10439 = vst [vmem:[#allocation13_spill] sm:$0xff] %v9210_v29  ;;  %v6721_v29 = vld [vmem:[%s10428_s1 + $0x960] sm:$0xf0] }
 0x27c   :  { %3517 = vmatpush.bf16.xpose.msrb.mxu0 %v5485_v35  ;;  %v2953_v35 = vsel %vm2810_vm0, %v5673_v16, 0 }
 0x27d   :  { %3531 = vmatpush.bf16.xpose.msrb.mxu1 %v5489_v45  ;;  %3545 = vmatpush.bf16.xpose.msrb.mxu2 %v5493_v48  ;;  %v6742_v45 = vld [vmem:[%s10428_s1 + $0xa08] sm:$0xf0] }
 0x27e   :  { %3559 = vmatpush.bf16.xpose.msrb.mxu3 %v5497_v57  ;;  %v6738_v48 = vld [vmem:[%s10428_s1 + $0x9ec] sm:$0xf]  ;;  %v9187_v57 = vpop.f32.mrf.mxu1 }
 0x27f   :  { %v5641_v5 = vor.u32 %v6738_v48, %v5638_v49  ;;  %v5818_v48 = vld [vmem:[%s10428_s1 + $0xb7c] sm:$0xf0]  ;;  %v9230_v49 = vpop.f32.mrf.mxu0 }
 0x283   :  { %3518 = vmatmul.bf16.vlgmr.msrb.gmra.mxu0 %v7288_v19 }
 0x284   :  { %3566 = vmatpush.bf16.xpose.msra.mxu0 %v5697_v14  ;;  %3546 = vmatmul.bf16.vlgmr.msrb.gmra.mxu2 %v7302_v25  ;;  %v5645_v14 = vor.u32 %v6742_v45, %v5644_v41  ;;  %v6788_v41 = vld [vmem:[%s10428_s1 + $0xb78] sm:$0xf0]  ;;  %v6785_v45 = vld [vmem:[%s10428_s1 + $0xb64] sm:$0xf] }
 0x285   :  { %3580 = vmatpush.bf16.xpose.msra.mxu1 %v2956_v1  ;;  %3594 = vmatpush.bf16.xpose.msra.mxu2 %v5901_v62  ;;  %v5844_v62 = vld [vmem:[%s10428_s1 + $0xb98] sm:$0xf]  ;;  %v6795_v1 = vld [vmem:[%s10428_s1 + $0xbb0] sm:$0xf0] }
 0x286   :  { %3608 = vmatpush.bf16.xpose.msra.mxu3 %v5905_v2  ;;  %3532 = vmatmul.bf16.vlgmr.msrb.gmra.mxu1 %v7265_v9  ;;  %v6792_v2 = vld [vmem:[%s10428_s1 + $0xb9c] sm:$0xf]  ;;  %v5845_v13 = vor.u32 %v6795_v1, %v5844_v62  ;;  %v2950_v16 = vsel %vm2810_vm0, %v5645_v14, 0  ;;  %v9232_v14 = vpop.f32.mrf.mxu1 }
 0x287   :  { %3560 = vmatmul.bf16.vlgmr.msrb.gmra.mxu3 %v7455_v42  ;;  %v5849_v20 = vor.u32 %v6792_v2, %v5846_v4  ;;  %v5821_v4 = vor.u32 %v6785_v45, %v5818_v48  ;;  %v3407_v48 = vpop.f32.mrf.mxu0 }
 0x28c   :  { %3567 = vmatpush.bf16.xpose.msra.mxu0 %v5669_v31  ;;  %v6731_v31 = vld [vmem:[%s10428_s1 + $0x9b4] sm:$0xf] }
 0x28d   :  { %3581 = vmatpush.bf16.xpose.msra.mxu1 %v2953_v35  ;;  %3595 = vmatpush.bf16.xpose.msra.mxu2 %v5873_v33  ;;  %v5610_v33 = vld [vmem:[%s10428_s1 + $0x9cc] sm:$0xf0]  ;;  %v5617_v35 = vor.u32 %v6735_v27, %v5616_v23  ;;  %v5582_v23 = vld [vmem:[%s10428_s1 + $0x994] sm:$0xf0] }
 0x28e   :  { %3609 = vmatpush.bf16.xpose.msra.mxu3 %v5877_v39  ;;  %v5816_v39 = vld [vmem:[%s10428_s1 + $0xb60] sm:$0xf]  ;;  %v5613_v62 = vor.u32 %v6731_v31, %v5610_v33  ;;  %v5788_v31 = vld [vmem:[%s10428_s1 + $0xb28] sm:$0xf]  ;;  %v6781_v33 = vld [vmem:[%s10428_s1 + $0xb40] sm:$0xf0] }
 0x28f   :  { %v5817_v1 = vor.u32 %v6788_v41, %v5816_v39  ;;  %v2947_v2 = vsel %vm2810_vm0, %v5617_v35, 0  ;;  %v9255_v35 = vpop.f32.mrf.mxu3  ;;  %v6778_v39 = vld [vmem:[%s10428_s1 + $0xb2c] sm:$0xf]  ;;  %v5790_v41 = vld [vmem:[%s10428_s1 + $0xb44] sm:$0xf0] }
 0x290   :  { %10440 = vst [vmem:[#allocation14_spill] sm:$0xff] %v9255_v35 }
 0x294   :  { %3568 = vmatpush.bf16.xpose.msra.mxu0 %v5641_v5  ;;  %v9235_v5 = vpop.f32.mrf.mxu2 }
 0x295   :  { %3582 = vmatpush.bf16.xpose.msra.mxu1 %v2950_v16  ;;  %3596 = vmatpush.bf16.xpose.msra.mxu2 %v5845_v13  ;;  %v5588_v13 = vld [vmem:[%s10428_s1 + $0x980] sm:$0xf]  ;;  %v6728_v16 = vld [vmem:[%s10428_s1 + $0x998] sm:$0xf0] }
 0x296   :  { %3610 = vmatpush.bf16.xpose.msra.mxu3 %v5849_v20  ;;  %v6724_v20 = vld [vmem:[%s10428_s1 + $0x97c] sm:$0xf]  ;;  %v5589_v27 = vor.u32 %v6728_v16, %v5588_v13  ;;  %v5793_v13 = vor.u32 %v6778_v39, %v5790_v41  ;;  %v5560_v16 = vld [vmem:[%s10428_s1 + $0x948] sm:$0xf]  ;;  %v5762_v39 = vld [vmem:[%s10428_s1 + $0xb0c] sm:$0xf0] }
 0x297   :  { %v5585_v45 = vor.u32 %v6724_v20, %v5582_v23  ;;  %v6717_v20 = vld [vmem:[%s10428_s1 + $0x944] sm:$0xf]  ;;  %v5554_v23 = vld [vmem:[%s10428_s1 + $0x95c] sm:$0xf0] }
 0x298   :  { %v5557_v41 = vor.u32 %v6717_v20, %v5554_v23  ;;  %v5732_v20 = vld [vmem:[%s10428_s1 + $0xab8] sm:$0xf]  ;;  %v6767_v23 = vld [vmem:[%s10428_s1 + $0xad0] sm:$0xf0] }
 0x29c   :  { %3569 = vmatpush.bf16.xpose.msra.mxu0 %v5613_v62  ;;  %v3421_v62 = vpop.f32.mrf.mxu1  ;;  %v3435_v21 = vpop.f32.mrf.mxu2 }
 0x29d   :  { %3583 = vmatpush.bf16.xpose.msra.mxu1 %v2947_v2  ;;  %3597 = vmatpush.bf16.xpose.msra.mxu2 %v5817_v1  ;;  %v5789_v1 = vor.u32 %v6781_v33, %v5788_v31  ;;  %v3422_v2 = vadd.f32 %v3421_v62, %v3407_v48  ;;  %v5760_v31 = vld [vmem:[%s10428_s1 + $0xaf0] sm:$0xf]  ;;  %v6771_v33 = vld [vmem:[%s10428_s1 + $0xaf4] sm:$0xf] }
 0x29e   :  { %3611 = vmatpush.bf16.xpose.msra.mxu3 %v5821_v4  ;;  %v2944_v4 = vsel %vm2810_vm0, %v5589_v27, 0  ;;  %v5561_v27 = vor.u32 %v6721_v29, %v5560_v16 }
 0x29f   :  { %v3436_v3 = vadd.f32 %v3435_v21, %v3422_v2  ;;  %v6774_v21 = vld [vmem:[%s10428_s1 + $0xb08] sm:$0xf0]  ;;  %v5532_v2 = vld [vmem:[%s10428_s1 + $0x910] sm:$0xf] }
 0x2a0   :  { %v5761_v48 = vor.u32 %v6774_v21, %v5760_v31  ;;  %v2941_v62 = vsel %vm2810_vm0, %v5561_v27, 0  ;;  %v6764_v27 = vld [vmem:[%s10428_s1 + $0xabc] sm:$0xf]  ;;  %v5734_v31 = vld [vmem:[%s10428_s1 + $0xad4] sm:$0xf0] }
 0x2a4   :  { %3570 = vmatpush.bf16.xpose.msra.mxu0 %v5585_v45  ;;  %v3449_v45 = vpop.f32.mrf.mxu3 }
 0x2a5   :  { %3584 = vmatpush.bf16.xpose.msra.mxu1 %v2944_v4  ;;  %3598 = vmatpush.bf16.xpose.msra.mxu2 %v5789_v1  ;;  %v9288_v29 = vadd.f32 %v3449_v45, %v3436_v3  ;;  %v5765_v1 = vor.u32 %v6771_v33, %v5762_v39  ;;  %v6714_v4 = vld [vmem:[%s10428_s1 + $0x928] sm:$0xf0]  ;;  %v5526_v3 = vld [vmem:[%s10428_s1 + $0x924] sm:$0xf0]  ;;  %v5733_v33 = vor.u32 %v6767_v23, %v5732_v20  ;;  %v5504_v45 = vld [vmem:[%s10428_s1 + $0x8d8] sm:$0xf] }
 0x2a6   :  { %3612 = vmatpush.bf16.xpose.msra.mxu3 %v5793_v13  ;;  %v6710_v13 = vld [vmem:[%s10428_s1 + $0x90c] sm:$0xf]  ;;  %v5533_v16 = vor.u32 %v6714_v4, %v5532_v2  ;;  %v5704_v2 = vld [vmem:[%s10428_s1 + $0xa80] sm:$0xf]  ;;  %v5908_v20 = vld [vmem:[%s10428_s1 + $0xc10] sm:$0xf] }
 0x2a7   :  { %v5529_v21 = vor.u32 %v6710_v13, %v5526_v3  ;;  %v6760_v13 = vld [vmem:[%s10428_s1 + $0xa98] sm:$0xf0]  ;;  %v6757_v3 = vld [vmem:[%s10428_s1 + $0xa84] sm:$0xf]  ;;  %v6810_v23 = vld [vmem:[%s10428_s1 + $0xc28] sm:$0xf0] }
 0x2a8   :  { %v2938_v39 = vsel %vm2810_vm0, %v5533_v16, 0  ;;  %v5706_v16 = vld [vmem:[%s10428_s1 + $0xa9c] sm:$0xf0]  ;;  %v5909_v35 = vor.u32 %v6810_v23, %v5908_v20  ;;  %v3409_v20 = vpop.f32.mrf.mxu0 }
 0x2ac   :  { %3571 = vmatpush.bf16.xpose.msra.mxu0 %v5557_v41  ;;  %v5737_v41 = vor.u32 %v6764_v27, %v5734_v31  ;;  %v6807_v27 = vld [vmem:[%s10428_s1 + $0xc14] sm:$0xf] }
 0x2ad   :  { %3585 = vmatpush.bf16.xpose.msra.mxu1 %v2941_v62  ;;  %3599 = vmatpush.bf16.xpose.msra.mxu2 %v5761_v48  ;;  %v6707_v48 = vld [vmem:[%s10428_s1 + $0x8f0] sm:$0xf0] }
 0x2ae   :  { %3613 = vmatpush.bf16.xpose.msra.mxu3 %v5765_v1  ;;  %v6703_v62 = vld [vmem:[%s10428_s1 + $0x8d4] sm:$0xf]  ;;  %v5498_v1 = vld [vmem:[%s10428_s1 + $0x8ec] sm:$0xf0]  ;;  %v5505_v4 = vor.u32 %v6707_v48, %v5504_v45  ;;  %v6808_v45 = vld [vmem:[%s10428_s1 + $0xc1c] sm:$0xf] }
 0x2af   :  { %v5501_v31 = vor.u32 %v6703_v62, %v5498_v1  ;;  %v5918_v48 = vld [vmem:[%s10428_s1 + $0xc34] sm:$0xf0]  ;;  %v5709_v1 = vor.u32 %v6757_v3, %v5706_v16 }
 0x2b0   :  { %v2935_v62 = vsel %vm2810_vm0, %v5505_v4, 0  ;;  %v5921_v17 = vor.u32 %v6808_v45, %v5918_v48  ;;  %v6803_v4 = vld [vmem:[%s10428_s1 + $0xbf0] sm:$0xf0]  ;;  %v5882_v3 = vld [vmem:[%s10428_s1 + $0xbf4] sm:$0xf0] }
 0x2b1   :  { %v5854_v45 = vld [vmem:[%s10428_s1 + $0xbbc] sm:$0xf0]  ;;  %v5860_v48 = vld [vmem:[%s10428_s1 + $0xba8] sm:$0xf] }
 0x2b4   :  { %3572 = vmatpush.bf16.xpose.msra.mxu0 %v5529_v21  ;;  %v5910_v21 = vld [vmem:[%s10428_s1 + $0xc2c] sm:$0xf0] }
 0x2b5   :  { %3586 = vmatpush.bf16.xpose.msra.mxu1 %v2938_v39  ;;  %3600 = vmatpush.bf16.xpose.msra.mxu2 %v5733_v33  ;;  %v5916_v33 = vld [vmem:[%s10428_s1 + $0xc18] sm:$0xf]  ;;  %v6811_v39 = vld [vmem:[%s10428_s1 + $0xc30] sm:$0xf0]  ;;  %v5913_v15 = vor.u32 %v6807_v27, %v5910_v21 }
 0x2b6   :  { %3614 = vmatpush.bf16.xpose.msra.mxu3 %v5737_v41  ;;  %v5705_v41 = vor.u32 %v6760_v13, %v5704_v2  ;;  %v5917_v12 = vor.u32 %v6811_v39, %v5916_v33  ;;  %v5880_v2 = vld [vmem:[%s10428_s1 + $0xbd8] sm:$0xf]  ;;  %v6800_v13 = vld [vmem:[%s10428_s1 + $0xbdc] sm:$0xf]  ;;  %v5852_v33 = vld [vmem:[%s10428_s1 + $0xba0] sm:$0xf] }
 0x2b7   :  { %v5881_v16 = vor.u32 %v6803_v4, %v5880_v2  ;;  %v5885_v23 = vor.u32 %v6800_v13, %v5882_v3  ;;  %v6796_v39 = vld [vmem:[%s10428_s1 + $0xbb8] sm:$0xf0]  ;;  %v6794_v2 = vld [vmem:[%s10428_s1 + $0xbac] sm:$0xf]  ;;  %v5862_v4 = vld [vmem:[%s10428_s1 + $0xbc4] sm:$0xf0] }
 0x2b8   :  { %v5853_v13 = vor.u32 %v6796_v39, %v5852_v33  ;;  %v5832_v33 = vld [vmem:[%s10428_s1 + $0xb70] sm:$0xf]  ;;  %v6790_v39 = vld [vmem:[%s10428_s1 + $0xb88] sm:$0xf0] }
 0x2bc   :  { %3573 = vmatpush.bf16.xpose.msra.mxu0 %v5501_v31  ;;  %v3423_v31 = vpop.f32.mrf.mxu1 }
 0x2bd   :  { %3587 = vmatpush.bf16.xpose.msra.mxu1 %v2935_v62  ;;  %3601 = vmatpush.bf16.xpose.msra.mxu2 %v5705_v41  ;;  %v6793_v41 = vld [vmem:[%s10428_s1 + $0xba4] sm:$0xf] }
 0x2be   :  { %3615 = vmatpush.bf16.xpose.msra.mxu3 %v5709_v1  ;;  %v6797_v62 = vld [vmem:[%s10428_s1 + $0xbc0] sm:$0xf0]  ;;  %v3437_v1 = vpop.f32.mrf.mxu2  ;;  %v5857_v3 = vor.u32 %v6793_v41, %v5854_v45  ;;  %v3451_v41 = vpop.f32.mrf.mxu3  ;;  %v6787_v45 = vld [vmem:[%s10428_s1 + $0xb74] sm:$0xf] }
 0x2c3   :  { %3574 = vmatmul.bf16.vlgmr.msra.gmra.mxu0 %v7468_v47 }
 0x2c4   :  { %3622 = vmatpush.bf16.xpose.msrb.mxu0 %v5909_v35  ;;  %v6801_v35 = vld [vmem:[%s10428_s1 + $0xbe4] sm:$0xf]  ;;  %6155 = vmatmul.msk.bf16.vlgmr.msra.gmra.mxu1 %vm2810_vm0, %v7466_v46 }
 0x2c5   :  { %3636 = vmatpush.bf16.xpose.msrb.mxu1 %v5913_v15  ;;  %3650 = vmatpush.bf16.xpose.msrb.mxu2 %v5917_v12  ;;  %v5888_v15 = vld [vmem:[%s10428_s1 + $0xbe0] sm:$0xf]  ;;  %v6804_v12 = vld [vmem:[%s10428_s1 + $0xbf8] sm:$0xf0] }
 0x2c6   :  { %3664 = vmatpush.bf16.xpose.msrb.mxu3 %v5921_v17  ;;  %v5890_v17 = vld [vmem:[%s10428_s1 + $0xbfc] sm:$0xf0]  ;;  %v5889_v27 = vor.u32 %v6804_v12, %v5888_v15  ;;  %3602 = vmatmul.bf16.vlgmr.msra.gmra.mxu2 %v7260_v6  ;;  %v5861_v15 = vor.u32 %v6797_v62, %v5860_v48  ;;  %v3424_v12 = vadd.f32 %v3423_v31, %v3409_v20  ;;  %v6786_v20 = vld [vmem:[%s10428_s1 + $0xb6c] sm:$0xf]  ;;  %v5834_v48 = vld [vmem:[%s10428_s1 + $0xb8c] sm:$0xf0] }
 0x2c7   :  { %v5893_v21 = vor.u32 %v6801_v35, %v5890_v17  ;;  %3616 = vmatmul.bf16.vlgmr.msra.gmra.mxu3 %v7288_v19  ;;  %v5865_v35 = vor.u32 %v6794_v2, %v5862_v4  ;;  %v3463_v17 = vpop.f32.mrf.mxu0  ;;  %v5833_v4 = vor.u32 %v6790_v39, %v5832_v33 }
 0x2c8   :  { %v3438_v31 = vadd.f32 %v3437_v1, %v3424_v12  ;;  %v3491_v1 = vpop.f32.mrf.mxu2 }
 0x2cc   :  { %3623 = vmatpush.bf16.xpose.msrb.mxu0 %v5881_v16  ;;  %v3464_v16 = vadd.f32 %v3463_v17, %v9288_v29  ;;  %v5826_v29 = vld [vmem:[%s10428_s1 + $0xb84] sm:$0xf0] }
 0x2cd   :  { %3637 = vmatpush.bf16.xpose.msrb.mxu1 %v5885_v23  ;;  %3651 = vmatpush.bf16.xpose.msrb.mxu2 %v5889_v27  ;;  %v3477_v23 = vpop.f32.mrf.mxu1  ;;  %v5824_v27 = vld [vmem:[%s10428_s1 + $0xb68] sm:$0xf]  ;;  %v5829_v2 = vor.u32 %v6786_v20, %v5826_v29  ;;  %v6783_v20 = vld [vmem:[%s10428_s1 + $0xb50] sm:$0xf0]  ;;  %v5806_v29 = vld [vmem:[%s10428_s1 + $0xb54] sm:$0xf0] }
 0x2ce   :  { %3665 = vmatpush.bf16.xpose.msrb.mxu3 %v5893_v21  ;;  %v6789_v21 = vld [vmem:[%s10428_s1 + $0xb80] sm:$0xf0]  ;;  %v3478_v12 = vadd.f32 %v3477_v23, %v3464_v16  ;;  %v5798_v16 = vld [vmem:[%s10428_s1 + $0xb4c] sm:$0xf0]  ;;  %v5804_v23 = vld [vmem:[%s10428_s1 + $0xb38] sm:$0xf] }
 0x2cf   :  { %v5825_v62 = vor.u32 %v6789_v21, %v5824_v27  ;;  %v6782_v27 = vld [vmem:[%s10428_s1 + $0xb48] sm:$0xf0]  ;;  %v6779_v21 = vld [vmem:[%s10428_s1 + $0xb34] sm:$0xf] }
 0x2d0   :  { %v3492_v33 = vadd.f32 %v3491_v1, %v3478_v12  ;;  %v6775_v1 = vld [vmem:[%s10428_s1 + $0xb10] sm:$0xf0] }
 0x2d4   :  { %3624 = vmatpush.bf16.xpose.msrb.mxu0 %v5853_v13  ;;  %v3452_v13 = vadd.f32 %v3451_v41, %v3438_v31  ;;  %v6780_v31 = vld [vmem:[%s10428_s1 + $0xb3c] sm:$0xf]  ;;  %v5797_v41 = vor.u32 %v6782_v27, %v5796_v7 }
 0x2d5   :  { %3638 = vmatpush.bf16.xpose.msrb.mxu1 %v5857_v3  ;;  %3652 = vmatpush.bf16.xpose.msrb.mxu2 %v5861_v15  ;;  %v5837_v3 = vor.u32 %v6787_v45, %v5834_v48  ;;  %v3465_v15 = vpop.f32.mrf.mxu0  ;;  %v3479_v17 = vpop.f32.mrf.mxu1  ;;  %v5801_v48 = vor.u32 %v6779_v21, %v5798_v16  ;;  %v6772_v7 = vld [vmem:[%s10428_s1 + $0xafc] sm:$0xf]  ;;  %v6773_v21 = vld [vmem:[%s10428_s1 + $0xb04] sm:$0xf]  ;;  %v5778_v16 = vld [vmem:[%s10428_s1 + $0xb1c] sm:$0xf0] }
 0x2d6   :  { %3666 = vmatpush.bf16.xpose.msrb.mxu3 %v5865_v35  ;;  %v3466_v35 = vadd.f32 %v3465_v15, %v3452_v13  ;;  %v3493_v45 = vpop.f32.mrf.mxu2  ;;  %v3794_v13 = vmax.f32 %v3492_v33, 0.0  ;;  %v5768_v15 = vld [vmem:[%s10428_s1 + $0xaf8] sm:$0xf]  ;;  %v6776_v27 = vld [vmem:[%s10428_s1 + $0xb18] sm:$0xf0] }
 0x2d7   :  { %v5740_v33 = vld [vmem:[%s10428_s1 + $0xac0] sm:$0xf] }
 0x2d8   :  { %v3480_v39 = vadd.f32 %v3479_v17, %v3466_v35  ;;  %v5770_v35 = vld [vmem:[%s10428_s1 + $0xb14] sm:$0xf0]  ;;  %v5776_v17 = vld [vmem:[%s10428_s1 + $0xb00] sm:$0xf] }
 0x2dc   :  { %3625 = vmatpush.bf16.xpose.msrb.mxu0 %v5825_v62  ;;  %v5805_v62 = vor.u32 %v6783_v20, %v5804_v23  ;;  %v5769_v23 = vor.u32 %v6775_v1, %v5768_v15  ;;  %v5773_v20 = vor.u32 %v6772_v7, %v5770_v35  ;;  %v5924_v7 = vld [vmem:[%s10428_s1 + $0xc20] sm:$0xf]  ;;  %v6812_v35 = vld [vmem:[%s10428_s1 + $0xc38] sm:$0xf0] }
 0x2dd   :  { %3639 = vmatpush.bf16.xpose.msrb.mxu1 %v5829_v2  ;;  %3653 = vmatpush.bf16.xpose.msrb.mxu2 %v5833_v4  ;;  %v3494_v2 = vadd.f32 %v3493_v45, %v3480_v39  ;;  %v5809_v4 = vor.u32 %v6780_v31, %v5806_v29  ;;  %v5777_v31 = vor.u32 %v6776_v27, %v5776_v17  ;;  %v6768_v39 = vld [vmem:[%s10428_s1 + $0xad8] sm:$0xf0]  ;;  %v5742_v45 = vld [vmem:[%s10428_s1 + $0xadc] sm:$0xf0]  ;;  %v5712_v17 = vld [vmem:[%s10428_s1 + $0xa88] sm:$0xf] }
 0x2de   :  { %3667 = vmatpush.bf16.xpose.msrb.mxu3 %v5837_v3  ;;  %v5781_v29 = vor.u32 %v6773_v21, %v5778_v16  ;;  %v6761_v27 = vld [vmem:[%s10428_s1 + $0xaa0] sm:$0xf0]  ;;  %v6758_v21 = vld [vmem:[%s10428_s1 + $0xa8c] sm:$0xf]  ;;  %v5714_v16 = vld [vmem:[%s10428_s1 + $0xaa4] sm:$0xf0] }
 0x2df   :  { %v3802_v3 = vmax.f32 %v3494_v2, 0.0  ;;  %v6766_v2 = vld [vmem:[%s10428_s1 + $0xacc] sm:$0xf] }
 0x2e1   :  { %v9476_v12 = vpack.c.bf16 %v3802_v3, %v3794_v13  ;;  %v5741_v13 = vor.u32 %v6768_v39, %v5740_v33  ;;  %v5925_v33 = vor.u32 %v6812_v35, %v5924_v7  ;;  %v6124_v39 = vld [vmem:[%s10428_s1 + $0xdc8] sm:$0xf] }
 0x2e3   :  { %10441 = vst [vmem:[#allocation15_spill] sm:$0xff] %v9476_v12 }
 0x2e4   :  { %3626 = vmatpush.bf16.xpose.msrb.mxu0 %v5797_v41  ;;  %v6765_v41 = vld [vmem:[%s10428_s1 + $0xac4] sm:$0xf] }
 0x2e5   :  { %3640 = vmatpush.bf16.xpose.msrb.mxu1 %v5801_v48  ;;  %3654 = vmatpush.bf16.xpose.msrb.mxu2 %v5805_v62  ;;  %v5748_v48 = vld [vmem:[%s10428_s1 + $0xac8] sm:$0xf]  ;;  %v6769_v62 = vld [vmem:[%s10428_s1 + $0xae0] sm:$0xf0]  ;;  %v5745_v3 = vor.u32 %v6765_v41, %v5742_v45  ;;  %v5713_v41 = vor.u32 %v6761_v27, %v5712_v17 }
 0x2e6   :  { %3668 = vmatpush.bf16.xpose.msrb.mxu3 %v5809_v4  ;;  %v5750_v4 = vld [vmem:[%s10428_s1 + $0xae4] sm:$0xf0]  ;;  %v5749_v15 = vor.u32 %v6769_v62, %v5748_v48  ;;  %v6865_v45 = vld [vmem:[%s10428_s1 + $0xde0] sm:$0xf0]  ;;  %v6862_v48 = vld [vmem:[%s10428_s1 + $0xdcc] sm:$0xf] }
 0x2e7   :  { %v5753_v1 = vor.u32 %v6766_v2, %v5750_v4  ;;  %v6126_v62 = vld [vmem:[%s10428_s1 + $0xde4] sm:$0xf0]  ;;  %v5717_v2 = vor.u32 %v6758_v21, %v5714_v16  ;;  %v6125_v7 = vor.u32 %v6865_v45, %v6124_v39  ;;  %v6805_v21 = vld [vmem:[%s10428_s1 + $0xc00] sm:$0xf0]  ;;  %v6859_v39 = vld [vmem:[%s10428_s1 + $0xdb0] sm:$0xf0] }
 0x2e8   :  { %v6129_v35 = vor.u32 %v6862_v48, %v6126_v62  ;;  %v5896_v27 = vld [vmem:[%s10428_s1 + $0xbe8] sm:$0xf] }
 0x2e9   :  { %v5897_v16 = vor.u32 %v6805_v21, %v5896_v27 }
 0x2ec   :  { %3627 = vmatpush.bf16.xpose.msrb.mxu0 %v5769_v23  ;;  %v5720_v23 = vld [vmem:[%s10428_s1 + $0xa90] sm:$0xf] }
 0x2ed   :  { %3641 = vmatpush.bf16.xpose.msrb.mxu1 %v5773_v20  ;;  %3655 = vmatpush.bf16.xpose.msrb.mxu2 %v5777_v31  ;;  %v6762_v20 = vld [vmem:[%s10428_s1 + $0xaa8] sm:$0xf0]  ;;  %v6759_v31 = vld [vmem:[%s10428_s1 + $0xa94] sm:$0xf] }
 0x2ee   :  { %3669 = vmatpush.bf16.xpose.msrb.mxu3 %v5781_v29  ;;  %v5722_v29 = vld [vmem:[%s10428_s1 + $0xaac] sm:$0xf0]  ;;  %v5721_v4 = vor.u32 %v6762_v20, %v5720_v23  ;;  %v6858_v20 = vld [vmem:[%s10428_s1 + $0xda8] sm:$0xf0] }
 0x2ef   :  { %v6096_v23 = vld [vmem:[%s10428_s1 + $0xd90] sm:$0xf] }
 0x2f0   :  { %v6097_v45 = vor.u32 %v6858_v20, %v6096_v23  ;;  %v5840_v20 = vld [vmem:[%s10428_s1 + $0xb78] sm:$0xf] }
 0x2f4   :  { %3628 = vmatpush.bf16.xpose.msrb.mxu0 %v5741_v13  ;;  %v6132_v13 = vld [vmem:[%s10428_s1 + $0xdd0] sm:$0xf] }
 0x2f5   :  { %3642 = vmatpush.bf16.xpose.msrb.mxu1 %v5745_v3  ;;  %3656 = vmatpush.bf16.xpose.msrb.mxu2 %v5749_v15  ;;  %v6866_v3 = vld [vmem:[%s10428_s1 + $0xde8] sm:$0xf0]  ;;  %v5725_v15 = vor.u32 %v6759_v31, %v5722_v29  ;;  %v6855_v31 = vld [vmem:[%s10428_s1 + $0xd94] sm:$0xf]  ;;  %v6098_v29 = vld [vmem:[%s10428_s1 + $0xdac] sm:$0xf0] }
 0x2f6   :  { %3670 = vmatpush.bf16.xpose.msrb.mxu3 %v5753_v1  ;;  %v2980_v1 = vsel %vm2810_vm0, %v5925_v33, 0  ;;  %v6133_v17 = vor.u32 %v6866_v3, %v6132_v13  ;;  %v6104_v33 = vld [vmem:[%s10428_s1 + $0xd98] sm:$0xf]  ;;  %v6101_v48 = vor.u32 %v6855_v31, %v6098_v29  ;;  %v6791_v31 = vld [vmem:[%s10428_s1 + $0xb90] sm:$0xf0] }
 0x2f7   :  { %v6105_v62 = vor.u32 %v6859_v39, %v6104_v33  ;;  %v6068_v3 = vld [vmem:[%s10428_s1 + $0xd58] sm:$0xf]  ;;  %v5841_v29 = vor.u32 %v6791_v31, %v5840_v20  ;;  %v6040_v33 = vld [vmem:[%s10428_s1 + $0xd20] sm:$0xf]  ;;  %v6844_v39 = vld [vmem:[%s10428_s1 + $0xd38] sm:$0xf0] }
 0x2fc   :  { %3629 = vmatpush.bf16.xpose.msrb.mxu0 %v5713_v41  ;;  %v2977_v41 = vsel %vm2810_vm0, %v5897_v16, 0 }
 0x2fd   :  { %3643 = vmatpush.bf16.xpose.msrb.mxu1 %v5717_v2  ;;  %3657 = vmatpush.bf16.xpose.msrb.mxu2 %v5721_v4  ;;  %v5868_v2 = vld [vmem:[%s10428_s1 + $0xbb0] sm:$0xf]  ;;  %v6798_v4 = vld [vmem:[%s10428_s1 + $0xbc8] sm:$0xf0] }
 0x2fe   :  { %3671 = vmatpush.bf16.xpose.msrb.mxu3 %v5725_v15  ;;  %v5869_v13 = vor.u32 %v6798_v4, %v5868_v2  ;;  %v6851_v15 = vld [vmem:[%s10428_s1 + $0xd70] sm:$0xf0]  ;;  %v2971_v2 = vsel %vm2810_vm0, %v5841_v29, 0  ;;  %v6041_v4 = vor.u32 %v6844_v39, %v6040_v33  ;;  %v5784_v39 = vld [vmem:[%s10428_s1 + $0xb08] sm:$0xf] }
 0x2ff   :  { %v6069_v21 = vor.u32 %v6851_v15, %v6068_v3  ;;  %v5812_v15 = vld [vmem:[%s10428_s1 + $0xb40] sm:$0xf] }
 0x300   :  { %v2974_v27 = vsel %vm2810_vm0, %v5869_v13, 0 }
 0x303   :  { %3630 = vmatmul.bf16.vlgmr.msrb.gmra.mxu0 %v7265_v9 }
 0x304   :  { %3678 = vmatpush.bf16.xpose.msra.mxu0 %v2980_v1  ;;  %3658 = vmatmul.bf16.vlgmr.msrb.gmra.mxu2 %v7455_v42  ;;  %v6848_v1 = vld [vmem:[%s10428_s1 + $0xd5c] sm:$0xf] }
 0x305   :  { %3692 = vmatpush.bf16.xpose.msra.mxu1 %v6125_v7  ;;  %3706 = vmatpush.bf16.xpose.msra.mxu2 %v6129_v35  ;;  %v6070_v7 = vld [vmem:[%s10428_s1 + $0xd74] sm:$0xf0]  ;;  %v6076_v35 = vld [vmem:[%s10428_s1 + $0xd60] sm:$0xf] }
 0x306   :  { %3720 = vmatpush.bf16.xpose.msra.mxu3 %v6133_v17  ;;  %3644 = vmatmul.bf16.vlgmr.msrb.gmra.mxu1 %v7302_v25  ;;  %v6852_v17 = vld [vmem:[%s10428_s1 + $0xd78] sm:$0xf0]  ;;  %v6073_v16 = vor.u32 %v6848_v1, %v6070_v7 }
 0x307   :  { %3672 = vmatmul.bf16.vlgmr.msrb.gmra.mxu3 %v7468_v47  ;;  %v6077_v23 = vor.u32 %v6852_v17, %v6076_v35  ;;  %v6784_v1 = vld [vmem:[%s10428_s1 + $0xb58] sm:$0xf0]  ;;  %v6012_v35 = vld [vmem:[%s10428_s1 + $0xce8] sm:$0xf]  ;;  %v6837_v17 = vld [vmem:[%s10428_s1 + $0xd00] sm:$0xf0] }
 0x308   :  { %v5813_v7 = vor.u32 %v6784_v1, %v5812_v15  ;;  %v6013_v31 = vor.u32 %v6837_v17, %v6012_v35  ;;  %v5756_v17 = vld [vmem:[%s10428_s1 + $0xad0] sm:$0xf] }
 0x30a   :  { %v2968_v20 = vsel %vm2810_vm0, %v5813_v7, 0 }
 0x30c   :  { %3679 = vmatpush.bf16.xpose.msra.mxu0 %v2977_v41  ;;  %v6841_v41 = vld [vmem:[%s10428_s1 + $0xd24] sm:$0xf] }
 0x30d   :  { %3693 = vmatpush.bf16.xpose.msra.mxu1 %v6097_v45  ;;  %3707 = vmatpush.bf16.xpose.msra.mxu2 %v6101_v48  ;;  %v6042_v45 = vld [vmem:[%s10428_s1 + $0xd3c] sm:$0xf0]  ;;  %v6048_v48 = vld [vmem:[%s10428_s1 + $0xd28] sm:$0xf] }
 0x30e   :  { %3721 = vmatpush.bf16.xpose.msra.mxu3 %v6105_v62  ;;  %v6845_v62 = vld [vmem:[%s10428_s1 + $0xd40] sm:$0xf0]  ;;  %v6045_v13 = vor.u32 %v6841_v41, %v6042_v45 }
 0x30f   :  { %v6049_v3 = vor.u32 %v6845_v62, %v6048_v48  ;;  %v6777_v41 = vld [vmem:[%s10428_s1 + $0xb20] sm:$0xf0]  ;;  %v5984_v48 = vld [vmem:[%s10428_s1 + $0xcb0] sm:$0xf]  ;;  %v6830_v62 = vld [vmem:[%s10428_s1 + $0xcc8] sm:$0xf0] }
 0x310   :  { %v5785_v45 = vor.u32 %v6777_v41, %v5784_v39  ;;  %v5985_v1 = vor.u32 %v6830_v62, %v5984_v48  ;;  %v5728_v62 = vld [vmem:[%s10428_s1 + $0xa98] sm:$0xf] }
 0x312   :  { %v2965_v15 = vsel %vm2810_vm0, %v5785_v45, 0 }
 0x314   :  { %3680 = vmatpush.bf16.xpose.msra.mxu0 %v2974_v27  ;;  %v6834_v27 = vld [vmem:[%s10428_s1 + $0xcec] sm:$0xf] }
 0x315   :  { %3694 = vmatpush.bf16.xpose.msra.mxu1 %v6069_v21  ;;  %3708 = vmatpush.bf16.xpose.msra.mxu2 %v6073_v16  ;;  %v6014_v21 = vld [vmem:[%s10428_s1 + $0xd04] sm:$0xf0]  ;;  %v6020_v16 = vld [vmem:[%s10428_s1 + $0xcf0] sm:$0xf] }
 0x316   :  { %3722 = vmatpush.bf16.xpose.msra.mxu3 %v6077_v23  ;;  %v6838_v23 = vld [vmem:[%s10428_s1 + $0xd08] sm:$0xf0]  ;;  %v6017_v29 = vor.u32 %v6834_v27, %v6014_v21 }
 0x317   :  { %v6021_v33 = vor.u32 %v6838_v23, %v6020_v16  ;;  %v6770_v27 = vld [vmem:[%s10428_s1 + $0xae8] sm:$0xf0]  ;;  %v5956_v16 = vld [vmem:[%s10428_s1 + $0xc78] sm:$0xf]  ;;  %v6823_v23 = vld [vmem:[%s10428_s1 + $0xc90] sm:$0xf0] }
 0x318   :  { %v5757_v21 = vor.u32 %v6770_v27, %v5756_v17  ;;  %v5957_v41 = vor.u32 %v6823_v23, %v5956_v16  ;;  %v6148_v17 = vld [vmem:[%s10428_s1 + $0xde0] sm:$0xf]  ;;  %v6868_v27 = vld [vmem:[%s10428_s1 + $0xdf8] sm:$0xf0]  ;;  %v6134_v16 = vld [vmem:[%s10428_s1 + $0xdec] sm:$0xf0] }
 0x319   :  { %v6140_v23 = vld [vmem:[%s10428_s1 + $0xdd8] sm:$0xf] }
 0x31a   :  { %v2962_v39 = vsel %vm2810_vm0, %v5757_v21, 0  ;;  %v6863_v21 = vld [vmem:[%s10428_s1 + $0xdd4] sm:$0xf] }
 0x31c   :  { %3681 = vmatpush.bf16.xpose.msra.mxu0 %v2971_v2  ;;  %v6827_v2 = vld [vmem:[%s10428_s1 + $0xcb4] sm:$0xf] }
 0x31d   :  { %3695 = vmatpush.bf16.xpose.msra.mxu1 %v6041_v4  ;;  %3709 = vmatpush.bf16.xpose.msra.mxu2 %v6045_v13  ;;  %v5986_v4 = vld [vmem:[%s10428_s1 + $0xccc] sm:$0xf0]  ;;  %v5992_v13 = vld [vmem:[%s10428_s1 + $0xcb8] sm:$0xf] }
 0x31e   :  { %3723 = vmatpush.bf16.xpose.msra.mxu3 %v6049_v3  ;;  %v6831_v3 = vld [vmem:[%s10428_s1 + $0xcd0] sm:$0xf0]  ;;  %v5989_v7 = vor.u32 %v6827_v2, %v5986_v4  ;;  %v5928_v4 = vld [vmem:[%s10428_s1 + $0xc40] sm:$0xf] }
 0x31f   :  { %v5993_v35 = vor.u32 %v6831_v3, %v5992_v13  ;;  %v6763_v2 = vld [vmem:[%s10428_s1 + $0xab0] sm:$0xf0]  ;;  %v6816_v13 = vld [vmem:[%s10428_s1 + $0xc58] sm:$0xf0] }
 0x320   :  { %v5729_v3 = vor.u32 %v6763_v2, %v5728_v62  ;;  %v6137_v62 = vor.u32 %v6863_v21, %v6134_v16  ;;  %v6092_v16 = vld [vmem:[%s10428_s1 + $0xd70] sm:$0xf] }
 0x324   :  { %3682 = vmatpush.bf16.xpose.msra.mxu0 %v2968_v20  ;;  %v6820_v20 = vld [vmem:[%s10428_s1 + $0xc7c] sm:$0xf] }
 0x325   :  { %3696 = vmatpush.bf16.xpose.msra.mxu1 %v6013_v31  ;;  %3710 = vmatpush.bf16.xpose.msra.mxu2 %v6017_v29  ;;  %v5958_v31 = vld [vmem:[%s10428_s1 + $0xc94] sm:$0xf0]  ;;  %v5964_v29 = vld [vmem:[%s10428_s1 + $0xc80] sm:$0xf] }
 0x326   :  { %3724 = vmatpush.bf16.xpose.msra.mxu3 %v6021_v33  ;;  %v6824_v33 = vld [vmem:[%s10428_s1 + $0xc98] sm:$0xf0]  ;;  %v5961_v45 = vor.u32 %v6820_v20, %v5958_v31  ;;  %v6867_v20 = vld [vmem:[%s10428_s1 + $0xdf0] sm:$0xf0] }
 0x327   :  { %v5965_v48 = vor.u32 %v6824_v33, %v5964_v29  ;;  %v6864_v31 = vld [vmem:[%s10428_s1 + $0xddc] sm:$0xf]  ;;  %v6142_v29 = vld [vmem:[%s10428_s1 + $0xdf4] sm:$0xf0]  ;;  %v2959_v33 = vsel %vm2810_vm0, %v5729_v3, 0  ;;  %v6141_v2 = vor.u32 %v6867_v20, %v6140_v23 }
 0x328   :  { %v6145_v12 = vor.u32 %v6864_v31, %v6142_v29  ;;  %v6106_v3 = vld [vmem:[%s10428_s1 + $0xdb4] sm:$0xf0]  ;;  %v6853_v23 = vld [vmem:[%s10428_s1 + $0xd80] sm:$0xf0]  ;;  %v6850_v20 = vld [vmem:[%s10428_s1 + $0xd6c] sm:$0xf] }
 0x329   :  { %v6086_v31 = vld [vmem:[%s10428_s1 + $0xd84] sm:$0xf0] }
 0x32c   :  { %3683 = vmatpush.bf16.xpose.msra.mxu0 %v2965_v15  ;;  %v6813_v15 = vld [vmem:[%s10428_s1 + $0xc44] sm:$0xf] }
 0x32d   :  { %3697 = vmatpush.bf16.xpose.msra.mxu1 %v5985_v1  ;;  %3711 = vmatpush.bf16.xpose.msra.mxu2 %v5989_v7  ;;  %v5930_v1 = vld [vmem:[%s10428_s1 + $0xc5c] sm:$0xf0]  ;;  %v5936_v7 = vld [vmem:[%s10428_s1 + $0xc48] sm:$0xf] }
 0x32e   :  { %3725 = vmatpush.bf16.xpose.msra.mxu3 %v5993_v35  ;;  %v6817_v35 = vld [vmem:[%s10428_s1 + $0xc60] sm:$0xf0] }
 0x334   :  { %3684 = vmatpush.bf16.xpose.msra.mxu0 %v2962_v39  ;;  %v5929_v39 = vor.u32 %v6816_v13, %v5928_v4  ;;  %v6861_v4 = vld [vmem:[%s10428_s1 + $0xdc0] sm:$0xf0]  ;;  %v6856_v13 = vld [vmem:[%s10428_s1 + $0xd9c] sm:$0xf] }
 0x335   :  { %3698 = vmatpush.bf16.xpose.msra.mxu1 %v5957_v41  ;;  %3712 = vmatpush.bf16.xpose.msra.mxu2 %v5961_v45  ;;  %v5933_v41 = vor.u32 %v6813_v15, %v5930_v1  ;;  %v6149_v45 = vor.u32 %v6868_v27, %v6148_v17  ;;  %v6112_v15 = vld [vmem:[%s10428_s1 + $0xda0] sm:$0xf]  ;;  %v6860_v1 = vld [vmem:[%s10428_s1 + $0xdb8] sm:$0xf0]  ;;  %v6109_v17 = vor.u32 %v6856_v13, %v6106_v3  ;;  %v6056_v13 = vld [vmem:[%s10428_s1 + $0xd30] sm:$0xf] }
 0x336   :  { %3726 = vmatpush.bf16.xpose.msra.mxu3 %v5965_v48  ;;  %v5937_v48 = vor.u32 %v6817_v35, %v5936_v7  ;;  %v6114_v7 = vld [vmem:[%s10428_s1 + $0xdbc] sm:$0xf0]  ;;  %v6121_v35 = vor.u32 %v6861_v4, %v6120_v51  ;;  %v6113_v27 = vor.u32 %v6860_v1, %v6112_v15  ;;  %v6854_v51 = vld [vmem:[%s10428_s1 + $0xd88] sm:$0xf0]  ;;  %v6050_v4 = vld [vmem:[%s10428_s1 + $0xd44] sm:$0xf0] }
 0x337   :  { %v3004_v61 = vsel %vm2810_vm0, %v6149_v45, 0  ;;  %v6093_v29 = vor.u32 %v6854_v51, %v6092_v16  ;;  %v6846_v3 = vld [vmem:[%s10428_s1 + $0xd48] sm:$0xf0]  ;;  %v6843_v15 = vld [vmem:[%s10428_s1 + $0xd34] sm:$0xf] }
 0x338   :  { %v6058_v1 = vld [vmem:[%s10428_s1 + $0xd4c] sm:$0xf0]  ;;  %v6835_v16 = vld [vmem:[%s10428_s1 + $0xcf4] sm:$0xf] }
 0x339   :  { %v2998_v45 = vsel %vm2810_vm0, %v6093_v29, 0  ;;  %v6022_v51 = vld [vmem:[%s10428_s1 + $0xd0c] sm:$0xf0] }
 0x33c   :  { %3685 = vmatpush.bf16.xpose.msra.mxu0 %v2959_v33 }
 0x33d   :  { %3699 = vmatpush.bf16.xpose.msra.mxu1 %v5929_v39  ;;  %3713 = vmatpush.bf16.xpose.msra.mxu2 %v5933_v41  ;;  %v6089_v41 = vor.u32 %v6850_v20, %v6086_v31  ;;  %v6025_v31 = vor.u32 %v6835_v16, %v6022_v51  ;;  %v5972_v16 = vld [vmem:[%s10428_s1 + $0xc88] sm:$0xf]  ;;  %v6825_v51 = vld [vmem:[%s10428_s1 + $0xca0] sm:$0xf0] }
 0x33e   :  { %3727 = vmatpush.bf16.xpose.msra.mxu3 %v5937_v48  ;;  %v6064_v48 = vld [vmem:[%s10428_s1 + $0xd38] sm:$0xf] }
 0x343   :  { %6156 = vmatmul.msk.bf16.vlgmr.msra.gmra.mxu0 %vm2810_vm0, %v7466_v46 }
 0x344   :  { %3734 = vmatpush.bf16.xpose.msrb.mxu0 %v6137_v62  ;;  %3714 = vmatmul.bf16.vlgmr.msra.gmra.mxu2 %v7288_v19  ;;  %v6849_v19 = vld [vmem:[%s10428_s1 + $0xd64] sm:$0xf]  ;;  %v6847_v62 = vld [vmem:[%s10428_s1 + $0xd50] sm:$0xf0] }
 0x345   :  { %3748 = vmatpush.bf16.xpose.msrb.mxu1 %v6141_v2  ;;  %3762 = vmatpush.bf16.xpose.msrb.mxu2 %v6145_v12  ;;  %v6857_v12 = vld [vmem:[%s10428_s1 + $0xda4] sm:$0xf]  ;;  %v6842_v2 = vld [vmem:[%s10428_s1 + $0xd2c] sm:$0xf] }
 0x346   :  { %3776 = vmatpush.bf16.xpose.msrb.mxu3 %v3004_v61  ;;  %v6117_v21 = vor.u32 %v6857_v12, %v6114_v7  ;;  %3700 = vmatmul.bf16.vlgmr.msra.gmra.mxu1 %v7260_v6  ;;  %v3001_v61 = vsel %vm2810_vm0, %v6121_v35, 0  ;;  %v6078_v6 = vld [vmem:[%s10428_s1 + $0xd7c] sm:$0xf0]  ;;  %v6065_v12 = vor.u32 %v6847_v62, %v6064_v48  ;;  %v6053_v7 = vor.u32 %v6842_v2, %v6050_v4  ;;  %v6828_v48 = vld [vmem:[%s10428_s1 + $0xcbc] sm:$0xf] }
 0x347   :  { %3728 = vmatmul.bf16.vlgmr.msra.gmra.mxu3 %v7265_v9  ;;  %v6084_v9 = vld [vmem:[%s10428_s1 + $0xd68] sm:$0xf]  ;;  %v6081_v33 = vor.u32 %v6849_v19, %v6078_v6  ;;  %v6057_v35 = vor.u32 %v6846_v3, %v6056_v13  ;;  %v6028_v19 = vld [vmem:[%s10428_s1 + $0xcf8] sm:$0xf]  ;;  %v6839_v6 = vld [vmem:[%s10428_s1 + $0xd10] sm:$0xf0] }
 0x348   :  { %v6085_v39 = vor.u32 %v6853_v23, %v6084_v9  ;;  %v6836_v9 = vld [vmem:[%s10428_s1 + $0xcfc] sm:$0xf]  ;;  %v6030_v23 = vld [vmem:[%s10428_s1 + $0xd14] sm:$0xf0]  ;;  %v6029_v29 = vor.u32 %v6839_v6, %v6028_v19  ;;  %v6000_v2 = vld [vmem:[%s10428_s1 + $0xcc0] sm:$0xf] }
 0x349   :  { %v5994_v62 = vld [vmem:[%s10428_s1 + $0xcd4] sm:$0xf0]  ;;  %v6832_v4 = vld [vmem:[%s10428_s1 + $0xcd8] sm:$0xf0]  ;;  %v6829_v13 = vld [vmem:[%s10428_s1 + $0xcc4] sm:$0xf] }
 0x34a   :  { %v6002_v3 = vld [vmem:[%s10428_s1 + $0xcdc] sm:$0xf0]  ;;  %v6822_v19 = vld [vmem:[%s10428_s1 + $0xc8c] sm:$0xf]  ;;  %v5974_v6 = vld [vmem:[%s10428_s1 + $0xca4] sm:$0xf0] }
 0x34c   :  { %3735 = vmatpush.bf16.xpose.msrb.mxu0 %v6109_v17  ;;  %v6061_v17 = vor.u32 %v6843_v15, %v6058_v1  ;;  %v5997_v1 = vor.u32 %v6828_v48, %v5994_v62  ;;  %v5944_v48 = vld [vmem:[%s10428_s1 + $0xc50] sm:$0xf]  ;;  %v6818_v62 = vld [vmem:[%s10428_s1 + $0xc68] sm:$0xf0] }
 0x34d   :  { %3749 = vmatpush.bf16.xpose.msrb.mxu1 %v6113_v27  ;;  %3763 = vmatpush.bf16.xpose.msrb.mxu2 %v6117_v21  ;;  %v2995_v27 = vsel %vm2810_vm0, %v6065_v12, 0  ;;  %v6036_v21 = vld [vmem:[%s10428_s1 + $0xd00] sm:$0xf]  ;;  %v6001_v12 = vor.u32 %v6832_v4, %v6000_v2  ;;  %v6815_v2 = vld [vmem:[%s10428_s1 + $0xc54] sm:$0xf] }
 0x34e   :  { %3777 = vmatpush.bf16.xpose.msrb.mxu3 %v3001_v61  ;;  %v6840_v61 = vld [vmem:[%s10428_s1 + $0xd18] sm:$0xf0]  ;;  %v5946_v4 = vld [vmem:[%s10428_s1 + $0xc6c] sm:$0xf0] }
 0x34f   :  { %v6037_v20 = vor.u32 %v6840_v61, %v6036_v21  ;;  %v6821_v21 = vld [vmem:[%s10428_s1 + $0xc84] sm:$0xf]  ;;  %v5966_v61 = vld [vmem:[%s10428_s1 + $0xc9c] sm:$0xf0] }
 0x354   :  { %3736 = vmatpush.bf16.xpose.msrb.mxu0 %v6081_v33  ;;  %v6033_v33 = vor.u32 %v6836_v9, %v6030_v23  ;;  %v5969_v23 = vor.u32 %v6821_v21, %v5966_v61  ;;  %v5949_v21 = vor.u32 %v6815_v2, %v5946_v4  ;;  %v6926_v61 = vld [vmem:[%s10429_s2 + $0x1cc] sm:$0xf] }
 0x355   :  { %3750 = vmatpush.bf16.xpose.msrb.mxu1 %v6085_v39  ;;  %3764 = vmatpush.bf16.xpose.msrb.mxu2 %v6089_v41  ;;  %v2992_v39 = vsel %vm2810_vm0, %v6037_v20, 0  ;;  %v6008_v41 = vld [vmem:[%s10428_s1 + $0xcc8] sm:$0xf]  ;;  %v5973_v20 = vor.u32 %v6825_v51, %v5972_v16  ;;  %v6394_v16 = vld [vmem:[%s10429_s2 + $0x1e8] sm:$0xf0] }
 0x356   :  { %3778 = vmatpush.bf16.xpose.msrb.mxu3 %v2998_v45  ;;  %v6833_v45 = vld [vmem:[%s10428_s1 + $0xce0] sm:$0xf0] }
 0x357   :  { %v6009_v15 = vor.u32 %v6833_v45, %v6008_v41  ;;  %v6814_v41 = vld [vmem:[%s10428_s1 + $0xc4c] sm:$0xf]  ;;  %v5938_v45 = vld [vmem:[%s10428_s1 + $0xc64] sm:$0xf0] }
 0x35c   :  { %3737 = vmatpush.bf16.xpose.msrb.mxu0 %v6053_v7  ;;  %v6005_v7 = vor.u32 %v6829_v13, %v6002_v3  ;;  %v6384_v3 = vld [vmem:[%s10429_s2 + $0x1c0] sm:$0xf] }
 0x35d   :  { %3751 = vmatpush.bf16.xpose.msrb.mxu1 %v6057_v35  ;;  %3765 = vmatpush.bf16.xpose.msrb.mxu2 %v6061_v17  ;;  %v2989_v35 = vsel %vm2810_vm0, %v6009_v15, 0  ;;  %v5980_v17 = vld [vmem:[%s10428_s1 + $0xc90] sm:$0xf]  ;;  %v6929_v15 = vld [vmem:[%s10429_s2 + $0x1dc] sm:$0xf0] }
 0x35e   :  { %3779 = vmatpush.bf16.xpose.msrb.mxu3 %v2995_v27  ;;  %v6826_v27 = vld [vmem:[%s10428_s1 + $0xca8] sm:$0xf0]  ;;  %v6385_v51 = vor.u32 %v6929_v15, %v6384_v3  ;;  %v6320_v3 = vld [vmem:[%s10429_s2 + $0x140] sm:$0xf]  ;;  %v6914_v15 = vld [vmem:[%s10429_s2 + $0x164] sm:$0xf0] }
 0x35f   :  { %v5981_v9 = vor.u32 %v6826_v27, %v5980_v17  ;;  %v6930_v17 = vld [vmem:[%s10429_s2 + $0x1e4] sm:$0xf0]  ;;  %v5945_v27 = vor.u32 %v6818_v62, %v5944_v48  ;;  %v6362_v48 = vld [vmem:[%s10429_s2 + $0x1a8] sm:$0xf0] }
 0x364   :  { %3738 = vmatpush.bf16.xpose.msrb.mxu0 %v6025_v31  ;;  %v5977_v31 = vor.u32 %v6822_v19, %v5974_v6 }
 0x365   :  { %3752 = vmatpush.bf16.xpose.msrb.mxu1 %v6029_v29  ;;  %3766 = vmatpush.bf16.xpose.msrb.mxu2 %v6033_v33  ;;  %v2986_v29 = vsel %vm2810_vm0, %v5981_v9, 0  ;;  %v5952_v33 = vld [vmem:[%s10428_s1 + $0xc58] sm:$0xf] }
 0x366   :  { %3780 = vmatpush.bf16.xpose.msrb.mxu3 %v2992_v39  ;;  %v6819_v39 = vld [vmem:[%s10428_s1 + $0xc70] sm:$0xf0] }
 0x367   :  { %v5953_v13 = vor.u32 %v6819_v39, %v5952_v33  ;;  %v6354_v33 = vld [vmem:[%s10429_s2 + $0x1a0] sm:$0xf0]  ;;  %v6360_v39 = vld [vmem:[%s10429_s2 + $0x188] sm:$0xf] }
 0x369   :  { %v2983_v19 = vsel %vm2810_vm0, %v5953_v13, 0 }
 0x36c   :  { %3739 = vmatpush.bf16.xpose.msrb.mxu0 %v5997_v1  ;;  %v6925_v1 = vld [vmem:[%s10429_s2 + $0x1c4] sm:$0xf] }
 0x36d   :  { %3753 = vmatpush.bf16.xpose.msrb.mxu1 %v6001_v12  ;;  %3767 = vmatpush.bf16.xpose.msrb.mxu2 %v6005_v7  ;;  %v5941_v12 = vor.u32 %v6814_v41, %v5938_v45  ;;  %v6386_v7 = vld [vmem:[%s10429_s2 + $0x1e0] sm:$0xf0]  ;;  %v6922_v41 = vld [vmem:[%s10429_s2 + $0x1a4] sm:$0xf0]  ;;  %v6918_v45 = vld [vmem:[%s10429_s2 + $0x18c] sm:$0xf] }
 0x36e   :  { %3781 = vmatpush.bf16.xpose.msrb.mxu3 %v2989_v35  ;;  %v6392_v35 = vld [vmem:[%s10429_s2 + $0x1c8] sm:$0xf]  ;;  %v6389_v6 = vor.u32 %v6925_v1, %v6386_v7  ;;  %v6361_v4 = vor.u32 %v6922_v41, %v6360_v39  ;;  %v6365_v13 = vor.u32 %v6918_v45, %v6362_v48  ;;  %v6910_v1 = vld [vmem:[%s10429_s2 + $0x14c] sm:$0xf]  ;;  %v6256_v39 = vld [vmem:[%s10429_s2 + $0xc0] sm:$0xf] }
 0x36f   :  { %v6393_v9 = vor.u32 %v6930_v17, %v6392_v35  ;;  %v6897_v41 = vld [vmem:[%s10429_s2 + $0xdc] sm:$0xf0]  ;;  %v6893_v45 = vld [vmem:[%s10429_s2 + $0xc4] sm:$0xf] }
 0x370   :  { %v6258_v48 = vld [vmem:[%s10429_s2 + $0xe0] sm:$0xf0] }
 0x374   :  { %3740 = vmatpush.bf16.xpose.msrb.mxu0 %v5969_v23  ;;  %v6397_v23 = vor.u32 %v6926_v61, %v6394_v16  ;;  %v6905_v61 = vld [vmem:[%s10429_s2 + $0x11c] sm:$0xf0]  ;;  %v6901_v16 = vld [vmem:[%s10429_s2 + $0x104] sm:$0xf] }
 0x375   :  { %3754 = vmatpush.bf16.xpose.msrb.mxu1 %v5973_v20  ;;  %3768 = vmatpush.bf16.xpose.msrb.mxu2 %v5977_v31  ;;  %v6352_v20 = vld [vmem:[%s10429_s2 + $0x180] sm:$0xf] }
 0x376   :  { %3782 = vmatpush.bf16.xpose.msrb.mxu3 %v2986_v29  ;;  %v6921_v31 = vld [vmem:[%s10429_s2 + $0x19c] sm:$0xf0]  ;;  %v6917_v29 = vld [vmem:[%s10429_s2 + $0x184] sm:$0xf] }
 0x377   :  { %v6353_v62 = vor.u32 %v6921_v31, %v6352_v20  ;;  %v6357_v2 = vor.u32 %v6917_v29, %v6354_v33 }
 0x37c   :  { %3741 = vmatpush.bf16.xpose.msrb.mxu0 %v5941_v12  ;;  %v6330_v12 = vld [vmem:[%s10429_s2 + $0x168] sm:$0xf0] }
 0x37d   :  { %3755 = vmatpush.bf16.xpose.msrb.mxu1 %v5945_v27  ;;  %3769 = vmatpush.bf16.xpose.msrb.mxu2 %v5949_v21  ;;  %v6333_v27 = vor.u32 %v6910_v1, %v6330_v12  ;;  %v6288_v21 = vld [vmem:[%s10429_s2 + $0x100] sm:$0xf]  ;;  %v6885_v1 = vld [vmem:[%s10429_s2 + $0x84] sm:$0xf] }
 0x37e   :  { %3783 = vmatpush.bf16.xpose.msrb.mxu3 %v2983_v19  ;;  %v6296_v19 = vld [vmem:[%s10429_s2 + $0x108] sm:$0xf]  ;;  %v6289_v20 = vor.u32 %v6905_v61, %v6288_v21  ;;  %v6226_v12 = vld [vmem:[%s10429_s2 + $0xa0] sm:$0xf0]  ;;  %v3032_v21 = vadd.f32 %v7893_v34, %v7888_v30  ;;  %v3130_v61 = vadd.f32 %v8313_v37, %v8130_v50  ;;  %v3228_v30 = vadd.f32 %v9009_v10, %v8989_v0  ;;  %v6192_v50 = vld [vmem:[%s10429_s2 + $0x40] sm:$0xf] }
 0x37f   :  { %v6881_v37 = vld [vmem:[%s10429_s2 + $0x5c] sm:$0xf0] }
 0x380   :  { %v3242_v0 = vadd.f32 %v9058_v55, %v3228_v30  ;;  %v6878_v55 = vld [vmem:[%s10429_s2 + $0x4c] sm:$0xf]  ;;  %v10448_v30 = vld [vmem:[#allocation14_spill] sm:$0xff] }
 0x383   :  { %3742 = vmatmul.bf16.vlgmr.msrb.gmra.mxu0 %v7302_v25  ;;  %v6913_v25 = vld [vmem:[%s10429_s2 + $0x15c] sm:$0xf0] }
 0x384   :  { %4198 = vmatpush.bf16.xpose.msra.mxu0 %v6385_v51  ;;  %3756 = vmatmul.bf16.vlgmr.msrb.gmra.mxu1 %v7455_v42  ;;  %v6909_v42 = vld [vmem:[%s10429_s2 + $0x144] sm:$0xf]  ;;  %v6321_v7 = vor.u32 %v6913_v25, %v6320_v3  ;;  %v6257_v3 = vor.u32 %v6897_v41, %v6256_v39  ;;  %v6261_v25 = vor.u32 %v6893_v45, %v6258_v48  ;;  %v10146_v41 = vpop.f32.mrf.mxu0 }
 0x385   :  { %4212 = vmatpush.bf16.xpose.msra.mxu1 %v6389_v6  ;;  %4226 = vmatpush.bf16.xpose.msra.mxu2 %v6393_v9  ;;  %v6290_v51 = vld [vmem:[%s10429_s2 + $0x120] sm:$0xf0]  ;;  %v6906_v6 = vld [vmem:[%s10429_s2 + $0x124] sm:$0xf0]  ;;  %v6902_v9 = vld [vmem:[%s10429_s2 + $0x10c] sm:$0xf] }
 0x386   :  { %4240 = vmatpush.bf16.xpose.msra.mxu3 %v6397_v23  ;;  %3770 = vmatmul.bf16.vlgmr.msrb.gmra.mxu2 %v7468_v47  ;;  %v6328_v47 = vld [vmem:[%s10429_s2 + $0x148] sm:$0xf]  ;;  %v6298_v23 = vld [vmem:[%s10429_s2 + $0x128] sm:$0xf0]  ;;  %v6293_v31 = vor.u32 %v6901_v16, %v6290_v51  ;;  %v6297_v29 = vor.u32 %v6906_v6, %v6296_v19  ;;  %v3324_v51 = vadd.f32 %v9110_v28, %v9079_v8  ;;  %v6194_v8 = vld [vmem:[%s10429_s2 + $0x60] sm:$0xf0] }
 0x387   :  { %6157 = vmatmul.msk.bf16.vlgmr.msrb.gmra.mxu3 %vm2810_vm0, %v7466_v46  ;;  %v6322_v46 = vld [vmem:[%s10429_s2 + $0x160] sm:$0xf0]  ;;  %v6329_v17 = vor.u32 %v6914_v15, %v6328_v47  ;;  %v6301_v33 = vor.u32 %v6902_v9, %v6298_v23  ;;  %v6224_v47 = vld [vmem:[%s10429_s2 + $0x80] sm:$0xf]  ;;  %v6229_v19 = vor.u32 %v6885_v1, %v6226_v12  ;;  %v3326_v9 = vadd.f32 %v9158_v24, %v9142_v11  ;;  %v6200_v28 = vld [vmem:[%s10429_s2 + $0x48] sm:$0xf] }
 0x388   :  { %v6325_v35 = vor.u32 %v6909_v42, %v6322_v46  ;;  %v6889_v15 = vld [vmem:[%s10429_s2 + $0x9c] sm:$0xf0]  ;;  %v3338_v34 = vadd.f32 %v9133_v60, %v3324_v51  ;;  %v6882_v60 = vld [vmem:[%s10429_s2 + $0x64] sm:$0xf0]  ;;  %v6202_v11 = vld [vmem:[%s10429_s2 + $0x68] sm:$0xf0] }
 0x389   :  { %v6225_v16 = vor.u32 %v6889_v15, %v6224_v47  ;;  %v3340_v10 = vadd.f32 %v9170_v40, %v3326_v9  ;;  %v6201_v48 = vor.u32 %v6882_v60, %v6200_v28  ;;  %v6927_v47 = vld [vmem:[%s10429_s2 + $0x1d4] sm:$0xf]  ;;  %v10442_v15 = vld [vmem:[#allocation6_spill] sm:$0xff]  ;;  %v10443_v12 = vld [vmem:[#allocation8_spill] sm:$0xff] }
 0x38a   :  { %v3352_v39 = vadd.f32 %v9185_v56, %v3338_v34  ;;  %v6160_v56 = vld [vmem:[%s10429_s2] sm:$0xf]  ;;  %v10449_v28 = vld [vmem:[#allocation5_spill] sm:$0xff] }
 0x38b   :  { %v3354_v40 = vadd.f32 %v9230_v49, %v3340_v10  ;;  %v3790_v60 = vmax.f32 %v10449_v28, 0.0 }
 0x38c   :  { %4199 = vmatpush.bf16.xpose.msra.mxu0 %v6353_v62  ;;  %v6264_v62 = vld [vmem:[%s10429_s2 + $0xc8] sm:$0xf] }
 0x38d   :  { %4213 = vmatpush.bf16.xpose.msra.mxu1 %v6357_v2  ;;  %4227 = vmatpush.bf16.xpose.msra.mxu2 %v6361_v4  ;;  %v6898_v2 = vld [vmem:[%s10429_s2 + $0xe4] sm:$0xf0]  ;;  %v6894_v4 = vld [vmem:[%s10429_s2 + $0xcc] sm:$0xf] }
 0x38e   :  { %4241 = vmatpush.bf16.xpose.msra.mxu3 %v6365_v13  ;;  %v6266_v13 = vld [vmem:[%s10429_s2 + $0xe8] sm:$0xf0]  ;;  %v6265_v42 = vor.u32 %v6898_v2, %v6264_v62  ;;  %v3256_v62 = vadd.f32 %v9047_v44, %v3242_v0  ;;  %v6205_v2 = vor.u32 %v6878_v55, %v6202_v11  ;;  %v10214_v0 = vpop.f32.mrf.mxu0  ;;  %v10450_v55 = vld [vmem:[#allocation7_spill] sm:$0xff] }
 0x38f   :  { %v6269_v46 = vor.u32 %v6894_v4, %v6266_v13  ;;  %v3368_v13 = vadd.f32 %v9232_v14, %v3354_v40  ;;  %v3791_v11 = vmax.f32 %v10450_v55, 0.0 }
 0x390   :  { %v3270_v49 = vadd.f32 %v9069_v58, %v3256_v62  ;;  %v6168_v58 = vld [vmem:[%s10429_s2 + $0x8] sm:$0xf] }
 0x394   :  { %4200 = vmatpush.bf16.xpose.msra.mxu0 %v6321_v7  ;;  %v6232_v7 = vld [vmem:[%s10429_s2 + $0x88] sm:$0xf] }
 0x395   :  { %4214 = vmatpush.bf16.xpose.msra.mxu1 %v6325_v35  ;;  %4228 = vmatpush.bf16.xpose.msra.mxu2 %v6329_v17  ;;  %v6890_v35 = vld [vmem:[%s10429_s2 + $0xa4] sm:$0xf0]  ;;  %v6886_v17 = vld [vmem:[%s10429_s2 + $0x8c] sm:$0xf] }
 0x396   :  { %4242 = vmatpush.bf16.xpose.msra.mxu3 %v6333_v27  ;;  %v6234_v27 = vld [vmem:[%s10429_s2 + $0xa8] sm:$0xf0]  ;;  %v6233_v6 = vor.u32 %v6890_v35, %v6232_v7  ;;  %v10444_v35 = vld [vmem:[#allocation9_spill] sm:$0xff] }
 0x397   :  { %v6237_v23 = vor.u32 %v6886_v17, %v6234_v27  ;;  %v3284_v17 = vadd.f32 %v10444_v35, %v3270_v49  ;;  %v6338_v35 = vld [vmem:[%s10429_s2 + $0x170] sm:$0xf0] }
 0x39c   :  { %4201 = vmatpush.bf16.xpose.msra.mxu0 %v6289_v20  ;;  %v10107_v20 = vpop.f32.mrf.mxu3 }
 0x39d   :  { %4215 = vmatpush.bf16.xpose.msra.mxu1 %v6293_v31  ;;  %4229 = vmatpush.bf16.xpose.msra.mxu2 %v6297_v29  ;;  %v3046_v31 = vadd.f32 %v7915_v43, %v3032_v21  ;;  %v3144_v29 = vadd.f32 %v8317_v59, %v3130_v61  ;;  %v6877_v43 = vld [vmem:[%s10429_s2 + $0x44] sm:$0xf]  ;;  %v6408_v21 = vld [vmem:[%s10429_s2 + $0x1d8] sm:$0xf] }
 0x39e   :  { %4243 = vmatpush.bf16.xpose.msra.mxu3 %v6301_v33  ;;  %v6193_v33 = vor.u32 %v6881_v37, %v6192_v50  ;;  %v6197_v45 = vor.u32 %v6877_v43, %v6194_v8  ;;  %v6932_v61 = vld [vmem:[%s10429_s2 + $0x1f4] sm:$0xf0]  ;;  %v10210_v50 = vpop.f32.mrf.mxu1 }
 0x39f   :  { %v3158_v59 = vadd.f32 %v8398_v53, %v3144_v29  ;;  %v3254_v53 = vadd.f32 %v9017_v18, %v8560_v52  ;;  %v3060_v24 = vadd.f32 %v8055_v63, %v3046_v31  ;;  %v10447_v31 = vld [vmem:[#allocation11_spill] sm:$0xff]  ;;  %v6409_v8 = vor.u32 %v6932_v61, %v6408_v21 }
 0x3a0   :  { %v3298_v29 = vadd.f32 %v10447_v31, %v3284_v17  ;;  %v6344_v17 = vld [vmem:[%s10429_s2 + $0x158] sm:$0xf]  ;;  %v6304_v31 = vld [vmem:[%s10429_s2 + $0x110] sm:$0xf] }
 0x3a1   :  { %v3074_v52 = vadd.f32 %v8099_v32, %v3060_v24  ;;  %v3172_v18 = vadd.f32 %v8400_v54, %v3158_v59  ;;  %v3268_v4 = vadd.f32 %v9019_v22, %v3254_v53  ;;  %v6873_v32 = vld [vmem:[%s10429_s2 + $0x1c] sm:$0xf0]  ;;  %v3366_v54 = vadd.f32 %v9187_v57, %v3352_v39  ;;  %v6162_v22 = vld [vmem:[%s10429_s2 + $0x20] sm:$0xf0]  ;;  %v10212_v59 = vpop.f32.mrf.mxu2 }
 0x3a2   :  { %v3382_v57 = vadd.f32 %v9235_v5, %v3368_v13  ;;  %v6931_v5 = vld [vmem:[%s10429_s2 + $0x1ec] sm:$0xf0]  ;;  %v6161_v27 = vor.u32 %v6873_v32, %v6160_v56  ;;  %v6370_v13 = vld [vmem:[%s10429_s2 + $0x1b0] sm:$0xf0]  ;;  %v6376_v56 = vld [vmem:[%s10429_s2 + $0x198] sm:$0xf] }
 0x3a3   :  { %v3186_v63 = vadd.f32 %v8529_v26, %v3172_v18  ;;  %v6869_v26 = vld [vmem:[%s10429_s2 + $0x4] sm:$0xf]  ;;  %v3088_v14 = vadd.f32 %v8110_v38, %v3074_v52  ;;  %v6400_v38 = vld [vmem:[%s10429_s2 + $0x1d0] sm:$0xf]  ;;  %v6928_v52 = vld [vmem:[%s10429_s2 + $0x1dc] sm:$0xf] }
 0x3a4   :  { %4202 = vmatpush.bf16.xpose.msra.mxu0 %v6257_v3  ;;  %v10162_v44 = vpop.f32.mrf.mxu3  ;;  %v6874_v3 = vld [vmem:[%s10429_s2 + $0x24] sm:$0xf0]  ;;  %v6165_v9 = vor.u32 %v6869_v26, %v6162_v22  ;;  %v3396_v34 = vadd.f32 %v10448_v30, %v3382_v57  ;;  %v6401_v43 = vor.u32 %v6931_v5, %v6400_v38  ;;  %v6410_v18 = vld [vmem:[%s10429_s2 + $0x1f8] sm:$0xf0]  ;;  %v6924_v32 = vld [vmem:[%s10429_s2 + $0x1b4] sm:$0xf0] }
 0x3a5   :  { %4216 = vmatpush.bf16.xpose.msra.mxu1 %v6261_v25  ;;  %4230 = vmatpush.bf16.xpose.msra.mxu2 %v6265_v42  ;;  %v6870_v25 = vld [vmem:[%s10429_s2 + $0xc] sm:$0xf]  ;;  %v3102_v1 = vadd.f32 %v10442_v15, %v3088_v14  ;;  %v3200_v7 = vadd.f32 %v10443_v12, %v3186_v63  ;;  %v6919_v63 = vld [vmem:[%s10429_s2 + $0x194] sm:$0xf]  ;;  %v6413_v49 = vor.u32 %v6928_v52, %v6410_v18  ;;  %v6920_v5 = vld [vmem:[%s10429_s2 + $0x19c] sm:$0xf] }
 0x3a6   :  { %4244 = vmatpush.bf16.xpose.msra.mxu3 %v6269_v46  ;;  %v6170_v42 = vld [vmem:[%s10429_s2 + $0x28] sm:$0xf0]  ;;  %v3282_v46 = vadd.f32 %v9045_v36, %v3268_v4  ;;  %v6402_v36 = vld [vmem:[%s10429_s2 + $0x1f0] sm:$0xf0]  ;;  %v6923_v4 = vld [vmem:[%s10429_s2 + $0x1ac] sm:$0xf0] }
 0x3a7   :  { %v6173_v37 = vor.u32 %v6870_v25, %v6170_v42  ;;  %v6405_v10 = vor.u32 %v6927_v47, %v6402_v36  ;;  %v3798_v53 = vmax.f32 %v3102_v1, 0.0  ;;  %v3799_v24 = vmax.f32 %v3200_v7, 0.0  ;;  %v6378_v47 = vld [vmem:[%s10429_s2 + $0x1b8] sm:$0xf0]  ;;  %v6336_v15 = vld [vmem:[%s10429_s2 + $0x150] sm:$0xf] }
 0x3a8   :  { %v6373_v25 = vor.u32 %v6919_v63, %v6370_v13  ;;  %v6377_v42 = vor.u32 %v6924_v32, %v6376_v56  ;;  %v6915_v1 = vld [vmem:[%s10429_s2 + $0x16c] sm:$0xf0]  ;;  %v6911_v12 = vld [vmem:[%s10429_s2 + $0x154] sm:$0xf]  ;;  %v6381_v7 = vor.u32 %v6920_v5, %v6378_v47  ;;  %v6896_v32 = vld [vmem:[%s10429_s2 + $0xdc] sm:$0xf] }
 0x3a9   :  { %v3807_v22 = vpack.c.bf16 %v3799_v24, %v3791_v11  ;;  %v10249_v38 = vpop.f32.mrf.mxu2  ;;  %v6337_v21 = vor.u32 %v6915_v1, %v6336_v15  ;;  %v6341_v61 = vor.u32 %v6911_v12, %v6338_v35  ;;  %v6903_v30 = vld [vmem:[%s10429_s2 + $0x114] sm:$0xf]  ;;  %v6904_v11 = vld [vmem:[%s10429_s2 + $0x11c] sm:$0xf]  ;;  %v6248_v5 = vld [vmem:[%s10429_s2 + $0x98] sm:$0xf]  ;;  %v3520_v35 = vadd.f32 %v10146_v41, %v10107_v20 }
 0x3aa   :  { %v6314_v24 = vld [vmem:[%s10429_s2 + $0x138] sm:$0xf0]  ;;  %v6274_v18 = vld [vmem:[%s10429_s2 + $0xf0] sm:$0xf0]  ;;  %v6892_v47 = vld [vmem:[%s10429_s2 + $0xb4] sm:$0xf0] }
 0x3ab   :  { %v6317_v52 = vor.u32 %v6904_v11, %v6314_v24  ;;  %v6208_v20 = vld [vmem:[%s10429_s2 + $0x50] sm:$0xf] }
 0x3ac   :  { %4203 = vmatpush.bf16.xpose.msra.mxu0 %v6225_v16  ;;  %v10445_v16 = vld [vmem:[#allocation10_spill] sm:$0xff]  ;;  %v10225_v62 = vpop.f32.mrf.mxu3  ;;  %v6883_v41 = vld [vmem:[%s10429_s2 + $0x6c] sm:$0xf0] }
 0x3ad   :  { %4217 = vmatpush.bf16.xpose.msra.mxu1 %v6229_v19  ;;  %4231 = vmatpush.bf16.xpose.msra.mxu2 %v6233_v6  ;;  %v3296_v51 = vadd.f32 %v10445_v16, %v3282_v46  ;;  %v10446_v19 = vld [vmem:[#allocation12_spill] sm:$0xff]  ;;  %v10247_v46 = vpop.f32.mrf.mxu1 }
 0x3ae   :  { %4245 = vmatpush.bf16.xpose.msra.mxu3 %v6237_v23  ;;  %v3380_v6 = vadd.f32 %v10446_v19, %v3366_v54  ;;  %v6169_v23 = vor.u32 %v6874_v3, %v6168_v58  ;;  %v3806_v54 = vpack.c.bf16 %v3798_v53, %v3790_v60  ;;  %v10245_v3 = vpop.f32.mrf.mxu0 }
 0x3af   :  { %v3792_v40 = vmax.f32 %v3296_v51, 0.0 }
 0x3b4   :  { %4204 = vmatpush.bf16.xpose.msra.mxu0 %v6193_v33  ;;  %v10451_v33 = vld [vmem:[#allocation13_spill] sm:$0xff]  ;;  %v10275_v36 = vpop.f32.mrf.mxu3 }
 0x3b5   :  { %4218 = vmatpush.bf16.xpose.msra.mxu1 %v6197_v45  ;;  %4232 = vmatpush.bf16.xpose.msra.mxu2 %v6201_v48  ;;  %v3394_v39 = vadd.f32 %v10451_v33, %v3380_v6  ;;  %v3800_v45 = vmax.f32 %v3298_v29, 0.0  ;;  %v3801_v48 = vmax.f32 %v3396_v34, 0.0  ;;  %v10277_v51 = vpop.f32.mrf.mxu1  ;;  %v3603_v6 = vpop.f32.mrf.mxu2  ;;  %v6907_v29 = vld [vmem:[%s10429_s2 + $0x12c] sm:$0xf0] }
 0x3b6   :  { %4246 = vmatpush.bf16.xpose.msra.mxu3 %v6205_v2  ;;  %v6368_v2 = vld [vmem:[%s10429_s2 + $0x190] sm:$0xf]  ;;  %v10279_v19 = vpop.f32.mrf.mxu0  ;;  %v6305_v28 = vor.u32 %v6907_v29, %v6304_v31 }
 0x3b7   :  { %v3793_v26 = vmax.f32 %v3394_v39, 0.0  ;;  %v3808_v58 = vpack.c.bf16 %v3800_v45, %v3792_v40  ;;  %v6369_v14 = vor.u32 %v6923_v4, %v6368_v2  ;;  %v6272_v39 = vld [vmem:[%s10429_s2 + $0xd0] sm:$0xf]  ;;  %v6280_v2 = vld [vmem:[%s10429_s2 + $0xd8] sm:$0xf] }
 0x3b8   :  { %v6899_v45 = vld [vmem:[%s10429_s2 + $0xec] sm:$0xf0]  ;;  %v6900_v4 = vld [vmem:[%s10429_s2 + $0xf4] sm:$0xf0] }
 0x3b9   :  { %v3809_v57 = vpack.c.bf16 %v3801_v48, %v3793_v26  ;;  %v6895_v48 = vld [vmem:[%s10429_s2 + $0xd4] sm:$0xf]  ;;  %v6273_v63 = vor.u32 %v6899_v45, %v6272_v39  ;;  %v6281_v56 = vor.u32 %v6900_v4, %v6280_v2  ;;  %v6880_v39 = vld [vmem:[%s10429_s2 + $0x5c] sm:$0xf] }
 0x3ba   :  { %v6277_v13 = vor.u32 %v6895_v48, %v6274_v18  ;;  %v6871_v48 = vld [vmem:[%s10429_s2 + $0x14] sm:$0xf] }
 0x3bc   :  { %4205 = vmatpush.bf16.xpose.msra.mxu0 %v6161_v27  ;;  %v6916_v27 = vld [vmem:[%s10429_s2 + $0x174] sm:$0xf0] }
 0x3bd   :  { %4219 = vmatpush.bf16.xpose.msra.mxu1 %v6165_v9  ;;  %4233 = vmatpush.bf16.xpose.msra.mxu2 %v6169_v23  ;;  %v6345_v16 = vor.u32 %v6916_v27, %v6344_v17  ;;  %v6912_v9 = vld [vmem:[%s10429_s2 + $0x15c] sm:$0xf]  ;;  %v10311_v40 = vpop.f32.mrf.mxu1  ;;  %v3605_v33 = vpop.f32.mrf.mxu2  ;;  %v3522_v17 = vadd.f32 %v10214_v0, %v10162_v44  ;;  %v6879_v44 = vld [vmem:[%s10429_s2 + $0x54] sm:$0xf] }
 0x3be   :  { %4247 = vmatpush.bf16.xpose.msra.mxu3 %v6173_v37  ;;  %v6346_v23 = vld [vmem:[%s10429_s2 + $0x178] sm:$0xf0]  ;;  %v6306_v37 = vld [vmem:[%s10429_s2 + $0x130] sm:$0xf0]  ;;  %v3631_v55 = vpop.f32.mrf.mxu0 }
 0x3bf   :  { %v6349_v34 = vor.u32 %v6912_v9, %v6346_v23  ;;  %v6309_v60 = vor.u32 %v6903_v30, %v6306_v37  ;;  %v6250_v9 = vld [vmem:[%s10429_s2 + $0xb8] sm:$0xf0]  ;;  %v3536_v31 = vadd.f32 %v10247_v46, %v3522_v17  ;;  %v6216_v37 = vld [vmem:[%s10429_s2 + $0x58] sm:$0xf] }
 0x3c3   :  { %4206 = vmatmul.bf16.vlgmr.msra.gmra.mxu0 %v3806_v54  ;;  %v6282_v54 = vld [vmem:[%s10429_s2 + $0xf8] sm:$0xf0] }
 0x3c4   :  { %4254 = vmatpush.bf16.xpose.msrb.mxu0 %v6401_v43  ;;  %4220 = vmatmul.bf16.vlgmr.msra.gmra.mxu1 %v3807_v22  ;;  %v6312_v43 = vld [vmem:[%s10429_s2 + $0x118] sm:$0xf] }
 0x3c5   :  { %4268 = vmatpush.bf16.xpose.msrb.mxu1 %v6405_v10  ;;  %4282 = vmatpush.bf16.xpose.msrb.mxu2 %v6409_v8  ;;  %v6908_v10 = vld [vmem:[%s10429_s2 + $0x134] sm:$0xf0]  ;;  %v3617_v8 = vpop.f32.mrf.mxu3  ;;  %v3645_v26 = vpop.f32.mrf.mxu1 }
 0x3c6   :  { %4296 = vmatpush.bf16.xpose.msrb.mxu3 %v6413_v49  ;;  %4234 = vmatmul.bf16.vlgmr.msra.gmra.mxu2 %v3808_v58  ;;  %v6313_v53 = vor.u32 %v6908_v10, %v6312_v43  ;;  %v3633_v22 = vpop.f32.mrf.mxu0  ;;  %v6240_v58 = vld [vmem:[%s10429_s2 + $0x90] sm:$0xf]  ;;  %v3659_v15 = vpop.f32.mrf.mxu2  ;;  %v3618_v27 = vadd.f32 %v3617_v8, %v3603_v6  ;;  %v3534_v6 = vadd.f32 %v10210_v50, %v3520_v35  ;;  %v6884_v43 = vld [vmem:[%s10429_s2 + $0x74] sm:$0xf0] }
 0x3c7   :  { %4248 = vmatmul.bf16.vlgmr.msra.gmra.mxu3 %v3809_v57  ;;  %v6887_v57 = vld [vmem:[%s10429_s2 + $0x94] sm:$0xf]  ;;  %v3550_v50 = vadd.f32 %v10249_v38, %v3536_v31  ;;  %v6209_v8 = vor.u32 %v6883_v41, %v6208_v20  ;;  %v6218_v38 = vld [vmem:[%s10429_s2 + $0x78] sm:$0xf0] }
 0x3c8   :  { %v3632_v29 = vadd.f32 %v3631_v55, %v3618_v27  ;;  %v10452_v27 = vld [vmem:[#allocation15_spill] sm:$0xff] }
 0x3c9   :  { %v3564_v24 = vadd.f32 %v10275_v36, %v3550_v50  ;;  %v6875_v36 = vld [vmem:[%s10429_s2 + $0x2c] sm:$0xf0] }
 0x3ca   :  { %v3646_v55 = vadd.f32 %v3645_v26, %v3632_v29 }
 0x3cb   :  { %v3578_v2 = vadd.f32 %v10279_v19, %v3564_v24 }
 0x3cc   :  { %4255 = vmatpush.bf16.xpose.msrb.mxu0 %v6369_v14  ;;  %v6891_v14 = vld [vmem:[%s10429_s2 + $0xac] sm:$0xf0]  ;;  %v3660_v4 = vadd.f32 %v3659_v15, %v3646_v55 }
 0x3cd   :  { %4269 = vmatpush.bf16.xpose.msrb.mxu1 %v6373_v25  ;;  %4283 = vmatpush.bf16.xpose.msrb.mxu2 %v6377_v42  ;;  %v3619_v49 = vpop.f32.mrf.mxu3  ;;  %v6285_v25 = vor.u32 %v6896_v32, %v6282_v54  ;;  %v6242_v42 = vld [vmem:[%s10429_s2 + $0xb0] sm:$0xf0]  ;;  %v6241_v1 = vor.u32 %v6891_v14, %v6240_v58  ;;  %v3647_v10 = vpop.f32.mrf.mxu1 }
 0x3ce   :  { %4297 = vmatpush.bf16.xpose.msrb.mxu3 %v6381_v7  ;;  %v6245_v12 = vor.u32 %v6887_v57, %v6242_v42  ;;  %v6249_v7 = vor.u32 %v6892_v47, %v6248_v5  ;;  %v3687_v23 = vpop.f32.mrf.mxu0  ;;  %v3661_v46 = vpop.f32.mrf.mxu2  ;;  %v6872_v42 = vld [vmem:[%s10429_s2 + $0x1c] sm:$0xf] }
 0x3d4   :  { %4256 = vmatpush.bf16.xpose.msrb.mxu0 %v6337_v21 }
 0x3d5   :  { %4270 = vmatpush.bf16.xpose.msrb.mxu1 %v6341_v61  ;;  %4284 = vmatpush.bf16.xpose.msrb.mxu2 %v6345_v16  ;;  %v3673_v21 = vpop.f32.mrf.mxu3  ;;  %v3620_v61 = vadd.f32 %v3619_v49, %v3605_v33  ;;  %v6888_v16 = vld [vmem:[%s10429_s2 + $0x9c] sm:$0xf]  ;;  %v6184_v49 = vld [vmem:[%s10429_s2 + $0x18] sm:$0xf]  ;;  %v3701_v5 = vpop.f32.mrf.mxu1 }
 0x3d6   :  { %4298 = vmatpush.bf16.xpose.msrb.mxu3 %v6349_v34  ;;  %v6253_v0 = vor.u32 %v6888_v16, %v6250_v9  ;;  %v6210_v34 = vld [vmem:[%s10429_s2 + $0x70] sm:$0xf0]  ;;  %v3674_v58 = vadd.f32 %v3673_v21, %v3660_v4 }
 0x3d7   :  { %v3634_v30 = vadd.f32 %v3633_v22, %v3620_v61  ;;  %v3592_v22 = vadd.f32 %v10311_v40, %v3578_v2 }
 0x3d9   :  { %v3648_v11 = vadd.f32 %v3647_v10, %v3634_v30  ;;  %v3803_v15 = vmax.f32 %v3592_v22, 0.0 }
 0x3db   :  { %v3662_v33 = vadd.f32 %v3661_v46, %v3648_v11 }
 0x3dc   :  { %4257 = vmatpush.bf16.xpose.msrb.mxu0 %v6305_v28  ;;  %v6213_v28 = vor.u32 %v6879_v44, %v6210_v34 }
 0x3dd   :  { %4271 = vmatpush.bf16.xpose.msrb.mxu1 %v6309_v60  ;;  %4285 = vmatpush.bf16.xpose.msrb.mxu2 %v6313_v53  ;;  %v6217_v60 = vor.u32 %v6884_v43, %v6216_v37  ;;  %v3548_v53 = vadd.f32 %v10212_v59, %v3534_v6  ;;  %v3675_v45 = vpop.f32.mrf.mxu3  ;;  %v6176_v59 = vld [vmem:[%s10429_s2 + $0x10] sm:$0xf]  ;;  %v3703_v21 = vpop.f32.mrf.mxu1 }
 0x3de   :  { %4299 = vmatpush.bf16.xpose.msrb.mxu3 %v6317_v52  ;;  %v6221_v52 = vor.u32 %v6880_v39, %v6218_v38  ;;  %v6177_v54 = vor.u32 %v6875_v36, %v6176_v59 }
 0x3df   :  { %v3562_v18 = vadd.f32 %v10225_v62, %v3548_v53  ;;  %v3676_v62 = vadd.f32 %v3675_v45, %v3662_v33 }
 0x3e1   :  { %v3576_v32 = vadd.f32 %v10245_v3, %v3562_v18  ;;  %v6186_v3 = vld [vmem:[%s10429_s2 + $0x38] sm:$0xf0] }
 0x3e2   :  { %v6189_v47 = vor.u32 %v6872_v42, %v6186_v3 }
 0x3e3   :  { %v3590_v57 = vadd.f32 %v10277_v51, %v3576_v32  ;;  %v3715_v51 = vpop.f32.mrf.mxu2 }
 0x3e4   :  { %4258 = vmatpush.bf16.xpose.msrb.mxu0 %v6273_v63  ;;  %v6178_v63 = vld [vmem:[%s10429_s2 + $0x30] sm:$0xf0]  ;;  %v3716_v16 = vadd.f32 %v3715_v51, %v3701_v5 }
 0x3e5   :  { %4272 = vmatpush.bf16.xpose.msrb.mxu1 %v6277_v13  ;;  %4286 = vmatpush.bf16.xpose.msrb.mxu2 %v6281_v56  ;;  %v6876_v13 = vld [vmem:[%s10429_s2 + $0x34] sm:$0xf0]  ;;  %v3689_v56 = vpop.f32.mrf.mxu0  ;;  %v6181_v19 = vor.u32 %v6871_v48, %v6178_v63  ;;  %v3729_v17 = vpop.f32.mrf.mxu3  ;;  %s6962_s2 = smov [#allocation2]  }
 0x3e6   :  { %4300 = vmatpush.bf16.xpose.msrb.mxu3 %v6285_v25  ;;  %v6185_v26 = vor.u32 %v6876_v13, %v6184_v49  ;;  %v3690_v14 = vadd.f32 %v3689_v56, %v3676_v62  ;;  %v3688_v25 = vadd.f32 %v3687_v23, %v3674_v58  ;;  %v3730_v41 = vadd.f32 %v3729_v17, %v3716_v16  ;;  %s4316_s18 = sshll.u32 %s6962_s2, 4  ;;  %s4317_s18 = int_to_ptr.vmem [resolvable:$true] %s4316_s18 }
 0x3e8   :  { %v3804_v40 = vmax.f32 %v3690_v14, 0.0 }
 0x3eb   :  { %v3717_v61 = vpop.f32.mrf.mxu2 }
 0x3ec   :  { %4259 = vmatpush.bf16.xpose.msrb.mxu0 %v6241_v1  ;;  %v3795_v1 = vmax.f32 %v3590_v57, 0.0  ;;  %v3718_v44 = vadd.f32 %v3717_v61, %v3703_v21 }
 0x3ed   :  { %4273 = vmatpush.bf16.xpose.msrb.mxu1 %v6245_v12  ;;  %4287 = vmatpush.bf16.xpose.msrb.mxu2 %v6249_v7  ;;  %v3796_v12 = vmax.f32 %v3688_v25, 0.0  ;;  %v3731_v9 = vpop.f32.mrf.mxu3 }
 0x3ee   :  { %4301 = vmatpush.bf16.xpose.msrb.mxu3 %v6253_v0  ;;  %v3811_v7 = vpack.c.bf16 %v3803_v15, %v3795_v1  ;;  %v3732_v31 = vadd.f32 %v3731_v9, %v3718_v44 }
 0x3ef   :  { %v3812_v35 = vpack.c.bf16 %v3804_v40, %v3796_v12 }
 0x3f4   :  { %4260 = vmatpush.bf16.xpose.msrb.mxu0 %v6209_v8 }
 0x3f5   :  { %4274 = vmatpush.bf16.xpose.msrb.mxu1 %v6213_v28  ;;  %4288 = vmatpush.bf16.xpose.msrb.mxu2 %v6217_v60 }
 0x3f6   :  { %4302 = vmatpush.bf16.xpose.msrb.mxu3 %v6221_v52 }
 0x3fc   :  { %4261 = vmatpush.bf16.xpose.msrb.mxu0 %v6177_v54 }
 0x3fd   :  { %4275 = vmatpush.bf16.xpose.msrb.mxu1 %v6181_v19  ;;  %4289 = vmatpush.bf16.xpose.msrb.mxu2 %v6185_v26 }
 0x3fe   :  { %4303 = vmatpush.bf16.xpose.msrb.mxu3 %v6189_v47 }
 0x400   :  { %v3743_v23 = vpop.f32.mrf.mxu0 }
 0x401   :  { %v3757_v20 = vpop.f32.mrf.mxu1  ;;  %v3744_v0 = vadd.f32 %v3743_v23, %v3730_v41 }
 0x403   :  { %4262 = vmatmul.bf16.vlgmr.msrb.gmra.mxu0 %v10452_v27  ;;  %v3758_v34 = vadd.f32 %v3757_v20, %v3744_v0 }
 0x404   :  { %4276 = vmatmul.bf16.vlgmr.msrb.gmra.mxu1 %v3811_v7  ;;  %4290 = vmatmul.bf16.vlgmr.msrb.gmra.mxu2 %v3812_v35 }
 0x408   :  { %v3745_v30 = vpop.f32.mrf.mxu0 }
 0x409   :  { %v3771_v6 = vpop.f32.mrf.mxu2  ;;  %v3746_v37 = vadd.f32 %v3745_v30, %v3732_v31  ;;  %v3759_v10 = vpop.f32.mrf.mxu1 }
 0x40a   :  { %v3785_v29 = vpop.f32.mrf.mxu3  ;;  %v3772_v43 = vadd.f32 %v3771_v6, %v3758_v34 }
 0x40b   :  { %v3760_v50 = vadd.f32 %v3759_v10, %v3746_v37 }
 0x40c   :  { %v3786_v46 = vadd.f32 %v3785_v29, %v3772_v43 }
 0x40e   :  { %v3797_v55 = vmax.f32 %v3786_v46, 0.0 }
 0x411   :  { %v3773_v8 = vpop.f32.mrf.mxu2 }
 0x412   :  { %v3774_v28 = vadd.f32 %v3773_v8, %v3760_v50  ;;  %v3787_v60 = vpop.f32.mrf.mxu3 }
 0x414   :  { %v3788_v53 = vadd.f32 %v3787_v60, %v3774_v28 }
 0x416   :  { %v3805_v11 = vmax.f32 %v3788_v53, 0.0 }
 0x418   :  { %v3813_v24 = vpack.c.bf16 %v3805_v11, %v3797_v55 }
 0x41a   :  { %4304 = vmatmul.bf16.vlgmr.msrb.gmra.mxu3 %v3813_v24 }
 0x440   :  { %v4207_v33 = vpop.f32.mrf.mxu0 }
 0x441   :  { %v4221_v39 = vpop.f32.mrf.mxu1 }
 0x442   :  { %v4222_v36 = vadd.f32 %v4221_v39, %v4207_v33 }
 0x448   :  { %v4209_v45 = vpop.f32.mrf.mxu0 }
 0x449   :  { %v4235_v38 = vpop.f32.mrf.mxu2  ;;  %v4223_v48 = vpop.f32.mrf.mxu1 }
 0x44a   :  { %v4249_v59 = vpop.f32.mrf.mxu3  ;;  %v4236_v18 = vadd.f32 %v4235_v38, %v4222_v36  ;;  %v4224_v49 = vadd.f32 %v4223_v48, %v4209_v45 }
 0x44c   :  { %v4250_v4 = vadd.f32 %v4249_v59, %v4236_v18 }
 0x451   :  { %v4237_v52 = vpop.f32.mrf.mxu2 }
 0x452   :  { %v4251_v63 = vpop.f32.mrf.mxu3  ;;  %v4238_v62 = vadd.f32 %v4237_v52, %v4224_v49 }
 0x454   :  { %v4252_v26 = vadd.f32 %v4251_v63, %v4238_v62 }
 0x480   :  { %v4263_v2 = vpop.f32.mrf.mxu0 }
 0x481   :  { %v4264_v13 = vadd.f32 %v4263_v2, %v4250_v4  ;;  %v4277_v56 = vpop.f32.mrf.mxu1 }
 0x483   :  { %v4278_v54 = vadd.f32 %v4277_v56, %v4264_v13 }
 0x487   :  { %v4291_v32 = vpop.f32.mrf.mxu2 }
 0x488   :  { %v4265_v19 = vpop.f32.mrf.mxu0  ;;  %v4292_v22 = vadd.f32 %v4291_v32, %v4278_v54 }
 0x489   :  { %v4266_v14 = vadd.f32 %v4265_v19, %v4252_v26  ;;  %v4279_v25 = vpop.f32.mrf.mxu1 }
 0x48b   :  { %v4280_v3 = vadd.f32 %v4279_v25, %v4266_v14 }
 0x48f   :  { %v4293_v42 = vpop.f32.mrf.mxu2 }
 0x490   :  { %v4294_v5 = vadd.f32 %v4293_v42, %v4280_v3 }
 0x49d   :  { %v4305_v58 = vpop.f32.mrf.mxu3 }
 0x49e   :  { %v4306_v57 = vadd.f32 %v4305_v58, %v4292_v22 }
 0x4a0   :  { %4310 = vst [vmem:[#allocation2] sm:$0xff] %v4306_v57 }
 0x4a5   :  { %v4307_v47 = vpop.f32.mrf.mxu3 }
 0x4a6   :  { %v4308_v15 = vadd.f32 %v4307_v47, %v4294_v5 }
 0x4a8   :  { %4311 = vst [vmem:[#allocation2 + $0x8] sm:$0xff] %v4308_v15 }
 0x4a9   :  { %4324 = dma.vmem_to_hbm [thread:$0]  %s4317_s18, 256, %s4319_s0, [#allocation3], %s6963_s21, %s6963_s21, %s6964_s22  }
 0x4aa   :  { %6960 = dma.done.wait [#allocation3], 256  }
 0x4ab   :  { %6961 = vsyncadd [#allocation3], 4294967040 }
 0x4ac   :  { %4329 = vsyncpa [#allocation3], 1 }

</bundles_post_ra>
